<compile_context>
chip_gen: v6e
topology: v6e:2x2x1
jax: 0.10.0
libtpu: 0.0.40
codegen_flags: <defaults>
</compile_context>

<pallas_src>
import math

import jax
import jax.numpy as jnp
from jax.experimental import pallas as pl
from jax.experimental.pallas import tpu as pltpu

# ----------------------- synthetic encoder config -----------------------
B = 2                       # batch
C = 4                       # image channels
IMG = 16                    # image H = W
PATCH = 4                   # patch size
HP = IMG // PATCH           # patches per side
N = HP * HP                 # num_patches = 16
BN = B * N                  # batch folded into rows = 32
PATCH_DIM = PATCH * PATCH * C   # pixel_values_per_patch = 64
DIM = 32                    # encoder_dim
HEADS = 4
DIM_HEAD = 8
INNER = HEADS * DIM_HEAD    # 32
MLP_DIM = 64
DEPTH = 2
MASKING_RATIO = 0.5
NUM_MASKED = int(MASKING_RATIO * N)     # 8
EPS = 1e-5                  # nn.LayerNorm default
NEG_INF = -1e30             # additive attention bias for cross-batch entries


# ----------------------- in-kernel helpers -----------------------
def _layernorm(x, gamma, beta):
    # x: (rows, d); gamma/beta: (1, d); biased variance like PyTorch
    mu = jnp.mean(x, axis=-1, keepdims=True)
    var = jnp.mean(jnp.square(x - mu), axis=-1, keepdims=True)
    return (x - mu) * jax.lax.rsqrt(var + EPS) * gamma + beta


def _gelu_exact(x):
    # torch nn.GELU() default is the exact erf formulation (kept for parity)
    return 0.5 * x * (1.0 + jax.lax.erf(x * (1.0 / math.sqrt(2.0))))


# ----------------------- fused kernel (single grid step) -----------------------
def simmim_kernel(patches_ref, mask_ref, addend_ref, bias_ref,
                  gvec_ref, pe_w_ref, wp_ref,
                  lvec_ref, wqkv_ref, wo_ref, w1_ref, w2_ref,
                  loss_ref):
    p = patches_ref[...]            # (BN, PATCH_DIM)
    m_pd = mask_ref[...]            # (BN, PATCH_DIM)  {0,1} float, lane-dense
    addend = addend_ref[...]        # (BN, DIM)  pos_emb + mask*mask_token
    bias = bias_ref[...]            # (BN, BN)   0 within batch, -1e30 across
    gv = gvec_ref[...]              # (8, 128)   global vector slab

    pe_g1 = gv[0:1, :PATCH_DIM]
    pe_b1 = gv[1:2, :PATCH_DIM]
    pe_b = gv[2:3, :DIM]
    pe_g2 = gv[3:4, :DIM]
    pe_b2 = gv[4:5, :DIM]
    fn_g = gv[5:6, :DIM]
    fn_b = gv[6:7, :DIM]
    bp = gv[7:8, :PATCH_DIM]

    # ---- patch embedding: LN -> Linear -> LN ----
    h = _layernorm(p, pe_g1, pe_b1)
    t = jnp.dot(h, pe_w_ref[...], preferred_element_type=jnp.float32) + pe_b
    t = _layernorm(t, pe_g2, pe_b2)

    # ---- add pos_emb and substitute masked tokens (arithmetic blend) ----
    # (t + pos)*(1-m) + (mask_token + pos)*m == t*(1-m) + pos + mask_token*m
    m_d = m_pd[:, :DIM]
    tok = t * (1.0 - m_d) + addend                       # (BN, DIM)

    scale = DIM_HEAD ** -0.5
    for d in range(DEPTH):                               # static unroll, DEPTH=2
        lv = lvec_ref[d]                                 # (8, 128) per-layer vectors
        ga, ba = lv[0:1, :DIM], lv[1:2, :DIM]
        bo = lv[2:3, :DIM]
        gf, bf = lv[3:4, :DIM], lv[4:5, :DIM]
        b2 = lv[5:6, :DIM]
        b1 = lv[6:7, :MLP_DIM]

        # ---- attention (pre-LN), fused QKV projection ----
        hln = _layernorm(tok, ga, ba)                    # (BN, DIM)
        qkv = jnp.dot(hln, wqkv_ref[d],
                      preferred_element_type=jnp.float32)   # (BN, 3*INNER)

        head_outs = []
        for hh in range(HEADS):                          # static, HEADS=4
            q_h = qkv[:, hh * DIM_HEAD:(hh + 1) * DIM_HEAD]
            k_h = qkv[:, INNER + hh * DIM_HEAD: INNER + (hh + 1) * DIM_HEAD]
            v_h = qkv[:, 2 * INNER + hh * DIM_HEAD: 2 * INNER + (hh + 1) * DIM_HEAD]
            s_h = jnp.einsum("nd,md->nm", q_h, k_h,
                             preferred_element_type=jnp.float32) * scale + bias
            a_h = jax.nn.softmax(s_h, axis=-1)           # cross-batch entries -> 0
            head_outs.append(jnp.dot(a_h, v_h, preferred_element_type=jnp.float32))
        o = jnp.concatenate(head_outs, axis=-1)          # (BN, INNER)

        # single 32-deep out-projection
        tok = tok + jnp.dot(o, wo_ref[d], preferred_element_type=jnp.float32) + bo

        # ---- feedforward (pre-LN GELU MLP) ----
        h2 = _layernorm(tok, gf, bf)
        y = jnp.dot(h2, w1_ref[d], preferred_element_type=jnp.float32) + b1
        y = _gelu_exact(y)
        y = jnp.dot(y, w2_ref[d], preferred_element_type=jnp.float32) + b2
        tok = tok + y

    # ---- final LayerNorm, pixel decoder, masked L1 loss ----
    enc = _layernorm(tok, fn_g, fn_b)
    pred = jnp.dot(enc, wp_ref[...], preferred_element_type=jnp.float32) + bp
    diff = jnp.abs(pred - p) * m_pd                      # only masked rows contribute
    # Reference: F.l1_loss(pred_masked, patch_masked) / num_masked
    # = sum|diff| / (B*NUM_MASKED*PATCH_DIM) / NUM_MASKED  (intentional double norm)
    denom = float(B * NUM_MASKED * PATCH_DIM) * float(NUM_MASKED)
    loss = jnp.sum(diff) * (1.0 / denom)
    loss_ref[...] = jnp.broadcast_to(loss, (1, 128)).astype(jnp.float32)


# ----------------------- pallas_call wrapper -----------------------
def _full_block(a):
    nd = a.ndim
    return pl.BlockSpec(a.shape, lambda i, _nd=nd: (0,) * _nd)


def simmim_pallas(patches, mask_pd, addend, attn_bias, packed):
    inputs = [
        patches, mask_pd, addend, attn_bias,
        packed["gvec"], packed["pe_w"], packed["wp"],
        packed["lvec"], packed["wqkv"], packed["wo"], packed["w1"], packed["w2"],
    ]
    out = pl.pallas_call(
        simmim_kernel,
        out_shape=jax.ShapeDtypeStruct((1, 128), jnp.float32),
        grid=(1,),                                        # single fused step
        in_specs=[_full_block(a) for a in inputs],
        out_specs=pl.BlockSpec((1, 128), lambda i: (0, 0)),
        compiler_params=pltpu.CompilerParams(
            dimension_semantics=("arbitrary",)),
    )(*inputs)
    return out[0, 0]


# ----------------------- glue (plain JAX) -----------------------
def to_patches(img):
    # Rearrange 'b c (h p1) (w p2) -> (b h w) (p1 p2 c)' with batch folded into rows
    x = img.reshape(B, C, HP, PATCH, HP, PATCH)
    x = x.transpose(0, 2, 4, 3, 5, 1)            # (B, h, w, p1, p2, C)
    return x.reshape(B * N, PATCH_DIM)


def init_params(key):
    ks = jax.random.split(key, 8)
    s = 0.02
    params = dict(
        # patch_to_emb: LayerNorm(patch_dim) -> Linear(patch_dim, dim) -> LayerNorm(dim)
        pe_g1=jnp.ones((PATCH_DIM,), jnp.float32),
        pe_b1=jnp.zeros((PATCH_DIM,), jnp.float32),
        pe_w=s * jax.random.normal(ks[0], (PATCH_DIM, DIM), jnp.float32),
        pe_b=jnp.zeros((DIM,), jnp.float32),
        pe_g2=jnp.ones((DIM,), jnp.float32),
        pe_b2=jnp.zeros((DIM,), jnp.float32),
        pos_embedding=jax.random.normal(ks[1], (1, N + 1, DIM), jnp.float32),
        mask_token=jax.random.normal(ks[2], (DIM,), jnp.float32),
        fn_g=jnp.ones((DIM,), jnp.float32),
        fn_b=jnp.zeros((DIM,), jnp.float32),
        # to_pixels: Linear(dim, patch_dim)
        wp=s * jax.random.normal(ks[3], (DIM, PATCH_DIM), jnp.float32),
        bp=jnp.zeros((PATCH_DIM,), jnp.float32),
    )
    layers = []
    for d in range(DEPTH):
        lk = jax.random.split(ks[4 + d], 4)
        layers.append(dict(
            ga=jnp.ones((DIM,), jnp.float32),
            ba=jnp.zeros((DIM,), jnp.float32),
            wqkv=s * jax.random.normal(lk[0], (DIM, 3 * INNER), jnp.float32),
            wo=s * jax.random.normal(lk[1], (INNER, DIM), jnp.float32),
            bo=jnp.zeros((DIM,), jnp.float32),
            gf=jnp.ones((DIM,), jnp.float32),
            bf=jnp.zeros((DIM,), jnp.float32),
            w1=s * jax.random.normal(lk[2], (DIM, MLP_DIM), jnp.float32),
            b1=jnp.zeros((MLP_DIM,), jnp.float32),
            w2=s * jax.random.normal(lk[3], (MLP_DIM, DIM), jnp.float32),
            b2=jnp.zeros((DIM,), jnp.float32),
        ))
    return params, layers


def pack_weights(params, layers):
    """One-time packing: lane-dense vector slabs + DEPTH-stacked weight matrices."""
    gvec = jnp.zeros((8, 128), jnp.float32)
    gvec = gvec.at[0, :PATCH_DIM].set(params["pe_g1"])
    gvec = gvec.at[1, :PATCH_DIM].set(params["pe_b1"])
    gvec = gvec.at[2, :DIM].set(params["pe_b"])
    gvec = gvec.at[3, :DIM].set(params["pe_g2"])
    gvec = gvec.at[4, :DIM].set(params["pe_b2"])
    gvec = gvec.at[5, :DIM].set(params["fn_g"])
    gvec = gvec.at[6, :DIM].set(params["fn_b"])
    gvec = gvec.at[7, :PATCH_DIM].set(params["bp"])

    lvec = jnp.zeros((DEPTH, 8, 128), jnp.float32)
    for d, lw in enumerate(layers):
        lvec = lvec.at[d, 0, :DIM].set(lw["ga"])
        lvec = lvec.at[d, 1, :DIM].set(lw["ba"])
        lvec = lvec.at[d, 2, :DIM].set(lw["bo"])
        lvec = lvec.at[d, 3, :DIM].set(lw["gf"])
        lvec = lvec.at[d, 4, :DIM].set(lw["bf"])
        lvec = lvec.at[d, 5, :DIM].set(lw["b2"])
        lvec = lvec.at[d, 6, :MLP_DIM].set(lw["b1"])

    return dict(
        gvec=gvec,
        pe_w=params["pe_w"],
        wp=params["wp"],
        lvec=lvec,
        wqkv=jnp.stack([lw["wqkv"] for lw in layers]),   # (DEPTH, DIM, 3*INNER)
        wo=jnp.stack([lw["wo"] for lw in layers]),       # (DEPTH, INNER, DIM)
        w1=jnp.stack([lw["w1"] for lw in layers]),       # (DEPTH, DIM, MLP_DIM)
        w2=jnp.stack([lw["w2"] for lw in layers]),       # (DEPTH, MLP_DIM, DIM)
    )


def simmim_forward(img, params, packed, mask_key):
    patches = to_patches(img)                                 # (BN, PATCH_DIM)

    pos = params["pos_embedding"][0, 1:N + 1]                 # (N, DIM)
    pos_full = jnp.tile(pos, (B, 1))                          # (BN, DIM)

    # random top-k masking (torch.rand(...).topk(k).indices equivalent)
    rand = jax.random.uniform(mask_key, (B, N))
    _, masked_indices = jax.lax.top_k(rand, NUM_MASKED)       # (B, NUM_MASKED)
    batch_idx = jnp.arange(B)[:, None]
    bool_mask = jnp.zeros((B, N), jnp.bool_).at[batch_idx, masked_indices].set(True)
    mask_col = bool_mask.reshape(B * N, 1).astype(jnp.float32)        # (BN, 1)
    mask_pd = jnp.broadcast_to(mask_col, (B * N, PATCH_DIM))          # lane-dense {0,1}

    # fold pos-add and mask-token substitution into one addend (see kernel comment)
    addend = pos_full + mask_col * params["mask_token"][None, :]      # (BN, DIM)

    # block-diagonal additive attention bias: 0 within a batch element, -1e30 across
    bid = jnp.repeat(jnp.arange(B), N)
    attn_bias = jnp.where(bid[:, None] == bid[None, :], 0.0, NEG_INF).astype(jnp.float32)

    return simmim_pallas(patches, mask_pd, addend, attn_bias, packed)


if __name__ == "__main__":
    root = jax.random.PRNGKey(0)
    k_img, k_params, k_mask = jax.random.split(root, 3)
    img = jax.random.normal(k_img, (B, C, IMG, IMG), jnp.float32)     # NCHW, like PyTorch
    params, layers = init_params(k_params)
    packed = pack_weights(params, layers)                             # one-time weight packing

    fwd = jax.jit(simmim_forward)
    recon_loss = fwd(img, params, packed, k_mask)
    recon_loss = jax.block_until_ready(recon_loss)
    assert recon_loss.shape == () and bool(jnp.isfinite(recon_loss))
    print("KERNEL_OK")
</pallas_src>

<mosaic_0001>
module attributes {stable_mosaic.version = 11 : i64} {
  func.func @simmim_kernel(%arg0: i32, %arg1: memref<32x64xf32, #tpu.memory_space<vmem>>, %arg2: memref<32x64xf32, #tpu.memory_space<vmem>>, %arg3: memref<32x32xf32, #tpu.memory_space<vmem>>, %arg4: memref<32x32xf32, #tpu.memory_space<vmem>>, %arg5: memref<8x128xf32, #tpu.memory_space<vmem>>, %arg6: memref<64x32xf32, #tpu.memory_space<vmem>>, %arg7: memref<32x64xf32, #tpu.memory_space<vmem>>, %arg8: memref<2x8x128xf32, #tpu.memory_space<vmem>>, %arg9: memref<2x32x96xf32, #tpu.memory_space<vmem>>, %arg10: memref<2x32x32xf32, #tpu.memory_space<vmem>>, %arg11: memref<2x32x64xf32, #tpu.memory_space<vmem>>, %arg12: memref<2x64x32xf32, #tpu.memory_space<vmem>>, %arg13: memref<1x128xf32, #tpu.memory_space<vmem>>) attributes {dimension_semantics = [#tpu.dimension_semantics<arbitrary>], iteration_bounds = array<i64: 1>, scalar_prefetch = 0 : i64, scratch_operands = 0 : i64, tpu.core_type = #tpu.core_type<tc>, window_params = [{pipeline_mode = #tpu.pipeline_mode<synchronous>, transform_indices = @transform_0, window_bounds = array<i64: 32, 64>}, {pipeline_mode = #tpu.pipeline_mode<synchronous>, transform_indices = @transform_1, window_bounds = array<i64: 32, 64>}, {pipeline_mode = #tpu.pipeline_mode<synchronous>, transform_indices = @transform_2, window_bounds = array<i64: 32, 32>}, {pipeline_mode = #tpu.pipeline_mode<synchronous>, transform_indices = @transform_3, window_bounds = array<i64: 32, 32>}, {pipeline_mode = #tpu.pipeline_mode<synchronous>, transform_indices = @transform_4, window_bounds = array<i64: 8, 128>}, {pipeline_mode = #tpu.pipeline_mode<synchronous>, transform_indices = @transform_5, window_bounds = array<i64: 64, 32>}, {pipeline_mode = #tpu.pipeline_mode<synchronous>, transform_indices = @transform_6, window_bounds = array<i64: 32, 64>}, {pipeline_mode = #tpu.pipeline_mode<synchronous>, transform_indices = @transform_7, window_bounds = array<i64: 2, 8, 128>}, {pipeline_mode = #tpu.pipeline_mode<synchronous>, transform_indices = @transform_8, window_bounds = array<i64: 2, 32, 96>}, {pipeline_mode = #tpu.pipeline_mode<synchronous>, transform_indices = @transform_9, window_bounds = array<i64: 2, 32, 32>}, {pipeline_mode = #tpu.pipeline_mode<synchronous>, transform_indices = @transform_10, window_bounds = array<i64: 2, 32, 64>}, {pipeline_mode = #tpu.pipeline_mode<synchronous>, transform_indices = @transform_11, window_bounds = array<i64: 2, 64, 32>}, {pipeline_mode = #tpu.pipeline_mode<synchronous>, transform_indices = @transform_12, window_bounds = array<i64: 1, 128>}]} {
    %c0 = arith.constant 0 : index
    %c0_0 = arith.constant 0 : index
    %0 = vector.load %arg1[%c0, %c0_0] : memref<32x64xf32, #tpu.memory_space<vmem>>, vector<32x64xf32>
    %c0_1 = arith.constant 0 : index
    %c0_2 = arith.constant 0 : index
    %1 = vector.load %arg2[%c0_1, %c0_2] : memref<32x64xf32, #tpu.memory_space<vmem>>, vector<32x64xf32>
    %c0_3 = arith.constant 0 : index
    %c0_4 = arith.constant 0 : index
    %2 = vector.load %arg3[%c0_3, %c0_4] : memref<32x32xf32, #tpu.memory_space<vmem>>, vector<32x32xf32>
    %c0_5 = arith.constant 0 : index
    %c0_6 = arith.constant 0 : index
    %3 = vector.load %arg4[%c0_5, %c0_6] : memref<32x32xf32, #tpu.memory_space<vmem>>, vector<32x32xf32>
    %c0_7 = arith.constant 0 : index
    %c0_8 = arith.constant 0 : index
    %4 = vector.load %arg5[%c0_7, %c0_8] : memref<8x128xf32, #tpu.memory_space<vmem>>, vector<8x128xf32>
    %5 = vector.extract_strided_slice %4 {offsets = [0, 0], sizes = [1, 64], strides = [1, 1]} : vector<8x128xf32> to vector<1x64xf32>
    %6 = vector.extract_strided_slice %4 {offsets = [1, 0], sizes = [1, 64], strides = [1, 1]} : vector<8x128xf32> to vector<1x64xf32>
    %7 = vector.extract_strided_slice %4 {offsets = [2, 0], sizes = [1, 32], strides = [1, 1]} : vector<8x128xf32> to vector<1x32xf32>
    %8 = vector.extract_strided_slice %4 {offsets = [3, 0], sizes = [1, 32], strides = [1, 1]} : vector<8x128xf32> to vector<1x32xf32>
    %9 = vector.extract_strided_slice %4 {offsets = [4, 0], sizes = [1, 32], strides = [1, 1]} : vector<8x128xf32> to vector<1x32xf32>
    %10 = vector.extract_strided_slice %4 {offsets = [5, 0], sizes = [1, 32], strides = [1, 1]} : vector<8x128xf32> to vector<1x32xf32>
    %11 = vector.extract_strided_slice %4 {offsets = [6, 0], sizes = [1, 32], strides = [1, 1]} : vector<8x128xf32> to vector<1x32xf32>
    %12 = vector.extract_strided_slice %4 {offsets = [7, 0], sizes = [1, 64], strides = [1, 1]} : vector<8x128xf32> to vector<1x64xf32>
    %cst = arith.constant dense<0.000000e+00> : vector<32xf32>
    %13 = vector.multi_reduction <add>, %0, %cst [1] : vector<32x64xf32> to vector<32xf32>
    %14 = vector.shape_cast %13 : vector<32xf32> to vector<32x1xf32>
    %cst_9 = arith.constant 6.400000e+01 : f32
    %15 = vector.broadcast %cst_9 : f32 to vector<32x1xf32>
    %16 = arith.divf %14, %15 : vector<32x1xf32>
    %17 = vector.broadcast %16 : vector<32x1xf32> to vector<32x64xf32>
    %18 = arith.subf %0, %17 : vector<32x64xf32>
    %19 = arith.mulf %18, %18 : vector<32x64xf32>
    %cst_10 = arith.constant dense<0.000000e+00> : vector<32xf32>
    %20 = vector.multi_reduction <add>, %19, %cst_10 [1] : vector<32x64xf32> to vector<32xf32>
    %21 = vector.shape_cast %20 : vector<32xf32> to vector<32x1xf32>
    %cst_11 = arith.constant 6.400000e+01 : f32
    %22 = vector.broadcast %cst_11 : f32 to vector<32x1xf32>
    %23 = arith.divf %21, %22 : vector<32x1xf32>
    %24 = vector.broadcast %16 : vector<32x1xf32> to vector<32x64xf32>
    %25 = arith.subf %0, %24 : vector<32x64xf32>
    %cst_12 = arith.constant 9.99999974E-6 : f32
    %26 = vector.broadcast %cst_12 : f32 to vector<32x1xf32>
    %27 = arith.addf %23, %26 : vector<32x1xf32>
    %28 = math.rsqrt %27 : vector<32x1xf32>
    %29 = vector.broadcast %28 : vector<32x1xf32> to vector<32x64xf32>
    %30 = arith.mulf %25, %29 : vector<32x64xf32>
    %31 = vector.broadcast %5 : vector<1x64xf32> to vector<32x64xf32>
    %32 = arith.mulf %30, %31 : vector<32x64xf32>
    %33 = vector.broadcast %6 : vector<1x64xf32> to vector<32x64xf32>
    %34 = arith.addf %32, %33 : vector<32x64xf32>
    %c0_13 = arith.constant 0 : index
    %c0_14 = arith.constant 0 : index
    %35 = vector.load %arg6[%c0_13, %c0_14] : memref<64x32xf32, #tpu.memory_space<vmem>>, vector<64x32xf32>
    %cst_15 = arith.constant dense<0.000000e+00> : vector<32x32xf32>
    %36 = tpu.matmul %34, %35, %cst_15 {dimension_numbers = #tpu.dot_dimension_numbers<[1], [0], [0], [1], [0, 0, 1, 1], [], []>} : vector<32x64xf32>, vector<64x32xf32>, vector<32x32xf32> -> vector<32x32xf32>
    %37 = vector.broadcast %7 : vector<1x32xf32> to vector<32x32xf32>
    %38 = arith.addf %36, %37 : vector<32x32xf32>
    %cst_16 = arith.constant dense<0.000000e+00> : vector<32xf32>
    %39 = vector.multi_reduction <add>, %38, %cst_16 [1] : vector<32x32xf32> to vector<32xf32>
    %40 = vector.shape_cast %39 : vector<32xf32> to vector<32x1xf32>
    %cst_17 = arith.constant 3.200000e+01 : f32
    %41 = vector.broadcast %cst_17 : f32 to vector<32x1xf32>
    %42 = arith.divf %40, %41 : vector<32x1xf32>
    %43 = vector.broadcast %42 : vector<32x1xf32> to vector<32x32xf32>
    %44 = arith.subf %38, %43 : vector<32x32xf32>
    %45 = arith.mulf %44, %44 : vector<32x32xf32>
    %cst_18 = arith.constant dense<0.000000e+00> : vector<32xf32>
    %46 = vector.multi_reduction <add>, %45, %cst_18 [1] : vector<32x32xf32> to vector<32xf32>
    %47 = vector.shape_cast %46 : vector<32xf32> to vector<32x1xf32>
    %cst_19 = arith.constant 3.200000e+01 : f32
    %48 = vector.broadcast %cst_19 : f32 to vector<32x1xf32>
    %49 = arith.divf %47, %48 : vector<32x1xf32>
    %50 = vector.broadcast %42 : vector<32x1xf32> to vector<32x32xf32>
    %51 = arith.subf %38, %50 : vector<32x32xf32>
    %cst_20 = arith.constant 9.99999974E-6 : f32
    %52 = vector.broadcast %cst_20 : f32 to vector<32x1xf32>
    %53 = arith.addf %49, %52 : vector<32x1xf32>
    %54 = math.rsqrt %53 : vector<32x1xf32>
    %55 = vector.broadcast %54 : vector<32x1xf32> to vector<32x32xf32>
    %56 = arith.mulf %51, %55 : vector<32x32xf32>
    %57 = vector.broadcast %8 : vector<1x32xf32> to vector<32x32xf32>
    %58 = arith.mulf %56, %57 : vector<32x32xf32>
    %59 = vector.broadcast %9 : vector<1x32xf32> to vector<32x32xf32>
    %60 = arith.addf %58, %59 : vector<32x32xf32>
    %61 = vector.extract_strided_slice %1 {offsets = [0, 0], sizes = [32, 32], strides = [1, 1]} : vector<32x64xf32> to vector<32x32xf32>
    %cst_21 = arith.constant 1.000000e+00 : f32
    %62 = vector.broadcast %cst_21 : f32 to vector<32x32xf32>
    %63 = arith.subf %62, %61 : vector<32x32xf32>
    %64 = arith.mulf %60, %63 : vector<32x32xf32>
    %65 = arith.addf %64, %2 : vector<32x32xf32>
    %c0_22 = arith.constant 0 : index
    %c0_23 = arith.constant 0 : index
    %c0_24 = arith.constant 0 : index
    %66 = vector.load %arg8[%c0_22, %c0_23, %c0_24] : memref<2x8x128xf32, #tpu.memory_space<vmem>>, vector<1x8x128xf32>
    %67 = vector.shape_cast %66 : vector<1x8x128xf32> to vector<8x128xf32>
    %68 = vector.extract_strided_slice %67 {offsets = [0, 0], sizes = [1, 32], strides = [1, 1]} : vector<8x128xf32> to vector<1x32xf32>
    %69 = vector.extract_strided_slice %67 {offsets = [1, 0], sizes = [1, 32], strides = [1, 1]} : vector<8x128xf32> to vector<1x32xf32>
    %70 = vector.extract_strided_slice %67 {offsets = [2, 0], sizes = [1, 32], strides = [1, 1]} : vector<8x128xf32> to vector<1x32xf32>
    %71 = vector.extract_strided_slice %67 {offsets = [3, 0], sizes = [1, 32], strides = [1, 1]} : vector<8x128xf32> to vector<1x32xf32>
    %72 = vector.extract_strided_slice %67 {offsets = [4, 0], sizes = [1, 32], strides = [1, 1]} : vector<8x128xf32> to vector<1x32xf32>
    %73 = vector.extract_strided_slice %67 {offsets = [5, 0], sizes = [1, 32], strides = [1, 1]} : vector<8x128xf32> to vector<1x32xf32>
    %74 = vector.extract_strided_slice %67 {offsets = [6, 0], sizes = [1, 64], strides = [1, 1]} : vector<8x128xf32> to vector<1x64xf32>
    %cst_25 = arith.constant dense<0.000000e+00> : vector<32xf32>
    %75 = vector.multi_reduction <add>, %65, %cst_25 [1] : vector<32x32xf32> to vector<32xf32>
    %76 = vector.shape_cast %75 : vector<32xf32> to vector<32x1xf32>
    %cst_26 = arith.constant 3.200000e+01 : f32
    %77 = vector.broadcast %cst_26 : f32 to vector<32x1xf32>
    %78 = arith.divf %76, %77 : vector<32x1xf32>
    %79 = vector.broadcast %78 : vector<32x1xf32> to vector<32x32xf32>
    %80 = arith.subf %65, %79 : vector<32x32xf32>
    %81 = arith.mulf %80, %80 : vector<32x32xf32>
    %cst_27 = arith.constant dense<0.000000e+00> : vector<32xf32>
    %82 = vector.multi_reduction <add>, %81, %cst_27 [1] : vector<32x32xf32> to vector<32xf32>
    %83 = vector.shape_cast %82 : vector<32xf32> to vector<32x1xf32>
    %cst_28 = arith.constant 3.200000e+01 : f32
    %84 = vector.broadcast %cst_28 : f32 to vector<32x1xf32>
    %85 = arith.divf %83, %84 : vector<32x1xf32>
    %86 = vector.broadcast %78 : vector<32x1xf32> to vector<32x32xf32>
    %87 = arith.subf %65, %86 : vector<32x32xf32>
    %cst_29 = arith.constant 9.99999974E-6 : f32
    %88 = vector.broadcast %cst_29 : f32 to vector<32x1xf32>
    %89 = arith.addf %85, %88 : vector<32x1xf32>
    %90 = math.rsqrt %89 : vector<32x1xf32>
    %91 = vector.broadcast %90 : vector<32x1xf32> to vector<32x32xf32>
    %92 = arith.mulf %87, %91 : vector<32x32xf32>
    %93 = vector.broadcast %68 : vector<1x32xf32> to vector<32x32xf32>
    %94 = arith.mulf %92, %93 : vector<32x32xf32>
    %95 = vector.broadcast %69 : vector<1x32xf32> to vector<32x32xf32>
    %96 = arith.addf %94, %95 : vector<32x32xf32>
    %c0_30 = arith.constant 0 : index
    %c0_31 = arith.constant 0 : index
    %c0_32 = arith.constant 0 : index
    %97 = vector.load %arg9[%c0_30, %c0_31, %c0_32] : memref<2x32x96xf32, #tpu.memory_space<vmem>>, vector<1x32x96xf32>
    %98 = vector.shape_cast %97 : vector<1x32x96xf32> to vector<32x96xf32>
    %cst_33 = arith.constant dense<0.000000e+00> : vector<32x96xf32>
    %99 = tpu.matmul %96, %98, %cst_33 {dimension_numbers = #tpu.dot_dimension_numbers<[1], [0], [0], [1], [0, 0, 1, 1], [], []>} : vector<32x32xf32>, vector<32x96xf32>, vector<32x96xf32> -> vector<32x96xf32>
    %100 = vector.extract_strided_slice %99 {offsets = [0, 0], sizes = [32, 8], strides = [1, 1]} : vector<32x96xf32> to vector<32x8xf32>
    %101 = vector.extract_strided_slice %99 {offsets = [0, 32], sizes = [32, 8], strides = [1, 1]} : vector<32x96xf32> to vector<32x8xf32>
    %102 = vector.extract_strided_slice %99 {offsets = [0, 64], sizes = [32, 8], strides = [1, 1]} : vector<32x96xf32> to vector<32x8xf32>
    "tpu.trace_start"() <{level = 10 : i32, message = "nd,md->nm"}> : () -> ()
    %cst_34 = arith.constant dense<0.000000e+00> : vector<32x32xf32>
    %103 = tpu.matmul %100, %101, %cst_34 {dimension_numbers = #tpu.dot_dimension_numbers<[1], [1], [0], [0], [0, 0, 1, 0], [], []>} : vector<32x8xf32>, vector<32x8xf32>, vector<32x32xf32> -> vector<32x32xf32>
    "tpu.trace_stop"() : () -> ()
    %cst_35 = arith.constant 0.353553385 : f32
    %104 = vector.broadcast %cst_35 : f32 to vector<32x32xf32>
    %105 = arith.mulf %103, %104 : vector<32x32xf32>
    %106 = arith.addf %105, %3 : vector<32x32xf32>
    %cst_36 = arith.constant dense<0xFF800000> : vector<32xf32>
    %107 = vector.multi_reduction <maximumf>, %106, %cst_36 [1] : vector<32x32xf32> to vector<32xf32>
    %cst_37 = arith.constant 0xFF800000 : f32
    %108 = vector.broadcast %cst_37 : f32 to vector<32xf32>
    %109 = arith.maximumf %108, %107 : vector<32xf32>
    %110 = vector.shape_cast %109 : vector<32xf32> to vector<32x1xf32>
    %111 = vector.broadcast %110 : vector<32x1xf32> to vector<32x32xf32>
    %112 = arith.subf %106, %111 : vector<32x32xf32>
    %113 = math.exp %112 : vector<32x32xf32>
    %cst_38 = arith.constant dense<0.000000e+00> : vector<32xf32>
    %114 = vector.multi_reduction <add>, %113, %cst_38 [1] : vector<32x32xf32> to vector<32xf32>
    %115 = vector.shape_cast %114 : vector<32xf32> to vector<32x1xf32>
    %116 = vector.broadcast %115 : vector<32x1xf32> to vector<32x32xf32>
    %117 = arith.divf %113, %116 : vector<32x32xf32>
    %cst_39 = arith.constant dense<0.000000e+00> : vector<32x8xf32>
    %118 = tpu.matmul %117, %102, %cst_39 {dimension_numbers = #tpu.dot_dimension_numbers<[1], [0], [0], [1], [0, 0, 1, 1], [], []>} : vector<32x32xf32>, vector<32x8xf32>, vector<32x8xf32> -> vector<32x8xf32>
    %119 = vector.extract_strided_slice %99 {offsets = [0, 8], sizes = [32, 8], strides = [1, 1]} : vector<32x96xf32> to vector<32x8xf32>
    %120 = vector.extract_strided_slice %99 {offsets = [0, 40], sizes = [32, 8], strides = [1, 1]} : vector<32x96xf32> to vector<32x8xf32>
    %121 = vector.extract_strided_slice %99 {offsets = [0, 72], sizes = [32, 8], strides = [1, 1]} : vector<32x96xf32> to vector<32x8xf32>
    "tpu.trace_start"() <{level = 10 : i32, message = "nd,md->nm"}> : () -> ()
    %cst_40 = arith.constant dense<0.000000e+00> : vector<32x32xf32>
    %122 = tpu.matmul %119, %120, %cst_40 {dimension_numbers = #tpu.dot_dimension_numbers<[1], [1], [0], [0], [0, 0, 1, 0], [], []>} : vector<32x8xf32>, vector<32x8xf32>, vector<32x32xf32> -> vector<32x32xf32>
    "tpu.trace_stop"() : () -> ()
    %cst_41 = arith.constant 0.353553385 : f32
    %123 = vector.broadcast %cst_41 : f32 to vector<32x32xf32>
    %124 = arith.mulf %122, %123 : vector<32x32xf32>
    %125 = arith.addf %124, %3 : vector<32x32xf32>
    %cst_42 = arith.constant dense<0xFF800000> : vector<32xf32>
    %126 = vector.multi_reduction <maximumf>, %125, %cst_42 [1] : vector<32x32xf32> to vector<32xf32>
    %cst_43 = arith.constant 0xFF800000 : f32
    %127 = vector.broadcast %cst_43 : f32 to vector<32xf32>
    %128 = arith.maximumf %127, %126 : vector<32xf32>
    %129 = vector.shape_cast %128 : vector<32xf32> to vector<32x1xf32>
    %130 = vector.broadcast %129 : vector<32x1xf32> to vector<32x32xf32>
    %131 = arith.subf %125, %130 : vector<32x32xf32>
    %132 = math.exp %131 : vector<32x32xf32>
    %cst_44 = arith.constant dense<0.000000e+00> : vector<32xf32>
    %133 = vector.multi_reduction <add>, %132, %cst_44 [1] : vector<32x32xf32> to vector<32xf32>
    %134 = vector.shape_cast %133 : vector<32xf32> to vector<32x1xf32>
    %135 = vector.broadcast %134 : vector<32x1xf32> to vector<32x32xf32>
    %136 = arith.divf %132, %135 : vector<32x32xf32>
    %cst_45 = arith.constant dense<0.000000e+00> : vector<32x8xf32>
    %137 = tpu.matmul %136, %121, %cst_45 {dimension_numbers = #tpu.dot_dimension_numbers<[1], [0], [0], [1], [0, 0, 1, 1], [], []>} : vector<32x32xf32>, vector<32x8xf32>, vector<32x8xf32> -> vector<32x8xf32>
    %138 = vector.extract_strided_slice %99 {offsets = [0, 16], sizes = [32, 8], strides = [1, 1]} : vector<32x96xf32> to vector<32x8xf32>
    %139 = vector.extract_strided_slice %99 {offsets = [0, 48], sizes = [32, 8], strides = [1, 1]} : vector<32x96xf32> to vector<32x8xf32>
    %140 = vector.extract_strided_slice %99 {offsets = [0, 80], sizes = [32, 8], strides = [1, 1]} : vector<32x96xf32> to vector<32x8xf32>
    "tpu.trace_start"() <{level = 10 : i32, message = "nd,md->nm"}> : () -> ()
    %cst_46 = arith.constant dense<0.000000e+00> : vector<32x32xf32>
    %141 = tpu.matmul %138, %139, %cst_46 {dimension_numbers = #tpu.dot_dimension_numbers<[1], [1], [0], [0], [0, 0, 1, 0], [], []>} : vector<32x8xf32>, vector<32x8xf32>, vector<32x32xf32> -> vector<32x32xf32>
    "tpu.trace_stop"() : () -> ()
    %cst_47 = arith.constant 0.353553385 : f32
    %142 = vector.broadcast %cst_47 : f32 to vector<32x32xf32>
    %143 = arith.mulf %141, %142 : vector<32x32xf32>
    %144 = arith.addf %143, %3 : vector<32x32xf32>
    %cst_48 = arith.constant dense<0xFF800000> : vector<32xf32>
    %145 = vector.multi_reduction <maximumf>, %144, %cst_48 [1] : vector<32x32xf32> to vector<32xf32>
    %cst_49 = arith.constant 0xFF800000 : f32
    %146 = vector.broadcast %cst_49 : f32 to vector<32xf32>
    %147 = arith.maximumf %146, %145 : vector<32xf32>
    %148 = vector.shape_cast %147 : vector<32xf32> to vector<32x1xf32>
    %149 = vector.broadcast %148 : vector<32x1xf32> to vector<32x32xf32>
    %150 = arith.subf %144, %149 : vector<32x32xf32>
    %151 = math.exp %150 : vector<32x32xf32>
    %cst_50 = arith.constant dense<0.000000e+00> : vector<32xf32>
    %152 = vector.multi_reduction <add>, %151, %cst_50 [1] : vector<32x32xf32> to vector<32xf32>
    %153 = vector.shape_cast %152 : vector<32xf32> to vector<32x1xf32>
    %154 = vector.broadcast %153 : vector<32x1xf32> to vector<32x32xf32>
    %155 = arith.divf %151, %154 : vector<32x32xf32>
    %cst_51 = arith.constant dense<0.000000e+00> : vector<32x8xf32>
    %156 = tpu.matmul %155, %140, %cst_51 {dimension_numbers = #tpu.dot_dimension_numbers<[1], [0], [0], [1], [0, 0, 1, 1], [], []>} : vector<32x32xf32>, vector<32x8xf32>, vector<32x8xf32> -> vector<32x8xf32>
    %157 = vector.extract_strided_slice %99 {offsets = [0, 24], sizes = [32, 8], strides = [1, 1]} : vector<32x96xf32> to vector<32x8xf32>
    %158 = vector.extract_strided_slice %99 {offsets = [0, 56], sizes = [32, 8], strides = [1, 1]} : vector<32x96xf32> to vector<32x8xf32>
    %159 = vector.extract_strided_slice %99 {offsets = [0, 88], sizes = [32, 8], strides = [1, 1]} : vector<32x96xf32> to vector<32x8xf32>
    "tpu.trace_start"() <{level = 10 : i32, message = "nd,md->nm"}> : () -> ()
    %cst_52 = arith.constant dense<0.000000e+00> : vector<32x32xf32>
    %160 = tpu.matmul %157, %158, %cst_52 {dimension_numbers = #tpu.dot_dimension_numbers<[1], [1], [0], [0], [0, 0, 1, 0], [], []>} : vector<32x8xf32>, vector<32x8xf32>, vector<32x32xf32> -> vector<32x32xf32>
    "tpu.trace_stop"() : () -> ()
    %cst_53 = arith.constant 0.353553385 : f32
    %161 = vector.broadcast %cst_53 : f32 to vector<32x32xf32>
    %162 = arith.mulf %160, %161 : vector<32x32xf32>
    %163 = arith.addf %162, %3 : vector<32x32xf32>
    %cst_54 = arith.constant dense<0xFF800000> : vector<32xf32>
    %164 = vector.multi_reduction <maximumf>, %163, %cst_54 [1] : vector<32x32xf32> to vector<32xf32>
    %cst_55 = arith.constant 0xFF800000 : f32
    %165 = vector.broadcast %cst_55 : f32 to vector<32xf32>
    %166 = arith.maximumf %165, %164 : vector<32xf32>
    %167 = vector.shape_cast %166 : vector<32xf32> to vector<32x1xf32>
    %168 = vector.broadcast %167 : vector<32x1xf32> to vector<32x32xf32>
    %169 = arith.subf %163, %168 : vector<32x32xf32>
    %170 = math.exp %169 : vector<32x32xf32>
    %cst_56 = arith.constant dense<0.000000e+00> : vector<32xf32>
    %171 = vector.multi_reduction <add>, %170, %cst_56 [1] : vector<32x32xf32> to vector<32xf32>
    %172 = vector.shape_cast %171 : vector<32xf32> to vector<32x1xf32>
    %173 = vector.broadcast %172 : vector<32x1xf32> to vector<32x32xf32>
    %174 = arith.divf %170, %173 : vector<32x32xf32>
    %cst_57 = arith.constant dense<0.000000e+00> : vector<32x8xf32>
    %175 = tpu.matmul %174, %159, %cst_57 {dimension_numbers = #tpu.dot_dimension_numbers<[1], [0], [0], [1], [0, 0, 1, 1], [], []>} : vector<32x32xf32>, vector<32x8xf32>, vector<32x8xf32> -> vector<32x8xf32>
    %176 = tpu.concatenate %118, %137, %156, %175 in 1 : vector<32x8xf32>, vector<32x8xf32>, vector<32x8xf32>, vector<32x8xf32> -> vector<32x32xf32>
    %c0_58 = arith.constant 0 : index
    %c0_59 = arith.constant 0 : index
    %c0_60 = arith.constant 0 : index
    %177 = vector.load %arg10[%c0_58, %c0_59, %c0_60] : memref<2x32x32xf32, #tpu.memory_space<vmem>>, vector<1x32x32xf32>
    %178 = vector.shape_cast %177 : vector<1x32x32xf32> to vector<32x32xf32>
    %cst_61 = arith.constant dense<0.000000e+00> : vector<32x32xf32>
    %179 = tpu.matmul %176, %178, %cst_61 {dimension_numbers = #tpu.dot_dimension_numbers<[1], [0], [0], [1], [0, 0, 1, 1], [], []>} : vector<32x32xf32>, vector<32x32xf32>, vector<32x32xf32> -> vector<32x32xf32>
    %180 = arith.addf %65, %179 : vector<32x32xf32>
    %181 = vector.broadcast %70 : vector<1x32xf32> to vector<32x32xf32>
    %182 = arith.addf %180, %181 : vector<32x32xf32>
    %cst_62 = arith.constant dense<0.000000e+00> : vector<32xf32>
    %183 = vector.multi_reduction <add>, %182, %cst_62 [1] : vector<32x32xf32> to vector<32xf32>
    %184 = vector.shape_cast %183 : vector<32xf32> to vector<32x1xf32>
    %cst_63 = arith.constant 3.200000e+01 : f32
    %185 = vector.broadcast %cst_63 : f32 to vector<32x1xf32>
    %186 = arith.divf %184, %185 : vector<32x1xf32>
    %187 = vector.broadcast %186 : vector<32x1xf32> to vector<32x32xf32>
    %188 = arith.subf %182, %187 : vector<32x32xf32>
    %189 = arith.mulf %188, %188 : vector<32x32xf32>
    %cst_64 = arith.constant dense<0.000000e+00> : vector<32xf32>
    %190 = vector.multi_reduction <add>, %189, %cst_64 [1] : vector<32x32xf32> to vector<32xf32>
    %191 = vector.shape_cast %190 : vector<32xf32> to vector<32x1xf32>
    %cst_65 = arith.constant 3.200000e+01 : f32
    %192 = vector.broadcast %cst_65 : f32 to vector<32x1xf32>
    %193 = arith.divf %191, %192 : vector<32x1xf32>
    %194 = vector.broadcast %186 : vector<32x1xf32> to vector<32x32xf32>
    %195 = arith.subf %182, %194 : vector<32x32xf32>
    %cst_66 = arith.constant 9.99999974E-6 : f32
    %196 = vector.broadcast %cst_66 : f32 to vector<32x1xf32>
    %197 = arith.addf %193, %196 : vector<32x1xf32>
    %198 = math.rsqrt %197 : vector<32x1xf32>
    %199 = vector.broadcast %198 : vector<32x1xf32> to vector<32x32xf32>
    %200 = arith.mulf %195, %199 : vector<32x32xf32>
    %201 = vector.broadcast %71 : vector<1x32xf32> to vector<32x32xf32>
    %202 = arith.mulf %200, %201 : vector<32x32xf32>
    %203 = vector.broadcast %72 : vector<1x32xf32> to vector<32x32xf32>
    %204 = arith.addf %202, %203 : vector<32x32xf32>
    %c0_67 = arith.constant 0 : index
    %c0_68 = arith.constant 0 : index
    %c0_69 = arith.constant 0 : index
    %205 = vector.load %arg11[%c0_67, %c0_68, %c0_69] : memref<2x32x64xf32, #tpu.memory_space<vmem>>, vector<1x32x64xf32>
    %206 = vector.shape_cast %205 : vector<1x32x64xf32> to vector<32x64xf32>
    %cst_70 = arith.constant dense<0.000000e+00> : vector<32x64xf32>
    %207 = tpu.matmul %204, %206, %cst_70 {dimension_numbers = #tpu.dot_dimension_numbers<[1], [0], [0], [1], [0, 0, 1, 1], [], []>} : vector<32x32xf32>, vector<32x64xf32>, vector<32x64xf32> -> vector<32x64xf32>
    %208 = vector.broadcast %74 : vector<1x64xf32> to vector<32x64xf32>
    %209 = arith.addf %207, %208 : vector<32x64xf32>
    %cst_71 = arith.constant 5.000000e-01 : f32
    %210 = vector.broadcast %cst_71 : f32 to vector<32x64xf32>
    %211 = arith.mulf %210, %209 : vector<32x64xf32>
    %cst_72 = arith.constant 0.707106769 : f32
    %212 = vector.broadcast %cst_72 : f32 to vector<32x64xf32>
    %213 = arith.mulf %209, %212 : vector<32x64xf32>
    %214 = math.erf %213 : vector<32x64xf32>
    %cst_73 = arith.constant 1.000000e+00 : f32
    %215 = vector.broadcast %cst_73 : f32 to vector<32x64xf32>
    %216 = arith.addf %215, %214 : vector<32x64xf32>
    %217 = arith.mulf %211, %216 : vector<32x64xf32>
    %c0_74 = arith.constant 0 : index
    %c0_75 = arith.constant 0 : index
    %c0_76 = arith.constant 0 : index
    %218 = vector.load %arg12[%c0_74, %c0_75, %c0_76] : memref<2x64x32xf32, #tpu.memory_space<vmem>>, vector<1x64x32xf32>
    %219 = vector.shape_cast %218 : vector<1x64x32xf32> to vector<64x32xf32>
    %cst_77 = arith.constant dense<0.000000e+00> : vector<32x32xf32>
    %220 = tpu.matmul %217, %219, %cst_77 {dimension_numbers = #tpu.dot_dimension_numbers<[1], [0], [0], [1], [0, 0, 1, 1], [], []>} : vector<32x64xf32>, vector<64x32xf32>, vector<32x32xf32> -> vector<32x32xf32>
    %221 = vector.broadcast %73 : vector<1x32xf32> to vector<32x32xf32>
    %222 = arith.addf %220, %221 : vector<32x32xf32>
    %223 = arith.addf %182, %222 : vector<32x32xf32>
    %c1 = arith.constant 1 : index
    %c0_78 = arith.constant 0 : index
    %c0_79 = arith.constant 0 : index
    %224 = vector.load %arg8[%c1, %c0_78, %c0_79] : memref<2x8x128xf32, #tpu.memory_space<vmem>>, vector<1x8x128xf32>
    %225 = vector.shape_cast %224 : vector<1x8x128xf32> to vector<8x128xf32>
    %226 = vector.extract_strided_slice %225 {offsets = [0, 0], sizes = [1, 32], strides = [1, 1]} : vector<8x128xf32> to vector<1x32xf32>
    %227 = vector.extract_strided_slice %225 {offsets = [1, 0], sizes = [1, 32], strides = [1, 1]} : vector<8x128xf32> to vector<1x32xf32>
    %228 = vector.extract_strided_slice %225 {offsets = [2, 0], sizes = [1, 32], strides = [1, 1]} : vector<8x128xf32> to vector<1x32xf32>
    %229 = vector.extract_strided_slice %225 {offsets = [3, 0], sizes = [1, 32], strides = [1, 1]} : vector<8x128xf32> to vector<1x32xf32>
    %230 = vector.extract_strided_slice %225 {offsets = [4, 0], sizes = [1, 32], strides = [1, 1]} : vector<8x128xf32> to vector<1x32xf32>
    %231 = vector.extract_strided_slice %225 {offsets = [5, 0], sizes = [1, 32], strides = [1, 1]} : vector<8x128xf32> to vector<1x32xf32>
    %232 = vector.extract_strided_slice %225 {offsets = [6, 0], sizes = [1, 64], strides = [1, 1]} : vector<8x128xf32> to vector<1x64xf32>
    %cst_80 = arith.constant dense<0.000000e+00> : vector<32xf32>
    %233 = vector.multi_reduction <add>, %223, %cst_80 [1] : vector<32x32xf32> to vector<32xf32>
    %234 = vector.shape_cast %233 : vector<32xf32> to vector<32x1xf32>
    %cst_81 = arith.constant 3.200000e+01 : f32
    %235 = vector.broadcast %cst_81 : f32 to vector<32x1xf32>
    %236 = arith.divf %234, %235 : vector<32x1xf32>
    %237 = vector.broadcast %236 : vector<32x1xf32> to vector<32x32xf32>
    %238 = arith.subf %223, %237 : vector<32x32xf32>
    %239 = arith.mulf %238, %238 : vector<32x32xf32>
    %cst_82 = arith.constant dense<0.000000e+00> : vector<32xf32>
    %240 = vector.multi_reduction <add>, %239, %cst_82 [1] : vector<32x32xf32> to vector<32xf32>
    %241 = vector.shape_cast %240 : vector<32xf32> to vector<32x1xf32>
    %cst_83 = arith.constant 3.200000e+01 : f32
    %242 = vector.broadcast %cst_83 : f32 to vector<32x1xf32>
    %243 = arith.divf %241, %242 : vector<32x1xf32>
    %244 = vector.broadcast %236 : vector<32x1xf32> to vector<32x32xf32>
    %245 = arith.subf %223, %244 : vector<32x32xf32>
    %cst_84 = arith.constant 9.99999974E-6 : f32
    %246 = vector.broadcast %cst_84 : f32 to vector<32x1xf32>
    %247 = arith.addf %243, %246 : vector<32x1xf32>
    %248 = math.rsqrt %247 : vector<32x1xf32>
    %249 = vector.broadcast %248 : vector<32x1xf32> to vector<32x32xf32>
    %250 = arith.mulf %245, %249 : vector<32x32xf32>
    %251 = vector.broadcast %226 : vector<1x32xf32> to vector<32x32xf32>
    %252 = arith.mulf %250, %251 : vector<32x32xf32>
    %253 = vector.broadcast %227 : vector<1x32xf32> to vector<32x32xf32>
    %254 = arith.addf %252, %253 : vector<32x32xf32>
    %c1_85 = arith.constant 1 : index
    %c0_86 = arith.constant 0 : index
    %c0_87 = arith.constant 0 : index
    %255 = vector.load %arg9[%c1_85, %c0_86, %c0_87] : memref<2x32x96xf32, #tpu.memory_space<vmem>>, vector<1x32x96xf32>
    %256 = vector.shape_cast %255 : vector<1x32x96xf32> to vector<32x96xf32>
    %cst_88 = arith.constant dense<0.000000e+00> : vector<32x96xf32>
    %257 = tpu.matmul %254, %256, %cst_88 {dimension_numbers = #tpu.dot_dimension_numbers<[1], [0], [0], [1], [0, 0, 1, 1], [], []>} : vector<32x32xf32>, vector<32x96xf32>, vector<32x96xf32> -> vector<32x96xf32>
    %258 = vector.extract_strided_slice %257 {offsets = [0, 0], sizes = [32, 8], strides = [1, 1]} : vector<32x96xf32> to vector<32x8xf32>
    %259 = vector.extract_strided_slice %257 {offsets = [0, 32], sizes = [32, 8], strides = [1, 1]} : vector<32x96xf32> to vector<32x8xf32>
    %260 = vector.extract_strided_slice %257 {offsets = [0, 64], sizes = [32, 8], strides = [1, 1]} : vector<32x96xf32> to vector<32x8xf32>
    "tpu.trace_start"() <{level = 10 : i32, message = "nd,md->nm"}> : () -> ()
    %cst_89 = arith.constant dense<0.000000e+00> : vector<32x32xf32>
    %261 = tpu.matmul %258, %259, %cst_89 {dimension_numbers = #tpu.dot_dimension_numbers<[1], [1], [0], [0], [0, 0, 1, 0], [], []>} : vector<32x8xf32>, vector<32x8xf32>, vector<32x32xf32> -> vector<32x32xf32>
    "tpu.trace_stop"() : () -> ()
    %cst_90 = arith.constant 0.353553385 : f32
    %262 = vector.broadcast %cst_90 : f32 to vector<32x32xf32>
    %263 = arith.mulf %261, %262 : vector<32x32xf32>
    %264 = arith.addf %263, %3 : vector<32x32xf32>
    %cst_91 = arith.constant dense<0xFF800000> : vector<32xf32>
    %265 = vector.multi_reduction <maximumf>, %264, %cst_91 [1] : vector<32x32xf32> to vector<32xf32>
    %cst_92 = arith.constant 0xFF800000 : f32
    %266 = vector.broadcast %cst_92 : f32 to vector<32xf32>
    %267 = arith.maximumf %266, %265 : vector<32xf32>
    %268 = vector.shape_cast %267 : vector<32xf32> to vector<32x1xf32>
    %269 = vector.broadcast %268 : vector<32x1xf32> to vector<32x32xf32>
    %270 = arith.subf %264, %269 : vector<32x32xf32>
    %271 = math.exp %270 : vector<32x32xf32>
    %cst_93 = arith.constant dense<0.000000e+00> : vector<32xf32>
    %272 = vector.multi_reduction <add>, %271, %cst_93 [1] : vector<32x32xf32> to vector<32xf32>
    %273 = vector.shape_cast %272 : vector<32xf32> to vector<32x1xf32>
    %274 = vector.broadcast %273 : vector<32x1xf32> to vector<32x32xf32>
    %275 = arith.divf %271, %274 : vector<32x32xf32>
    %cst_94 = arith.constant dense<0.000000e+00> : vector<32x8xf32>
    %276 = tpu.matmul %275, %260, %cst_94 {dimension_numbers = #tpu.dot_dimension_numbers<[1], [0], [0], [1], [0, 0, 1, 1], [], []>} : vector<32x32xf32>, vector<32x8xf32>, vector<32x8xf32> -> vector<32x8xf32>
    %277 = vector.extract_strided_slice %257 {offsets = [0, 8], sizes = [32, 8], strides = [1, 1]} : vector<32x96xf32> to vector<32x8xf32>
    %278 = vector.extract_strided_slice %257 {offsets = [0, 40], sizes = [32, 8], strides = [1, 1]} : vector<32x96xf32> to vector<32x8xf32>
    %279 = vector.extract_strided_slice %257 {offsets = [0, 72], sizes = [32, 8], strides = [1, 1]} : vector<32x96xf32> to vector<32x8xf32>
    "tpu.trace_start"() <{level = 10 : i32, message = "nd,md->nm"}> : () -> ()
    %cst_95 = arith.constant dense<0.000000e+00> : vector<32x32xf32>
    %280 = tpu.matmul %277, %278, %cst_95 {dimension_numbers = #tpu.dot_dimension_numbers<[1], [1], [0], [0], [0, 0, 1, 0], [], []>} : vector<32x8xf32>, vector<32x8xf32>, vector<32x32xf32> -> vector<32x32xf32>
    "tpu.trace_stop"() : () -> ()
    %cst_96 = arith.constant 0.353553385 : f32
    %281 = vector.broadcast %cst_96 : f32 to vector<32x32xf32>
    %282 = arith.mulf %280, %281 : vector<32x32xf32>
    %283 = arith.addf %282, %3 : vector<32x32xf32>
    %cst_97 = arith.constant dense<0xFF800000> : vector<32xf32>
    %284 = vector.multi_reduction <maximumf>, %283, %cst_97 [1] : vector<32x32xf32> to vector<32xf32>
    %cst_98 = arith.constant 0xFF800000 : f32
    %285 = vector.broadcast %cst_98 : f32 to vector<32xf32>
    %286 = arith.maximumf %285, %284 : vector<32xf32>
    %287 = vector.shape_cast %286 : vector<32xf32> to vector<32x1xf32>
    %288 = vector.broadcast %287 : vector<32x1xf32> to vector<32x32xf32>
    %289 = arith.subf %283, %288 : vector<32x32xf32>
    %290 = math.exp %289 : vector<32x32xf32>
    %cst_99 = arith.constant dense<0.000000e+00> : vector<32xf32>
    %291 = vector.multi_reduction <add>, %290, %cst_99 [1] : vector<32x32xf32> to vector<32xf32>
    %292 = vector.shape_cast %291 : vector<32xf32> to vector<32x1xf32>
    %293 = vector.broadcast %292 : vector<32x1xf32> to vector<32x32xf32>
    %294 = arith.divf %290, %293 : vector<32x32xf32>
    %cst_100 = arith.constant dense<0.000000e+00> : vector<32x8xf32>
    %295 = tpu.matmul %294, %279, %cst_100 {dimension_numbers = #tpu.dot_dimension_numbers<[1], [0], [0], [1], [0, 0, 1, 1], [], []>} : vector<32x32xf32>, vector<32x8xf32>, vector<32x8xf32> -> vector<32x8xf32>
    %296 = vector.extract_strided_slice %257 {offsets = [0, 16], sizes = [32, 8], strides = [1, 1]} : vector<32x96xf32> to vector<32x8xf32>
    %297 = vector.extract_strided_slice %257 {offsets = [0, 48], sizes = [32, 8], strides = [1, 1]} : vector<32x96xf32> to vector<32x8xf32>
    %298 = vector.extract_strided_slice %257 {offsets = [0, 80], sizes = [32, 8], strides = [1, 1]} : vector<32x96xf32> to vector<32x8xf32>
    "tpu.trace_start"() <{level = 10 : i32, message = "nd,md->nm"}> : () -> ()
    %cst_101 = arith.constant dense<0.000000e+00> : vector<32x32xf32>
    %299 = tpu.matmul %296, %297, %cst_101 {dimension_numbers = #tpu.dot_dimension_numbers<[1], [1], [0], [0], [0, 0, 1, 0], [], []>} : vector<32x8xf32>, vector<32x8xf32>, vector<32x32xf32> -> vector<32x32xf32>
    "tpu.trace_stop"() : () -> ()
    %cst_102 = arith.constant 0.353553385 : f32
    %300 = vector.broadcast %cst_102 : f32 to vector<32x32xf32>
    %301 = arith.mulf %299, %300 : vector<32x32xf32>
    %302 = arith.addf %301, %3 : vector<32x32xf32>
    %cst_103 = arith.constant dense<0xFF800000> : vector<32xf32>
    %303 = vector.multi_reduction <maximumf>, %302, %cst_103 [1] : vector<32x32xf32> to vector<32xf32>
    %cst_104 = arith.constant 0xFF800000 : f32
    %304 = vector.broadcast %cst_104 : f32 to vector<32xf32>
    %305 = arith.maximumf %304, %303 : vector<32xf32>
    %306 = vector.shape_cast %305 : vector<32xf32> to vector<32x1xf32>
    %307 = vector.broadcast %306 : vector<32x1xf32> to vector<32x32xf32>
    %308 = arith.subf %302, %307 : vector<32x32xf32>
    %309 = math.exp %308 : vector<32x32xf32>
    %cst_105 = arith.constant dense<0.000000e+00> : vector<32xf32>
    %310 = vector.multi_reduction <add>, %309, %cst_105 [1] : vector<32x32xf32> to vector<32xf32>
    %311 = vector.shape_cast %310 : vector<32xf32> to vector<32x1xf32>
    %312 = vector.broadcast %311 : vector<32x1xf32> to vector<32x32xf32>
    %313 = arith.divf %309, %312 : vector<32x32xf32>
    %cst_106 = arith.constant dense<0.000000e+00> : vector<32x8xf32>
    %314 = tpu.matmul %313, %298, %cst_106 {dimension_numbers = #tpu.dot_dimension_numbers<[1], [0], [0], [1], [0, 0, 1, 1], [], []>} : vector<32x32xf32>, vector<32x8xf32>, vector<32x8xf32> -> vector<32x8xf32>
    %315 = vector.extract_strided_slice %257 {offsets = [0, 24], sizes = [32, 8], strides = [1, 1]} : vector<32x96xf32> to vector<32x8xf32>
    %316 = vector.extract_strided_slice %257 {offsets = [0, 56], sizes = [32, 8], strides = [1, 1]} : vector<32x96xf32> to vector<32x8xf32>
    %317 = vector.extract_strided_slice %257 {offsets = [0, 88], sizes = [32, 8], strides = [1, 1]} : vector<32x96xf32> to vector<32x8xf32>
    "tpu.trace_start"() <{level = 10 : i32, message = "nd,md->nm"}> : () -> ()
    %cst_107 = arith.constant dense<0.000000e+00> : vector<32x32xf32>
    %318 = tpu.matmul %315, %316, %cst_107 {dimension_numbers = #tpu.dot_dimension_numbers<[1], [1], [0], [0], [0, 0, 1, 0], [], []>} : vector<32x8xf32>, vector<32x8xf32>, vector<32x32xf32> -> vector<32x32xf32>
    "tpu.trace_stop"() : () -> ()
    %cst_108 = arith.constant 0.353553385 : f32
    %319 = vector.broadcast %cst_108 : f32 to vector<32x32xf32>
    %320 = arith.mulf %318, %319 : vector<32x32xf32>
    %321 = arith.addf %320, %3 : vector<32x32xf32>
    %cst_109 = arith.constant dense<0xFF800000> : vector<32xf32>
    %322 = vector.multi_reduction <maximumf>, %321, %cst_109 [1] : vector<32x32xf32> to vector<32xf32>
    %cst_110 = arith.constant 0xFF800000 : f32
    %323 = vector.broadcast %cst_110 : f32 to vector<32xf32>
    %324 = arith.maximumf %323, %322 : vector<32xf32>
    %325 = vector.shape_cast %324 : vector<32xf32> to vector<32x1xf32>
    %326 = vector.broadcast %325 : vector<32x1xf32> to vector<32x32xf32>
    %327 = arith.subf %321, %326 : vector<32x32xf32>
    %328 = math.exp %327 : vector<32x32xf32>
    %cst_111 = arith.constant dense<0.000000e+00> : vector<32xf32>
    %329 = vector.multi_reduction <add>, %328, %cst_111 [1] : vector<32x32xf32> to vector<32xf32>
    %330 = vector.shape_cast %329 : vector<32xf32> to vector<32x1xf32>
    %331 = vector.broadcast %330 : vector<32x1xf32> to vector<32x32xf32>
    %332 = arith.divf %328, %331 : vector<32x32xf32>
    %cst_112 = arith.constant dense<0.000000e+00> : vector<32x8xf32>
    %333 = tpu.matmul %332, %317, %cst_112 {dimension_numbers = #tpu.dot_dimension_numbers<[1], [0], [0], [1], [0, 0, 1, 1], [], []>} : vector<32x32xf32>, vector<32x8xf32>, vector<32x8xf32> -> vector<32x8xf32>
    %334 = tpu.concatenate %276, %295, %314, %333 in 1 : vector<32x8xf32>, vector<32x8xf32>, vector<32x8xf32>, vector<32x8xf32> -> vector<32x32xf32>
    %c1_113 = arith.constant 1 : index
    %c0_114 = arith.constant 0 : index
    %c0_115 = arith.constant 0 : index
    %335 = vector.load %arg10[%c1_113, %c0_114, %c0_115] : memref<2x32x32xf32, #tpu.memory_space<vmem>>, vector<1x32x32xf32>
    %336 = vector.shape_cast %335 : vector<1x32x32xf32> to vector<32x32xf32>
    %cst_116 = arith.constant dense<0.000000e+00> : vector<32x32xf32>
    %337 = tpu.matmul %334, %336, %cst_116 {dimension_numbers = #tpu.dot_dimension_numbers<[1], [0], [0], [1], [0, 0, 1, 1], [], []>} : vector<32x32xf32>, vector<32x32xf32>, vector<32x32xf32> -> vector<32x32xf32>
    %338 = arith.addf %223, %337 : vector<32x32xf32>
    %339 = vector.broadcast %228 : vector<1x32xf32> to vector<32x32xf32>
    %340 = arith.addf %338, %339 : vector<32x32xf32>
    %cst_117 = arith.constant dense<0.000000e+00> : vector<32xf32>
    %341 = vector.multi_reduction <add>, %340, %cst_117 [1] : vector<32x32xf32> to vector<32xf32>
    %342 = vector.shape_cast %341 : vector<32xf32> to vector<32x1xf32>
    %cst_118 = arith.constant 3.200000e+01 : f32
    %343 = vector.broadcast %cst_118 : f32 to vector<32x1xf32>
    %344 = arith.divf %342, %343 : vector<32x1xf32>
    %345 = vector.broadcast %344 : vector<32x1xf32> to vector<32x32xf32>
    %346 = arith.subf %340, %345 : vector<32x32xf32>
    %347 = arith.mulf %346, %346 : vector<32x32xf32>
    %cst_119 = arith.constant dense<0.000000e+00> : vector<32xf32>
    %348 = vector.multi_reduction <add>, %347, %cst_119 [1] : vector<32x32xf32> to vector<32xf32>
    %349 = vector.shape_cast %348 : vector<32xf32> to vector<32x1xf32>
    %cst_120 = arith.constant 3.200000e+01 : f32
    %350 = vector.broadcast %cst_120 : f32 to vector<32x1xf32>
    %351 = arith.divf %349, %350 : vector<32x1xf32>
    %352 = vector.broadcast %344 : vector<32x1xf32> to vector<32x32xf32>
    %353 = arith.subf %340, %352 : vector<32x32xf32>
    %cst_121 = arith.constant 9.99999974E-6 : f32
    %354 = vector.broadcast %cst_121 : f32 to vector<32x1xf32>
    %355 = arith.addf %351, %354 : vector<32x1xf32>
    %356 = math.rsqrt %355 : vector<32x1xf32>
    %357 = vector.broadcast %356 : vector<32x1xf32> to vector<32x32xf32>
    %358 = arith.mulf %353, %357 : vector<32x32xf32>
    %359 = vector.broadcast %229 : vector<1x32xf32> to vector<32x32xf32>
    %360 = arith.mulf %358, %359 : vector<32x32xf32>
    %361 = vector.broadcast %230 : vector<1x32xf32> to vector<32x32xf32>
    %362 = arith.addf %360, %361 : vector<32x32xf32>
    %c1_122 = arith.constant 1 : index
    %c0_123 = arith.constant 0 : index
    %c0_124 = arith.constant 0 : index
    %363 = vector.load %arg11[%c1_122, %c0_123, %c0_124] : memref<2x32x64xf32, #tpu.memory_space<vmem>>, vector<1x32x64xf32>
    %364 = vector.shape_cast %363 : vector<1x32x64xf32> to vector<32x64xf32>
    %cst_125 = arith.constant dense<0.000000e+00> : vector<32x64xf32>
    %365 = tpu.matmul %362, %364, %cst_125 {dimension_numbers = #tpu.dot_dimension_numbers<[1], [0], [0], [1], [0, 0, 1, 1], [], []>} : vector<32x32xf32>, vector<32x64xf32>, vector<32x64xf32> -> vector<32x64xf32>
    %366 = vector.broadcast %232 : vector<1x64xf32> to vector<32x64xf32>
    %367 = arith.addf %365, %366 : vector<32x64xf32>
    %cst_126 = arith.constant 5.000000e-01 : f32
    %368 = vector.broadcast %cst_126 : f32 to vector<32x64xf32>
    %369 = arith.mulf %368, %367 : vector<32x64xf32>
    %cst_127 = arith.constant 0.707106769 : f32
    %370 = vector.broadcast %cst_127 : f32 to vector<32x64xf32>
    %371 = arith.mulf %367, %370 : vector<32x64xf32>
    %372 = math.erf %371 : vector<32x64xf32>
    %cst_128 = arith.constant 1.000000e+00 : f32
    %373 = vector.broadcast %cst_128 : f32 to vector<32x64xf32>
    %374 = arith.addf %373, %372 : vector<32x64xf32>
    %375 = arith.mulf %369, %374 : vector<32x64xf32>
    %c1_129 = arith.constant 1 : index
    %c0_130 = arith.constant 0 : index
    %c0_131 = arith.constant 0 : index
    %376 = vector.load %arg12[%c1_129, %c0_130, %c0_131] : memref<2x64x32xf32, #tpu.memory_space<vmem>>, vector<1x64x32xf32>
    %377 = vector.shape_cast %376 : vector<1x64x32xf32> to vector<64x32xf32>
    %cst_132 = arith.constant dense<0.000000e+00> : vector<32x32xf32>
    %378 = tpu.matmul %375, %377, %cst_132 {dimension_numbers = #tpu.dot_dimension_numbers<[1], [0], [0], [1], [0, 0, 1, 1], [], []>} : vector<32x64xf32>, vector<64x32xf32>, vector<32x32xf32> -> vector<32x32xf32>
    %379 = vector.broadcast %231 : vector<1x32xf32> to vector<32x32xf32>
    %380 = arith.addf %378, %379 : vector<32x32xf32>
    %381 = arith.addf %340, %380 : vector<32x32xf32>
    %cst_133 = arith.constant dense<0.000000e+00> : vector<32xf32>
    %382 = vector.multi_reduction <add>, %381, %cst_133 [1] : vector<32x32xf32> to vector<32xf32>
    %383 = vector.shape_cast %382 : vector<32xf32> to vector<32x1xf32>
    %cst_134 = arith.constant 3.200000e+01 : f32
    %384 = vector.broadcast %cst_134 : f32 to vector<32x1xf32>
    %385 = arith.divf %383, %384 : vector<32x1xf32>
    %386 = vector.broadcast %385 : vector<32x1xf32> to vector<32x32xf32>
    %387 = arith.subf %381, %386 : vector<32x32xf32>
    %388 = arith.mulf %387, %387 : vector<32x32xf32>
    %cst_135 = arith.constant dense<0.000000e+00> : vector<32xf32>
    %389 = vector.multi_reduction <add>, %388, %cst_135 [1] : vector<32x32xf32> to vector<32xf32>
    %390 = vector.shape_cast %389 : vector<32xf32> to vector<32x1xf32>
    %cst_136 = arith.constant 3.200000e+01 : f32
    %391 = vector.broadcast %cst_136 : f32 to vector<32x1xf32>
    %392 = arith.divf %390, %391 : vector<32x1xf32>
    %393 = vector.broadcast %385 : vector<32x1xf32> to vector<32x32xf32>
    %394 = arith.subf %381, %393 : vector<32x32xf32>
    %cst_137 = arith.constant 9.99999974E-6 : f32
    %395 = vector.broadcast %cst_137 : f32 to vector<32x1xf32>
    %396 = arith.addf %392, %395 : vector<32x1xf32>
    %397 = math.rsqrt %396 : vector<32x1xf32>
    %398 = vector.broadcast %397 : vector<32x1xf32> to vector<32x32xf32>
    %399 = arith.mulf %394, %398 : vector<32x32xf32>
    %400 = vector.broadcast %10 : vector<1x32xf32> to vector<32x32xf32>
    %401 = arith.mulf %399, %400 : vector<32x32xf32>
    %402 = vector.broadcast %11 : vector<1x32xf32> to vector<32x32xf32>
    %403 = arith.addf %401, %402 : vector<32x32xf32>
    %c0_138 = arith.constant 0 : index
    %c0_139 = arith.constant 0 : index
    %404 = vector.load %arg7[%c0_138, %c0_139] : memref<32x64xf32, #tpu.memory_space<vmem>>, vector<32x64xf32>
    %cst_140 = arith.constant dense<0.000000e+00> : vector<32x64xf32>
    %405 = tpu.matmul %403, %404, %cst_140 {dimension_numbers = #tpu.dot_dimension_numbers<[1], [0], [0], [1], [0, 0, 1, 1], [], []>} : vector<32x32xf32>, vector<32x64xf32>, vector<32x64xf32> -> vector<32x64xf32>
    %406 = vector.broadcast %12 : vector<1x64xf32> to vector<32x64xf32>
    %407 = arith.addf %405, %406 : vector<32x64xf32>
    %408 = arith.subf %407, %0 : vector<32x64xf32>
    %409 = math.absf %408 : vector<32x64xf32>
    %410 = arith.mulf %409, %1 : vector<32x64xf32>
    %411 = vector.shape_cast %410 : vector<32x64xf32> to vector<1x32x64xf32>
    %cst_141 = arith.constant dense<0.000000e+00> : vector<1xf32>
    %412 = vector.multi_reduction <add>, %411, %cst_141 [1, 2] : vector<1x32x64xf32> to vector<1xf32>
    %413 = vector.shape_cast %412 : vector<1xf32> to vector<1x1x1xf32>
    %414 = vector.extract %413[0, 0, 0] : f32 from vector<1x1x1xf32>
    %cst_142 = arith.constant 1.22070313E-4 : f32
    %415 = arith.mulf %414, %cst_142 : f32
    %416 = vector.broadcast %415 : f32 to vector<1x128xf32>
    %c0_143 = arith.constant 0 : index
    %c0_144 = arith.constant 0 : index
    %417 = vector.load %arg13[%c0_143, %c0_144] : memref<1x128xf32, #tpu.memory_space<vmem>>, vector<1x128xf32>
    tpu.vector_store %arg13[%c0_143, %c0_144], %416 {strides = array<i32>} : memref<1x128xf32, #tpu.memory_space<vmem>>, vector<1x128xf32>,
    return
  }
  func.func @transform_0(%arg0: i32) -> (i32, i32) {
    %c0_i32 = arith.constant 0 : i32
    %c0_i32_0 = arith.constant 0 : i32
    %c0_i32_1 = arith.constant 0 : i32
    return %c0_i32, %c0_i32_0 : i32, i32
  }
  func.func @transform_1(%arg0: i32) -> (i32, i32) {
    %c0_i32 = arith.constant 0 : i32
    %c0_i32_0 = arith.constant 0 : i32
    %c0_i32_1 = arith.constant 0 : i32
    return %c0_i32, %c0_i32_0 : i32, i32
  }
  func.func @transform_2(%arg0: i32) -> (i32, i32) {
    %c0_i32 = arith.constant 0 : i32
    %c0_i32_0 = arith.constant 0 : i32
    %c0_i32_1 = arith.constant 0 : i32
    return %c0_i32, %c0_i32_0 : i32, i32
  }
  func.func @transform_3(%arg0: i32) -> (i32, i32) {
    %c0_i32 = arith.constant 0 : i32
    %c0_i32_0 = arith.constant 0 : i32
    %c0_i32_1 = arith.constant 0 : i32
    return %c0_i32, %c0_i32_0 : i32, i32
  }
  func.func @transform_4(%arg0: i32) -> (i32, i32) {
    %c0_i32 = arith.constant 0 : i32
    %c0_i32_0 = arith.constant 0 : i32
    %c0_i32_1 = arith.constant 0 : i32
    return %c0_i32, %c0_i32_0 : i32, i32
  }
  func.func @transform_5(%arg0: i32) -> (i32, i32) {
    %c0_i32 = arith.constant 0 : i32
    %c0_i32_0 = arith.constant 0 : i32
    %c0_i32_1 = arith.constant 0 : i32
    return %c0_i32, %c0_i32_0 : i32, i32
  }
  func.func @transform_6(%arg0: i32) -> (i32, i32) {
    %c0_i32 = arith.constant 0 : i32
    %c0_i32_0 = arith.constant 0 : i32
    %c0_i32_1 = arith.constant 0 : i32
    return %c0_i32, %c0_i32_0 : i32, i32
  }
  func.func @transform_7(%arg0: i32) -> (i32, i32, i32) {
    %c0_i32 = arith.constant 0 : i32
    %c0_i32_0 = arith.constant 0 : i32
    %c0_i32_1 = arith.constant 0 : i32
    %c0_i32_2 = arith.constant 0 : i32
    return %c0_i32, %c0_i32_0, %c0_i32_1 : i32, i32, i32
  }
  func.func @transform_8(%arg0: i32) -> (i32, i32, i32) {
    %c0_i32 = arith.constant 0 : i32
    %c0_i32_0 = arith.constant 0 : i32
    %c0_i32_1 = arith.constant 0 : i32
    %c0_i32_2 = arith.constant 0 : i32
    return %c0_i32, %c0_i32_0, %c0_i32_1 : i32, i32, i32
  }
  func.func @transform_9(%arg0: i32) -> (i32, i32, i32) {
    %c0_i32 = arith.constant 0 : i32
    %c0_i32_0 = arith.constant 0 : i32
    %c0_i32_1 = arith.constant 0 : i32
    %c0_i32_2 = arith.constant 0 : i32
    return %c0_i32, %c0_i32_0, %c0_i32_1 : i32, i32, i32
  }
  func.func @transform_10(%arg0: i32) -> (i32, i32, i32) {
    %c0_i32 = arith.constant 0 : i32
    %c0_i32_0 = arith.constant 0 : i32
    %c0_i32_1 = arith.constant 0 : i32
    %c0_i32_2 = arith.constant 0 : i32
    return %c0_i32, %c0_i32_0, %c0_i32_1 : i32, i32, i32
  }
  func.func @transform_11(%arg0: i32) -> (i32, i32, i32) {
    %c0_i32 = arith.constant 0 : i32
    %c0_i32_0 = arith.constant 0 : i32
    %c0_i32_1 = arith.constant 0 : i32
    %c0_i32_2 = arith.constant 0 : i32
    return %c0_i32, %c0_i32_0, %c0_i32_1 : i32, i32, i32
  }
  func.func @transform_12(%arg0: i32) -> (i32, i32) {
    %c0_i32 = arith.constant 0 : i32
    %c0_i32_0 = arith.constant 0 : i32
    %c0_i32_1 = arith.constant 0 : i32
    return %c0_i32, %c0_i32_0 : i32, i32
  }
}

</mosaic_0001>

<bundles_post_ra>
// kernel: eq.8
= control target key start
LH: loop header
LB: loop body
LE: loop exit
PB: predicated region body
PF: predicated region fallthrough
CT: control target
= control target key end

     0   :  { %vm8_vm0 = vcmask 130048   ;;  %vm14_vm1 = vcmask 261248   ;;  %s42_s0 = inlined_call_operand.vmem [shape: s32[2,16], index: 0, kind: input, shape index: {}]   ;;  %s43_s1 = inlined_call_operand.vmem [shape: s32[32], index: 1, kind: output, shape index: {}]  }
   0x1   :  { %v5_v0 = vld [vmem:[%s42_s0] sm:$0x3]  ;;  %s25_s0 = smov 16  }
   0x2   :  { %6 = vst [vmem:[#allocation1] sm:$0x3] %v5_v0 }
   0x9   :  { %v11_v1 = vld [vmem:[#allocation1 + $0x1] sm:$0x1]   ;;  %v7_v2 = vld [vmem:[#allocation1] sm:$0x1]  }
   0xa   :  { %12 = vrot.lane.b32.xlu0 %v11_v1, %s25_s0  ;;  %9 = vst.msk [vmem:[#allocation0] sm:$0x1] %vm8_vm0, %v7_v2  }
  0x7c   :  { %v13_v3 = vpop.permute.xlu0 %12  }
  0x7d   :  { %15 = vst.msk [vmem:[#allocation0] sm:$0x1] %vm14_vm1, %v13_v3  }
  0x84   :  { %v20_v4 = vld [vmem:[#allocation0] sm:$0x1] }
  0x85   :  { %23 = vst [vmem:[%s43_s1] sm:$0x1] %v20_v4 }

// kernel: simmim_forward.1
= control target key start
LH: loop header
LB: loop body
LE: loop exit
PB: predicated region body
PF: predicated region fallthrough
CT: control target
= control target key end

     0   :  { %vm59_vm0 = vcmask 523264   ;;  %s6225_s0 = inlined_call_operand.vmem [shape: f32[32,64], index: 0, kind: input, shape index: {}]   ;;  %s6226_s1 = inlined_call_operand.vmem [shape: f32[32,64], index: 1, kind: input, shape index: {}]   ;;  %s6227_s2 = inlined_call_operand.vmem [shape: f32[32,32], index: 2, kind: input, shape index: {}]   ;;  %s6228_s3 = inlined_call_operand.vmem [shape: f32[32,32], index: 3, kind: input, shape index: {}]   ;;  %s6229_s4 = inlined_call_operand.vmem [shape: f32[8,128], index: 4, kind: input, shape index: {}]   ;;  %s6230_s5 = inlined_call_operand.vmem [shape: f32[64,32], index: 5, kind: input, shape index: {}]   ;;  %s6231_s6 = inlined_call_operand.vmem [shape: f32[32,64], index: 6, kind: input, shape index: {}]   ;;  %s6232_s7 = inlined_call_operand.vmem [shape: f32[2,8,128], index: 7, kind: input, shape index: {}]   ;;  %s6233_s8 = inlined_call_operand.vmem [shape: f32[2,32,96], index: 8, kind: input, shape index: {}]   ;;  %s6234_s9 = inlined_call_operand.vmem [shape: f32[2,32,32], index: 9, kind: input, shape index: {}]   ;;  %s6235_s10 = inlined_call_operand.vmem [shape: f32[2,32,64], index: 10, kind: input, shape index: {}]   ;;  %s6236_s11 = inlined_call_operand.vmem [shape: f32[2,64,32], index: 11, kind: input, shape index: {}]   ;;  %s6237_s12 = inlined_call_operand.hbm [shape: f32[1,128], index: 12, kind: output, shape index: {}]  }
   0x1   :  { %v42_v0 = vld [vmem:[%s6225_s0] sm:$0xff]  ;;  %v44_v1 = vld [vmem:[%s6225_s0 + $0x10] sm:$0xff]  ;;  %v43_v2 = vld [vmem:[%s6225_s0 + $0x8] sm:$0xff] }
   0x2   :  { %v60_v3 = vsel %vm59_vm0, %v42_v0, 0.0  ;;  %v66_v4 = vsel %vm59_vm0, %v44_v1, 0.0  ;;  %v45_v5 = vld [vmem:[%s6225_s0 + $0x18] sm:$0xff] }
   0x3   :  { %17 = vsyncpa [#allocation3], 0  ;;  %61 = vadd.xlane.f32.xlu0 %v60_v3  ;;  %67 = vadd.xlane.f32.xlu1 %v66_v4  ;;  %v63_v6 = vsel %vm59_vm0, %v43_v2, 0.0  ;;  %v69_v7 = vsel %vm59_vm0, %v45_v5, 0.0  ;;  %v136_v28 = vld [vmem:[%s6230_s5 + $0x38] sm:$0xff]  ;;  %v135_v29 = vld [vmem:[%s6230_s5 + $0x30] sm:$0xff]  ;;  %v113_v43 = vlaneseq }
   0x4   :  { %4437 = vmatprep.subr.mxu0 %v136_v28  ;;  %v134_v30 = vld [vmem:[%s6230_s5 + $0x28] sm:$0xff]  ;;  %v133_v31 = vld [vmem:[%s6230_s5 + $0x20] sm:$0xff]  ;;  %v132_v32 = vld [vmem:[%s6230_s5 + $0x18] sm:$0xff]  ;;  %vm238_vm1 = vcmask 261120   ;;  %vm502_vm2 = vcmask 64512   ;;  %s5079_s16 = smov 96  }
   0x5   :  { %4438 = vmatpush3.msra.mxu0 %v136_v28  ;;  %v131_v33 = vld [vmem:[%s6230_s5 + $0x10] sm:$0xff]  ;;  %v130_v34 = vld [vmem:[%s6230_s5 + $0x8] sm:$0xff]  ;;  %v129_v35 = vld [vmem:[%s6230_s5] sm:$0xff]  ;;  %v5219_v48 = vshrl.u32 %v113_v43, 7  ;;  %s5080_s25 = smov 64   ;;  %s5082_s26 = smov 120  }
   0x6   :  { %4439 = vmatprep.subr.mxu0 %v135_v29  ;;  %v5227_v51 = vld [vmem:[%s6229_s4] sm:$0xff]  ;;  %s5083_s5 = smov 56   ;;  %s5084_s27 = smov 80   ;;  %vm1651_vm3 = vcmask 130048   ;;  %vm1656_vm4 = vcmask 195584  }
   0x7   :  { %64 = vadd.xlane.f32.xlu0 %v63_v6  ;;  %70 = vadd.xlane.f32.xlu1 %v69_v7  ;;  %v5222_v50 = vsub.s32 0, %v5219_v48  ;;  %v5230_v52 = vsub.s32 1, %v5219_v48  ;;  %v5245_v7 = vsub.s32 2, %v5219_v48  ;;  %s5085_s28 = smov 112   ;;  %s5086_s29 = smov 48  }
   0x8   :  { %4440 = vmatpush3.msra.mxu0 %v135_v29  ;;  %s5087_s30 = smov 72   ;;  %s5088_s13 = smov 104  }
   0x9   :  { %4441 = vmatprep.subr.mxu0 %v134_v30  ;;  %v116_v53 = vrot.slane %v5227_v51, %v5222_v50  ;;  %v124_v56 = vrot.slane %v5227_v51, %v5230_v52  ;;  %s5089_s14 = smov 40   ;;  %s5090_s15 = smov 8  }
   0xa   :  { %4442 = vmatpush3.msra.mxu0 %v134_v30  ;;  %s6238_s17 = smov 16   ;;  %s6240_s18 = smov 24  }
   0xb   :  { %4443 = vmatprep.subr.mxu0 %v133_v31 }
   0xc   :  { %4444 = vmatpush3.msra.mxu0 %v133_v31 }
   0xd   :  { %4445 = vmatprep.subr.mxu0 %v132_v32 }
   0xe   :  { %4446 = vmatpush3.msra.mxu0 %v132_v32 }
   0xf   :  { %4447 = vmatprep.subr.mxu0 %v131_v33 }
  0x10   :  { %4448 = vmatpush3.msra.mxu0 %v131_v33 }
  0x11   :  { %4449 = vmatprep.subr.mxu0 %v130_v34 }
  0x12   :  { %4450 = vmatpush3.msra.mxu0 %v130_v34 }
  0x13   :  { %4451 = vmatprep.subr.mxu0 %v129_v35 }
  0x14   :  { %4452 = vmatpush3.msra.mxu0 %v129_v35 }
  0x8c   :  { %v62_v8 = vpop.xlane.xlu0 %61  ;;  %v68_v9 = vpop.xlane.xlu1 %67 }
  0x8d   :  { %v73_v10 = vmul.f32 0.015625, %v62_v8  ;;  %v75_v11 = vmul.f32 0.015625, %v68_v9  ;;  %v140_v8 = vrot.slane %v5227_v51, %v5245_v7 }
  0x8f   :  { %v5175_v12 = vsub.f32 %v42_v0, %v73_v10  ;;  %v5177_v13 = vsub.f32 %v44_v1, %v75_v11 }
  0x90   :  { %v65_v14 = vpop.xlane.xlu0 %64  ;;  %v71_v15 = vpop.xlane.xlu1 %70 }
  0x91   :  { %v74_v16 = vmul.f32 0.015625, %v65_v14  ;;  %v76_v17 = vmul.f32 0.015625, %v71_v15  ;;  %v81_v18 = vmul.f32 %v5175_v12, %v5175_v12  ;;  %v83_v19 = vmul.f32 %v5177_v13, %v5177_v13 }
  0x93   :  { %v5183_v20 = vsub.f32 %v43_v2, %v74_v16  ;;  %v5185_v21 = vsub.f32 %v45_v5, %v76_v17  ;;  %v85_v22 = vsel %vm59_vm0, %v81_v18, 0.0  ;;  %v91_v23 = vsel %vm59_vm0, %v83_v19, 0.0 }
  0x94   :  { %86 = vadd.xlane.f32.xlu0 %v85_v22 }
  0x95   :  { %v82_v24 = vmul.f32 %v5183_v20, %v5183_v20  ;;  %v84_v25 = vmul.f32 %v5185_v21, %v5185_v21 }
  0x97   :  { %v88_v26 = vsel %vm59_vm0, %v82_v24, 0.0  ;;  %v94_v27 = vsel %vm59_vm0, %v84_v25, 0.0 }
  0x98   :  { %92 = vadd.xlane.f32.xlu0 %v91_v23  ;;  %89 = vadd.xlane.f32.xlu1 %v88_v26 }
  0x9c   :  { %95 = vadd.xlane.f32.xlu1 %v94_v27 }
 0x11d   :  { %v87_v36 = vpop.xlane.xlu0 %86 }
 0x11e   :  { %v97_v37 = vmul.f32 0.015625, %v87_v36 }
 0x120   :  { %v101_v38 = vadd.f32 1e-05, %v97_v37 }
 0x121   :  { %v90_v39 = vpop.xlane.xlu1 %89  ;;  %v93_v40 = vpop.xlane.xlu0 %92 }
 0x122   :  { %4842 = vrsqrt.f32 %v101_v38  ;;  %v98_v41 = vmul.f32 0.015625, %v90_v39  ;;  %v99_v42 = vmul.f32 0.015625, %v93_v40 }
 0x124   :  { %v102_v44 = vadd.f32 1e-05, %v98_v41  ;;  %v103_v45 = vadd.f32 1e-05, %v99_v42 }
 0x125   :  { %v96_v46 = vpop.xlane.xlu1 %95 }
 0x126   :  { %4844 = vrsqrt.f32 %v102_v44  ;;  %v100_v47 = vmul.f32 0.015625, %v96_v46 }
 0x127   :  { %4846 = vrsqrt.f32 %v103_v45 }
 0x128   :  { %v104_v49 = vadd.f32 1e-05, %v100_v47 }
 0x12a   :  { %4848 = vrsqrt.f32 %v104_v49 }
 0x12f   :  { %v4843_v54 = vpop.eup %4842 }
 0x130   :  { %v109_v55 = vmul.f32 %v4843_v54, %v5175_v12 }
 0x132   :  { %v117_v57 = vmul.f32 %v116_v53, %v109_v55 }
 0x133   :  { %v4845_v58 = vpop.eup %4844 }
 0x134   :  { %v4847_v59 = vpop.eup %4846  ;;  %v125_v60 = vadd.f32 %v124_v56, %v117_v57  ;;  %v110_v61 = vmul.f32 %v4845_v58, %v5183_v20  ;;  %v5258_v57 = vsub.s32 3, %v5219_v48  ;;  %v5261_v58 = vsub.s32 4, %v5219_v48 }
 0x135   :  { %v111_v62 = vmul.f32 %v4847_v59, %v5177_v13 }
 0x136   :  { %4453 = vmatprep.mubr.msk.f32.mxu0 %vm59_vm0, %v125_v60  ;;  %v118_v63 = vmul.f32 %v116_v53, %v110_v61  ;;  %v295_v59 = vrot.slane %v5227_v51, %v5258_v57  ;;  %v47_v61 = vld [vmem:[%s6226_s1 + $0x8] sm:$0xff] }
 0x137   :  { %v4849_v0 = vpop.eup %4848  ;;  %v119_v1 = vmul.f32 %v116_v53, %v111_v62 }
 0x138   :  { %v126_v2 = vadd.f32 %v124_v56, %v118_v63  ;;  %v112_v3 = vmul.f32 %v4849_v0, %v5185_v21  ;;  %v303_v63 = vrot.slane %v5227_v51, %v5261_v58  ;;  %v48_v51 = vld [vmem:[%s6226_s1 + $0x10] sm:$0xff] }
 0x139   :  { %v127_v4 = vadd.f32 %v124_v56, %v119_v1  ;;  %v46_v1 = vld [vmem:[%s6226_s1] sm:$0xff] }
 0x13a   :  { %4454 = vmatmul.mubr.msk.f32.vlgmr.msra.gmra.mxu0 %vm59_vm0, %v126_v2  ;;  %v120_v5 = vmul.f32 %v116_v53, %v112_v3  ;;  %v309_v3 = vsub.f32 1.0, %v47_v61 }
 0x13b   :  { %4456 = vmatprep.mubr.msk.f32.mxu0 %vm59_vm0, %v127_v4 }
 0x13c   :  { %v128_v6 = vadd.f32 %v124_v56, %v120_v5  ;;  %v49_v5 = vld [vmem:[%s6226_s1 + $0x18] sm:$0xff] }
 0x13e   :  { %4457 = vmatmul.mubr.msk.f32.gmra.mxu0 %vm59_vm0, %v128_v6 }
 0x1fa   :  { %v4455_v9 = vpop.f32.mrf.mxu0 }
 0x1fb   :  { %v225_v10 = vadd.f32 %v4455_v9, %v140_v8 }
 0x1fc   :  { %v219_v11 = vpop.f32.mrf.mxu0 }
 0x1fd   :  { %v220_v12 = vadd.f32 %v219_v11, %v140_v8  ;;  %v242_v13 = vsel %vm238_vm1, %v225_v10, 0.0 }
 0x1fe   :  { %243 = vadd.xlane.f32.xlu1 %v242_v13  ;;  %v4458_v14 = vpop.f32.mrf.mxu0  ;;  %v51_v13 = vld [vmem:[%s6227_s2 + $0x8] sm:$0xff] }
 0x1ff   :  { %v235_v15 = vadd.f32 %v4458_v14, %v140_v8  ;;  %v239_v16 = vsel %vm238_vm1, %v220_v12, 0.0  ;;  %v311_v14 = vsub.f32 1.0, %v49_v5 }
 0x200   :  { %240 = vadd.xlane.f32.xlu0 %v239_v16  ;;  %v229_v17 = vpop.f32.mrf.mxu0 }
 0x201   :  { %v230_v18 = vadd.f32 %v229_v17, %v140_v8  ;;  %v248_v19 = vsel %vm238_vm1, %v235_v15, 0.0 }
 0x202   :  { %249 = vadd.xlane.f32.xlu1 %v248_v19  ;;  %v50_v19 = vld [vmem:[%s6227_s2] sm:$0xff] }
 0x203   :  { %v245_v20 = vsel %vm238_vm1, %v230_v18, 0.0 }
 0x204   :  { %246 = vadd.xlane.f32.xlu0 %v245_v20  ;;  %v310_v20 = vsub.f32 1.0, %v48_v51 }
 0x287   :  { %v244_v21 = vpop.xlane.xlu1 %243 }
 0x288   :  { %v253_v22 = vmul.f32 0.03125, %v244_v21 }
 0x289   :  { %v241_v23 = vpop.xlane.xlu0 %240 }
 0x28a   :  { %v257_v24 = vsub.f32 %v225_v10, %v253_v22  ;;  %v252_v25 = vmul.f32 0.03125, %v241_v23  ;;  %v308_v10 = vsub.f32 1.0, %v46_v1  ;;  %v390_v1 = vld [vmem:[%s6233_s8 + $0x8] sm:$0xff] }
 0x28b   :  { %v250_v26 = vpop.xlane.xlu1 %249 }
 0x28c   :  { %v256_v27 = vsub.f32 %v220_v12, %v252_v25  ;;  %v255_v28 = vmul.f32 0.03125, %v250_v26  ;;  %v261_v29 = vmul.f32 %v257_v24, %v257_v24  ;;  %v53_v25 = vld [vmem:[%s6227_s2 + $0x18] sm:$0xff] }
 0x28d   :  { %v247_v30 = vpop.xlane.xlu0 %246 }
 0x28e   :  { %v259_v31 = vsub.f32 %v235_v15, %v255_v28  ;;  %v254_v32 = vmul.f32 0.03125, %v247_v30  ;;  %v267_v33 = vsel %vm238_vm1, %v261_v29, 0.0  ;;  %v260_v34 = vmul.f32 %v256_v27, %v256_v27  ;;  %v52_v30 = vld [vmem:[%s6227_s2 + $0x10] sm:$0xff]  ;;  %s5081_s2 = smov 88  }
 0x28f   :  { %268 = vadd.xlane.f32.xlu1 %v267_v33 }
 0x290   :  { %v258_v35 = vsub.f32 %v230_v18, %v254_v32  ;;  %v264_v36 = vsel %vm238_vm1, %v260_v34, 0.0  ;;  %v263_v37 = vmul.f32 %v259_v31, %v259_v31 }
 0x291   :  { %265 = vadd.xlane.f32.xlu0 %v264_v36 }
 0x292   :  { %v273_v38 = vsel %vm238_vm1, %v263_v37, 0.0  ;;  %v262_v39 = vmul.f32 %v258_v35, %v258_v35 }
 0x293   :  { %274 = vadd.xlane.f32.xlu1 %v273_v38 }
 0x294   :  { %v270_v40 = vsel %vm238_vm1, %v262_v39, 0.0 }
 0x295   :  { %271 = vadd.xlane.f32.xlu0 %v270_v40 }
 0x318   :  { %v269_v41 = vpop.xlane.xlu1 %268 }
 0x319   :  { %v277_v42 = vmul.f32 0.03125, %v269_v41 }
 0x31a   :  { %v266_v43 = vpop.xlane.xlu0 %265 }
 0x31b   :  { %v281_v44 = vadd.f32 1e-05, %v277_v42  ;;  %v276_v45 = vmul.f32 0.03125, %v266_v43 }
 0x31c   :  { %v275_v46 = vpop.xlane.xlu1 %274 }
 0x31d   :  { %4850 = vrsqrt.f32 %v281_v44  ;;  %v280_v47 = vadd.f32 1e-05, %v276_v45  ;;  %v279_v49 = vmul.f32 0.03125, %v275_v46 }
 0x31e   :  { %v272_v53 = vpop.xlane.xlu0 %271 }
 0x31f   :  { %4852 = vrsqrt.f32 %v280_v47  ;;  %v283_v54 = vadd.f32 1e-05, %v279_v49  ;;  %v278_v55 = vmul.f32 0.03125, %v272_v53 }
 0x321   :  { %4854 = vrsqrt.f32 %v283_v54  ;;  %v282_v56 = vadd.f32 1e-05, %v278_v55 }
 0x323   :  { %4856 = vrsqrt.f32 %v282_v56 }
 0x32a   :  { %v4851_v60 = vpop.eup %4850 }
 0x32b   :  { %v289_v62 = vmul.f32 %v4851_v60, %v257_v24 }
 0x32c   :  { %v4853_v0 = vpop.eup %4852 }
 0x32d   :  { %v297_v2 = vmul.f32 %v295_v59, %v289_v62  ;;  %v288_v4 = vmul.f32 %v4853_v0, %v256_v27  ;;  %v391_v0 = vld [vmem:[%s6233_s8 + $0x10] sm:$0xff] }
 0x32e   :  { %v4855_v6 = vpop.eup %4854 }
 0x32f   :  { %v305_v8 = vadd.f32 %v303_v63, %v297_v2  ;;  %v296_v9 = vmul.f32 %v295_v59, %v288_v4  ;;  %v291_v11 = vmul.f32 %v4855_v6, %v259_v31  ;;  %v389_v2 = vld [vmem:[%s6233_s8] sm:$0xff] }
 0x330   :  { %v4857_v12 = vpop.eup %4856 }
 0x331   :  { %v313_v15 = vmul.f32 %v309_v3, %v305_v8  ;;  %v304_v16 = vadd.f32 %v303_v63, %v296_v9  ;;  %v299_v17 = vmul.f32 %v295_v59, %v291_v11  ;;  %v290_v18 = vmul.f32 %v4857_v12, %v258_v35 }
 0x333   :  { %v5285_v21 = vadd.f32 %v313_v15, %v51_v13  ;;  %v312_v22 = vmul.f32 %v308_v10, %v304_v16  ;;  %v307_v23 = vadd.f32 %v303_v63, %v299_v17  ;;  %v298_v24 = vmul.f32 %v295_v59, %v290_v18  ;;  %v320_v15 = vld [vmem:[%s6232_s7] sm:$0xff] }
 0x334   :  { %v376_v17 = vrot.slane %v320_v15, %v5222_v50 }
 0x335   :  { %v324_v26 = vsel %vm238_vm1, %v5285_v21, 0.0  ;;  %v5292_v27 = vadd.f32 %v312_v22, %v50_v19  ;;  %v315_v28 = vmul.f32 %v311_v14, %v307_v23  ;;  %v306_v29 = vadd.f32 %v303_v63, %v298_v24  ;;  %v392_v63 = vld [vmem:[%s6233_s8 + $0x18] sm:$0xff] }
 0x336   :  { %325 = vadd.xlane.f32.xlu1 %v324_v26  ;;  %4459 = vmatprep.subr.mxu1 %v392_v63  ;;  %v384_v23 = vrot.slane %v320_v15, %v5230_v52 }
 0x337   :  { %v321_v31 = vsel %vm238_vm1, %v5292_v27, 0.0  ;;  %v5299_v32 = vadd.f32 %v315_v28, %v53_v25  ;;  %v314_v33 = vmul.f32 %v310_v20, %v306_v29  ;;  %4460 = vmatpush3.msra.mxu1 %v392_v63 }
 0x338   :  { %322 = vadd.xlane.f32.xlu0 %v321_v31  ;;  %4461 = vmatprep.subr.mxu1 %v391_v0 }
 0x339   :  { %v330_v34 = vsel %vm238_vm1, %v5299_v32, 0.0  ;;  %v5303_v35 = vadd.f32 %v314_v33, %v52_v30  ;;  %4462 = vmatpush3.msra.mxu1 %v391_v0 }
 0x33a   :  { %331 = vadd.xlane.f32.xlu1 %v330_v34  ;;  %4463 = vmatprep.subr.mxu1 %v390_v1 }
 0x33b   :  { %v327_v36 = vsel %vm238_vm1, %v5303_v35, 0.0  ;;  %4464 = vmatpush3.msra.mxu1 %v390_v1 }
 0x33c   :  { %328 = vadd.xlane.f32.xlu0 %v327_v36  ;;  %4465 = vmatprep.subr.mxu1 %v389_v2 }
 0x33d   :  { %4466 = vmatpush3.msra.mxu1 %v389_v2 }
 0x3bf   :  { %v326_v37 = vpop.xlane.xlu1 %325 }
 0x3c0   :  { %v334_v38 = vmul.f32 0.03125, %v326_v37 }
 0x3c1   :  { %v323_v39 = vpop.xlane.xlu0 %322 }
 0x3c2   :  { %v338_v40 = vsub.f32 %v5285_v21, %v334_v38  ;;  %v333_v41 = vmul.f32 0.03125, %v323_v39 }
 0x3c3   :  { %v332_v42 = vpop.xlane.xlu1 %331 }
 0x3c4   :  { %v337_v43 = vsub.f32 %v5292_v27, %v333_v41  ;;  %v336_v44 = vmul.f32 0.03125, %v332_v42  ;;  %v342_v45 = vmul.f32 %v338_v40, %v338_v40 }
 0x3c5   :  { %v329_v46 = vpop.xlane.xlu0 %328 }
 0x3c6   :  { %v340_v47 = vsub.f32 %v5299_v32, %v336_v44  ;;  %v335_v49 = vmul.f32 0.03125, %v329_v46  ;;  %v348_v53 = vsel %vm238_vm1, %v342_v45, 0.0  ;;  %v341_v54 = vmul.f32 %v337_v43, %v337_v43 }
 0x3c7   :  { %349 = vadd.xlane.f32.xlu1 %v348_v53 }
 0x3c8   :  { %v339_v55 = vsub.f32 %v5303_v35, %v335_v49  ;;  %v345_v56 = vsel %vm238_vm1, %v341_v54, 0.0  ;;  %v344_v59 = vmul.f32 %v340_v47, %v340_v47  ;;  %v5376_v54 = vld [vmem:[%s6228_s3] sm:$0xff] }
 0x3c9   :  { %346 = vadd.xlane.f32.xlu0 %v345_v56 }
 0x3ca   :  { %v354_v60 = vsel %vm238_vm1, %v344_v59, 0.0  ;;  %v343_v61 = vmul.f32 %v339_v55, %v339_v55 }
 0x3cb   :  { %355 = vadd.xlane.f32.xlu1 %v354_v60  ;;  %v5382_v60 = vld [vmem:[%s6228_s3 + $0x18] sm:$0xff] }
 0x3cc   :  { %v351_v62 = vsel %vm238_vm1, %v343_v61, 0.0 }
 0x3cd   :  { %352 = vadd.xlane.f32.xlu0 %v351_v62 }
 0x450   :  { %v350_v3 = vpop.xlane.xlu1 %349 }
 0x451   :  { %v358_v4 = vmul.f32 0.03125, %v350_v3 }
 0x452   :  { %v347_v5 = vpop.xlane.xlu0 %346 }
 0x453   :  { %v362_v6 = vadd.f32 1e-05, %v358_v4  ;;  %v357_v8 = vmul.f32 0.03125, %v347_v5  ;;  %v5391_v4 = vld [vmem:[%s6228_s3 + $0x10] sm:$0xff] }
 0x454   :  { %v356_v9 = vpop.xlane.xlu1 %355 }
 0x455   :  { %4858 = vrsqrt.f32 %v362_v6  ;;  %v361_v10 = vadd.f32 1e-05, %v357_v8  ;;  %v360_v11 = vmul.f32 0.03125, %v356_v9 }
 0x456   :  { %v353_v51 = vpop.xlane.xlu0 %352 }
 0x457   :  { %4860 = vrsqrt.f32 %v361_v10  ;;  %v364_v12 = vadd.f32 1e-05, %v360_v11  ;;  %v359_v13 = vmul.f32 0.03125, %v353_v51 }
 0x459   :  { %4862 = vrsqrt.f32 %v364_v12  ;;  %v363_v14 = vadd.f32 1e-05, %v359_v13 }
 0x45b   :  { %4864 = vrsqrt.f32 %v363_v14 }
 0x462   :  { %v4859_v16 = vpop.eup %4858 }
 0x463   :  { %v370_v18 = vmul.f32 %v4859_v16, %v338_v40 }
 0x464   :  { %v4861_v19 = vpop.eup %4860 }
 0x465   :  { %v369_v20 = vmul.f32 %v4861_v19, %v337_v43  ;;  %v378_v24 = vmul.f32 %v376_v17, %v370_v18 }
 0x466   :  { %v4863_v22 = vpop.eup %4862 }
 0x467   :  { %v377_v25 = vmul.f32 %v376_v17, %v369_v20  ;;  %v372_v26 = vmul.f32 %v4863_v22, %v340_v47  ;;  %v386_v31 = vadd.f32 %v384_v23, %v378_v24  ;;  %v5371_v47 = vld [vmem:[%s6228_s3 + $0x8] sm:$0xff] }
 0x468   :  { %v4865_v28 = vpop.eup %4864 }
 0x469   :  { %v385_v29 = vadd.f32 %v384_v23, %v377_v25  ;;  %v371_v30 = vmul.f32 %v4865_v28, %v339_v55  ;;  %v380_v33 = vmul.f32 %v376_v17, %v372_v26 }
 0x46b   :  { %4467 = vmatprep.mubr.msk.f32.mxu1 %vm238_vm1, %v385_v29  ;;  %v379_v34 = vmul.f32 %v376_v17, %v371_v30  ;;  %v388_v37 = vadd.f32 %v384_v23, %v380_v33 }
 0x46c   :  { %4468 = vmatmul.mubr.msk.f32.vlgmr.msra.gmra.mxu1 %vm238_vm1, %v386_v31 }
 0x46d   :  { %v387_v36 = vadd.f32 %v384_v23, %v379_v34 }
 0x46f   :  { %4470 = vmatprep.mubr.msk.f32.mxu1 %vm238_vm1, %v387_v36 }
 0x470   :  { %4471 = vmatmul.mubr.msk.f32.gmra.mxu1 %vm238_vm1, %v388_v37 }
 0x52c   :  { %v5336_v38 = vpop.f32.mrf.mxu1 }
 0x52e   :  { %v5338_v39 = vpop.f32.mrf.mxu1 }
 0x52f   :  { %4481 = vmatprep.mubr.msk.f32.mxu1 %vm502_vm2, %v5338_v39 }
 0x530   :  { %v5342_v40 = vpop.f32.mrf.mxu1 }
 0x531   :  { %500 = vrot.lane.b32.xlu0 %v5342_v40, %s5079_s16 }
 0x532   :  { %v5346_v41 = vpop.f32.mrf.mxu1 }
 0x533   :  { %498 = vrot.lane.b32.xlu1 %v5346_v41, %s5079_s16 }
 0x537   :  { %496 = vrot.lane.b32.xlu1 %v5336_v38, %s5079_s16 }
 0x53b   :  { %494 = vrot.lane.b32.xlu1 %v5338_v39, %s5079_s16 }
 0x5a3   :  { %v501_v42 = vpop.permute.xlu0 %500 }
 0x5a4   :  { %4473 = vmatprep.subr.msk.mxu1 %vm502_vm2, %v501_v42 }
 0x5a5   :  { %4474 = vmatpush3.xpose.msk.msra.mxu1 %vm502_vm2, %v501_v42  ;;  %v499_v43 = vpop.permute.xlu1 %498 }
 0x5a6   :  { %4475 = vmatprep.subr.msk.mxu1 %vm502_vm2, %v499_v43 }
 0x5a9   :  { %4476 = vmatpush3.xpose.msk.msra.mxu1 %vm502_vm2, %v499_v43  ;;  %v497_v44 = vpop.permute.xlu1 %496 }
 0x5aa   :  { %4477 = vmatprep.subr.msk.mxu1 %vm502_vm2, %v497_v44 }
 0x5ad   :  { %4478 = vmatpush3.xpose.msk.msra.mxu1 %vm502_vm2, %v497_v44  ;;  %v495_v45 = vpop.permute.xlu1 %494 }
 0x5ae   :  { %4479 = vmatprep.subr.msk.mxu1 %vm502_vm2, %v495_v45 }
 0x5b1   :  { %4480 = vmatpush3.xpose.msk.msra.mxu1 %vm502_vm2, %v495_v45 }
 0x5b4   :  { %4482 = vmatmul.mubr.msk.f32.vlgmr.msra.gmra.mxu1 %vm502_vm2, %v5336_v38 }
 0x5b5   :  { %4484 = vmatprep.mubr.msk.f32.mxu1 %vm502_vm2, %v5346_v41 }
 0x5b8   :  { %4485 = vmatmul.mubr.msk.f32.gmra.mxu1 %vm502_vm2, %v5342_v40 }
 0x674   :  { %v4483_v46 = vpop.f32.mrf.mxu1 }
 0x675   :  { %v605_v49 = vmul.f32 0.35355338, %v4483_v46 }
 0x676   :  { %v585_v53 = vpop.f32.mrf.mxu1 }
 0x677   :  { %v604_v55 = vmul.f32 0.35355338, %v585_v53  ;;  %v609_v56 = vadd.f32 %v605_v49, %v5371_v47 }
 0x678   :  { %v4486_v59 = vpop.f32.mrf.mxu1 }
 0x679   :  { %v607_v61 = vmul.f32 0.35355338, %v4486_v59  ;;  %v615_v62 = vsel %vm238_vm1, %v609_v56, -inf  ;;  %v608_v63 = vadd.f32 %v604_v55, %v5376_v54 }
 0x67a   :  { %616 = vmax.xlane.f32.xlu1 %v615_v62  ;;  %v595_v0 = vpop.f32.mrf.mxu1 }
 0x67b   :  { %v606_v1 = vmul.f32 0.35355338, %v595_v0  ;;  %v612_v2 = vsel %vm238_vm1, %v608_v63, -inf  ;;  %v611_v3 = vadd.f32 %v607_v61, %v5382_v60 }
 0x67c   :  { %613 = vmax.xlane.f32.xlu0 %v612_v2 }
 0x67d   :  { %v621_v5 = vsel %vm238_vm1, %v611_v3, -inf  ;;  %v610_v6 = vadd.f32 %v606_v1, %v5391_v4 }
 0x67f   :  { %v618_v8 = vsel %vm238_vm1, %v610_v6, -inf }
 0x680   :  { %622 = vmax.xlane.f32.xlu0 %v621_v5 }
 0x684   :  { %619 = vmax.xlane.f32.xlu0 %v618_v8 }
 0x68b   :  { %660 = vrot.lane.b32.xlu1 %v5346_v41, %s5080_s25 }
 0x68f   :  { %658 = vrot.lane.b32.xlu1 %v5336_v38, %s5080_s25 }
 0x693   :  { %656 = vrot.lane.b32.xlu1 %v5338_v39, %s5080_s25 }
 0x69a   :  { %662 = vrot.lane.b32.xlu0 %v5342_v40, %s5080_s25 }
 0x703   :  { %v617_v9 = vpop.xlane.xlu1 %616 }
 0x704   :  { %v625_v10 = vsub.f32 %v609_v56, %v617_v9 }
 0x705   :  { %v614_v11 = vpop.xlane.xlu0 %613 }
 0x706   :  { %v630_v51 = vmul.f32 1.442695, %v625_v10  ;;  %v624_v12 = vsub.f32 %v608_v63, %v614_v11 }
 0x707   :  { %v661_v15 = vpop.permute.xlu1 %660 }
 0x708   :  { %4866 = vpow2.f32 %v630_v51  ;;  %v628_v13 = vmul.f32 1.442695, %v624_v12 }
 0x709   :  { %v623_v14 = vpop.xlane.xlu0 %622 }
 0x70a   :  { %4868 = vpow2.f32 %v628_v13  ;;  %v627_v25 = vsub.f32 %v611_v3, %v623_v14 }
 0x70b   :  { %v659_v17 = vpop.permute.xlu1 %658 }
 0x70c   :  { %v634_v28 = vmul.f32 1.442695, %v627_v25 }
 0x70d   :  { %v620_v16 = vpop.xlane.xlu0 %619 }
 0x70e   :  { %v626_v26 = vsub.f32 %v610_v6, %v620_v16  ;;  %4870 = vpow2.f32 %v634_v28 }
 0x70f   :  { %v657_v23 = vpop.permute.xlu1 %656 }
 0x710   :  { %v632_v29 = vmul.f32 1.442695, %v626_v26 }
 0x711   :  { %v663_v18 = vpop.permute.xlu0 %662 }
 0x712   :  { %4487 = vmatprep.subr.mxu0 %v663_v18  ;;  %4872 = vpow2.f32 %v632_v29 }
 0x713   :  { %4488 = vmatpush3.msra.mxu0 %v663_v18 }
 0x714   :  { %4489 = vmatprep.subr.mxu0 %v661_v15 }
 0x715   :  { %v4867_v19 = vpop.eup %4866  ;;  %4490 = vmatpush3.msra.mxu0 %v661_v15 }
 0x716   :  { %4491 = vmatprep.subr.mxu0 %v659_v17  ;;  %v639_v20 = vsel %vm238_vm1, %v4867_v19, 0.0 }
 0x717   :  { %v4869_v22 = vpop.eup %4868  ;;  %640 = vadd.xlane.f32.xlu1 %v639_v20  ;;  %4492 = vmatpush3.msra.mxu0 %v659_v17 }
 0x718   :  { %4493 = vmatprep.subr.mxu0 %v657_v23  ;;  %v636_v24 = vsel %vm238_vm1, %v4869_v22, 0.0 }
 0x719   :  { %637 = vadd.xlane.f32.xlu0 %v636_v24  ;;  %4494 = vmatpush3.msra.mxu0 %v657_v23 }
 0x71b   :  { %v4871_v30 = vpop.eup %4870 }
 0x71c   :  { %v645_v33 = vsel %vm238_vm1, %v4871_v30, 0.0 }
 0x71f   :  { %v4873_v31 = vpop.eup %4872 }
 0x720   :  { %v642_v34 = vsel %vm238_vm1, %v4873_v31, 0.0 }
 0x728   :  { %777 = vrot.lane.b32.xlu1 %v5346_v41, %s5081_s2 }
 0x72f   :  { %779 = vrot.lane.b32.xlu0 %v5342_v40, %s5081_s2 }
 0x74c   :  { %646 = vadd.xlane.f32.xlu1 %v645_v33 }
 0x74e   :  { %643 = vadd.xlane.f32.xlu0 %v642_v34 }
 0x75d   :  { %773 = vrot.lane.b32.xlu1 %v5338_v39, %s5081_s2 }
 0x761   :  { %767 = vrot.lane.b32.xlu1 %v5336_v38, %s5082_s26 }
 0x764   :  { %775 = vrot.lane.b32.xlu0 %v5336_v38, %s5081_s2 }
 0x765   :  { %771 = vrot.lane.b32.xlu1 %v5342_v40, %s5082_s26 }
 0x768   :  { %765 = vrot.lane.b32.xlu0 %v5338_v39, %s5082_s26 }
 0x76c   :  { %769 = vrot.lane.b32.xlu0 %v5346_v41, %s5082_s26 }
 0x7a0   :  { %v641_v36 = vpop.xlane.xlu1 %640 }
 0x7a1   :  { %4874 = vrcp.f32 %v641_v36 }
 0x7a2   :  { %v638_v37 = vpop.xlane.xlu0 %637 }
 0x7a3   :  { %4876 = vrcp.f32 %v638_v37 }
 0x7a4   :  { %v778_v49 = vpop.permute.xlu1 %777 }
 0x7a6   :  { %v780_v42 = vpop.permute.xlu0 %779 }
 0x7a7   :  { %4501 = vmatprep.subr.msk.mxu0 %vm502_vm2, %v780_v42 }
 0x7ae   :  { %v4875_v43 = vpop.eup %4874 }
 0x7af   :  { %v651_v46 = vmul.f32 %v4875_v43, %v4867_v19 }
 0x7b0   :  { %v4877_v44 = vpop.eup %4876 }
 0x7b1   :  { %v649_v45 = vmul.f32 %v4877_v44, %v4869_v22 }
 0x7b3   :  { %4495 = vmatprep.mubr.msk.f32.mxu0 %vm238_vm1, %v649_v45 }
 0x7b4   :  { %4496 = vmatmul.mubr.msk.f32.vlgmr.msra.gmra.mxu0 %vm238_vm1, %v651_v46 }
 0x7b5   :  { %4502 = vmatpush3.xpose.msk.msra.mxu0 %vm502_vm2, %v780_v42 }
 0x7b6   :  { %4503 = vmatprep.subr.msk.mxu0 %vm502_vm2, %v778_v49 }
 0x7b9   :  { %4504 = vmatpush3.xpose.msk.msra.mxu0 %vm502_vm2, %v778_v49 }
 0x7d5   :  { %v647_v53 = vpop.xlane.xlu1 %646 }
 0x7d6   :  { %4878 = vrcp.f32 %v647_v53 }
 0x7d7   :  { %v644_v55 = vpop.xlane.xlu0 %643 }
 0x7d8   :  { %4880 = vrcp.f32 %v644_v55 }
 0x7d9   :  { %v774_v59 = vpop.permute.xlu1 %773 }
 0x7db   :  { %v776_v56 = vpop.permute.xlu0 %775 }
 0x7dc   :  { %4505 = vmatprep.subr.msk.mxu0 %vm502_vm2, %v776_v56 }
 0x7dd   :  { %4506 = vmatpush3.xpose.msk.msra.mxu0 %vm502_vm2, %v776_v56  ;;  %v768_v2 = vpop.permute.xlu1 %767 }
 0x7de   :  { %4507 = vmatprep.subr.msk.mxu0 %vm502_vm2, %v774_v59 }
 0x7df   :  { %v766_v0 = vpop.permute.xlu0 %765 }
 0x7e1   :  { %4508 = vmatpush3.xpose.msk.msra.mxu0 %vm502_vm2, %v774_v59  ;;  %v772_v5 = vpop.permute.xlu1 %771 }
 0x7e3   :  { %v4879_v61 = vpop.eup %4878  ;;  %v770_v3 = vpop.permute.xlu0 %769 }
 0x7e4   :  { %v655_v1 = vmul.f32 %v4879_v61, %v4871_v30 }
 0x7e5   :  { %v4881_v62 = vpop.eup %4880 }
 0x7e6   :  { %v653_v63 = vmul.f32 %v4881_v62, %v4873_v31 }
 0x7e8   :  { %4498 = vmatprep.mubr.msk.f32.mxu0 %vm238_vm1, %v653_v63 }
 0x7e9   :  { %4499 = vmatmul.mubr.msk.f32.gmra.mxu0 %vm238_vm1, %v655_v1 }
 0x7ea   :  { %4509 = vmatprep.mubr.msk.f32.mxu0 %vm502_vm2, %v766_v0 }
 0x7ed   :  { %4510 = vmatmul.mubr.msk.f32.vlgmr.msra.gmra.mxu0 %vm502_vm2, %v768_v2 }
 0x7ee   :  { %4512 = vmatprep.mubr.msk.f32.mxu0 %vm502_vm2, %v770_v3 }
 0x7f1   :  { %4513 = vmatmul.mubr.msk.f32.gmra.mxu0 %vm502_vm2, %v772_v5 }
 0x874   :  { %v5440_v6 = vpop.f32.mrf.mxu0 }
 0x876   :  { %v5442_v8 = vpop.f32.mrf.mxu0 }
 0x8a9   :  { %v5444_v9 = vpop.f32.mrf.mxu0 }
 0x8ab   :  { %v5446_v10 = vpop.f32.mrf.mxu0 }
 0x8ad   :  { %v4511_v11 = vpop.f32.mrf.mxu0 }
 0x8ae   :  { %v883_v51 = vmul.f32 0.35355338, %v4511_v11 }
 0x8af   :  { %v863_v12 = vpop.f32.mrf.mxu0 }
 0x8b0   :  { %v882_v13 = vmul.f32 0.35355338, %v863_v12  ;;  %v887_v14 = vadd.f32 %v883_v51, %v5371_v47 }
 0x8b1   :  { %v4514_v15 = vpop.f32.mrf.mxu0 }
 0x8b2   :  { %v885_v16 = vmul.f32 0.35355338, %v4514_v15  ;;  %v893_v17 = vsel %vm238_vm1, %v887_v14, -inf  ;;  %v886_v18 = vadd.f32 %v882_v13, %v5376_v54 }
 0x8b3   :  { %894 = vmax.xlane.f32.xlu1 %v893_v17  ;;  %v873_v19 = vpop.f32.mrf.mxu0 }
 0x8b4   :  { %v884_v20 = vmul.f32 0.35355338, %v873_v19  ;;  %v890_v22 = vsel %vm238_vm1, %v886_v18, -inf  ;;  %v889_v23 = vadd.f32 %v885_v16, %v5382_v60 }
 0x8b5   :  { %891 = vmax.xlane.f32.xlu0 %v890_v22 }
 0x8b6   :  { %v899_v24 = vsel %vm238_vm1, %v889_v23, -inf  ;;  %v888_v25 = vadd.f32 %v884_v20, %v5391_v4 }
 0x8b8   :  { %v896_v26 = vsel %vm238_vm1, %v888_v25, -inf }
 0x8b9   :  { %900 = vmax.xlane.f32.xlu0 %v899_v24 }
 0x8bd   :  { %897 = vmax.xlane.f32.xlu0 %v896_v26 }
 0x8c4   :  { %938 = vrot.lane.b32.xlu1 %v5346_v41, %s5083_s5 }
 0x8c8   :  { %936 = vrot.lane.b32.xlu1 %v5336_v38, %s5083_s5 }
 0x8cc   :  { %934 = vrot.lane.b32.xlu1 %v5338_v39, %s5083_s5 }
 0x8d3   :  { %940 = vrot.lane.b32.xlu0 %v5342_v40, %s5083_s5 }
 0x93c   :  { %v895_v28 = vpop.xlane.xlu1 %894 }
 0x93d   :  { %v903_v29 = vsub.f32 %v887_v14, %v895_v28 }
 0x93e   :  { %v892_v30 = vpop.xlane.xlu0 %891 }
 0x93f   :  { %v908_v31 = vmul.f32 1.442695, %v903_v29  ;;  %v902_v33 = vsub.f32 %v886_v18, %v892_v30 }
 0x940   :  { %v939_v37 = vpop.permute.xlu1 %938 }
 0x941   :  { %4882 = vpow2.f32 %v908_v31  ;;  %v906_v34 = vmul.f32 1.442695, %v902_v33 }
 0x942   :  { %v901_v36 = vpop.xlane.xlu0 %900 }
 0x943   :  { %4884 = vpow2.f32 %v906_v34  ;;  %v905_v56 = vsub.f32 %v889_v23, %v901_v36 }
 0x944   :  { %v937_v43 = vpop.permute.xlu1 %936 }
 0x945   :  { %v912_v61 = vmul.f32 1.442695, %v905_v56 }
 0x946   :  { %v898_v42 = vpop.xlane.xlu0 %897 }
 0x947   :  { %v904_v59 = vsub.f32 %v888_v25, %v898_v42  ;;  %4886 = vpow2.f32 %v912_v61 }
 0x948   :  { %v935_v53 = vpop.permute.xlu1 %934 }
 0x949   :  { %v910_v62 = vmul.f32 1.442695, %v904_v59 }
 0x94a   :  { %v941_v44 = vpop.permute.xlu0 %940 }
 0x94b   :  { %4515 = vmatprep.subr.mxu1 %v941_v44  ;;  %4888 = vpow2.f32 %v910_v62 }
 0x94c   :  { %4516 = vmatpush3.msra.mxu1 %v941_v44 }
 0x94d   :  { %4517 = vmatprep.subr.mxu1 %v939_v37 }
 0x94e   :  { %v4883_v45 = vpop.eup %4882  ;;  %4518 = vmatpush3.msra.mxu1 %v939_v37 }
 0x94f   :  { %4519 = vmatprep.subr.mxu1 %v937_v43  ;;  %v917_v46 = vsel %vm238_vm1, %v4883_v45, 0.0 }
 0x950   :  { %v4885_v49 = vpop.eup %4884  ;;  %918 = vadd.xlane.f32.xlu1 %v917_v46  ;;  %4520 = vmatpush3.msra.mxu1 %v937_v43 }
 0x951   :  { %4521 = vmatprep.subr.mxu1 %v935_v53  ;;  %v914_v55 = vsel %vm238_vm1, %v4885_v49, 0.0 }
 0x952   :  { %915 = vadd.xlane.f32.xlu0 %v914_v55  ;;  %4522 = vmatpush3.msra.mxu1 %v935_v53 }
 0x954   :  { %v4887_v63 = vpop.eup %4886 }
 0x955   :  { %v923_v1 = vsel %vm238_vm1, %v4887_v63, 0.0 }
 0x958   :  { %v4889_v0 = vpop.eup %4888 }
 0x959   :  { %v920_v2 = vsel %vm238_vm1, %v4889_v0, 0.0 }
 0x961   :  { %1055 = vrot.lane.b32.xlu1 %v5346_v41, %s5084_s27 }
 0x968   :  { %1057 = vrot.lane.b32.xlu0 %v5342_v40, %s5084_s27 }
 0x985   :  { %924 = vadd.xlane.f32.xlu1 %v923_v1 }
 0x987   :  { %921 = vadd.xlane.f32.xlu0 %v920_v2 }
 0x996   :  { %1051 = vrot.lane.b32.xlu1 %v5338_v39, %s5084_s27 }
 0x99a   :  { %1045 = vrot.lane.b32.xlu1 %v5336_v38, %s5085_s28 }
 0x99d   :  { %1053 = vrot.lane.b32.xlu0 %v5336_v38, %s5084_s27 }
 0x99e   :  { %1049 = vrot.lane.b32.xlu1 %v5342_v40, %s5085_s28 }
 0x9a1   :  { %1043 = vrot.lane.b32.xlu0 %v5338_v39, %s5085_s28 }
 0x9a5   :  { %1047 = vrot.lane.b32.xlu0 %v5346_v41, %s5085_s28 }
 0x9d9   :  { %v919_v3 = vpop.xlane.xlu1 %918 }
 0x9da   :  { %4890 = vrcp.f32 %v919_v3 }
 0x9db   :  { %v916_v5 = vpop.xlane.xlu0 %915 }
 0x9dc   :  { %4892 = vrcp.f32 %v916_v5 }
 0x9dd   :  { %v1056_v15 = vpop.permute.xlu1 %1055 }
 0x9df   :  { %v1058_v11 = vpop.permute.xlu0 %1057 }
 0x9e0   :  { %4529 = vmatprep.subr.msk.mxu1 %vm502_vm2, %v1058_v11 }
 0x9e7   :  { %v4891_v51 = vpop.eup %4890 }
 0x9e8   :  { %v929_v14 = vmul.f32 %v4891_v51, %v4883_v45 }
 0x9e9   :  { %v4893_v12 = vpop.eup %4892 }
 0x9ea   :  { %v927_v13 = vmul.f32 %v4893_v12, %v4885_v49 }
 0x9ec   :  { %4523 = vmatprep.mubr.msk.f32.mxu1 %vm238_vm1, %v927_v13 }
 0x9ed   :  { %4524 = vmatmul.mubr.msk.f32.vlgmr.msra.gmra.mxu1 %vm238_vm1, %v929_v14 }
 0x9ee   :  { %4530 = vmatpush3.xpose.msk.msra.mxu1 %vm502_vm2, %v1058_v11 }
 0x9ef   :  { %4531 = vmatprep.subr.msk.mxu1 %vm502_vm2, %v1056_v15 }
 0x9f2   :  { %4532 = vmatpush3.xpose.msk.msra.mxu1 %vm502_vm2, %v1056_v15 }
 0xa0e   :  { %v925_v16 = vpop.xlane.xlu1 %924 }
 0xa0f   :  { %4894 = vrcp.f32 %v925_v16 }
 0xa10   :  { %v922_v17 = vpop.xlane.xlu0 %921 }
 0xa11   :  { %4896 = vrcp.f32 %v922_v17 }
 0xa12   :  { %v1052_v19 = vpop.permute.xlu1 %1051 }
 0xa14   :  { %v1054_v18 = vpop.permute.xlu0 %1053 }
 0xa15   :  { %4533 = vmatprep.subr.msk.mxu1 %vm502_vm2, %v1054_v18 }
 0xa16   :  { %4534 = vmatpush3.xpose.msk.msra.mxu1 %vm502_vm2, %v1054_v18  ;;  %v1046_v26 = vpop.permute.xlu1 %1045 }
 0xa17   :  { %4535 = vmatprep.subr.msk.mxu1 %vm502_vm2, %v1052_v19 }
 0xa18   :  { %v1044_v24 = vpop.permute.xlu0 %1043 }
 0xa1a   :  { %4536 = vmatpush3.xpose.msk.msra.mxu1 %vm502_vm2, %v1052_v19  ;;  %v1050_v29 = vpop.permute.xlu1 %1049 }
 0xa1c   :  { %v4895_v20 = vpop.eup %4894  ;;  %v1048_v28 = vpop.permute.xlu0 %1047 }
 0xa1d   :  { %v933_v25 = vmul.f32 %v4895_v20, %v4887_v63 }
 0xa1e   :  { %v4897_v22 = vpop.eup %4896 }
 0xa1f   :  { %v931_v23 = vmul.f32 %v4897_v22, %v4889_v0 }
 0xa21   :  { %4526 = vmatprep.mubr.msk.f32.mxu1 %vm238_vm1, %v931_v23 }
 0xa22   :  { %4527 = vmatmul.mubr.msk.f32.gmra.mxu1 %vm238_vm1, %v933_v25 }
 0xa23   :  { %4537 = vmatprep.mubr.msk.f32.mxu1 %vm502_vm2, %v1044_v24 }
 0xa26   :  { %4538 = vmatmul.mubr.msk.f32.vlgmr.msra.gmra.mxu1 %vm502_vm2, %v1046_v26 }
 0xa27   :  { %4540 = vmatprep.mubr.msk.f32.mxu1 %vm502_vm2, %v1048_v28 }
 0xa2a   :  { %4541 = vmatmul.mubr.msk.f32.gmra.mxu1 %vm502_vm2, %v1050_v29 }
 0xaad   :  { %v5500_v30 = vpop.f32.mrf.mxu1 }
 0xaaf   :  { %v5502_v31 = vpop.f32.mrf.mxu1 }
 0xae2   :  { %v5504_v33 = vpop.f32.mrf.mxu1 }
 0xae4   :  { %v5506_v34 = vpop.f32.mrf.mxu1 }
 0xae6   :  { %v4539_v36 = vpop.f32.mrf.mxu1 }
 0xae7   :  { %v1161_v37 = vmul.f32 0.35355338, %v4539_v36 }
 0xae8   :  { %v1141_v42 = vpop.f32.mrf.mxu1 }
 0xae9   :  { %v1160_v43 = vmul.f32 0.35355338, %v1141_v42  ;;  %v1165_v44 = vadd.f32 %v1161_v37, %v5371_v47 }
 0xaea   :  { %v4542_v45 = vpop.f32.mrf.mxu1 }
 0xaeb   :  { %v1163_v46 = vmul.f32 0.35355338, %v4542_v45  ;;  %v1171_v49 = vsel %vm238_vm1, %v1165_v44, -inf  ;;  %v1164_v53 = vadd.f32 %v1160_v43, %v5376_v54 }
 0xaec   :  { %1172 = vmax.xlane.f32.xlu1 %v1171_v49  ;;  %v1151_v55 = vpop.f32.mrf.mxu1 }
 0xaed   :  { %v1162_v56 = vmul.f32 0.35355338, %v1151_v55  ;;  %v1168_v59 = vsel %vm238_vm1, %v1164_v53, -inf  ;;  %v1167_v61 = vadd.f32 %v1163_v46, %v5382_v60 }
 0xaee   :  { %1169 = vmax.xlane.f32.xlu0 %v1168_v59 }
 0xaef   :  { %v1177_v62 = vsel %vm238_vm1, %v1167_v61, -inf  ;;  %v1166_v63 = vadd.f32 %v1162_v56, %v5391_v4 }
 0xaf1   :  { %v1174_v0 = vsel %vm238_vm1, %v1166_v63, -inf }
 0xaf2   :  { %1178 = vmax.xlane.f32.xlu0 %v1177_v62 }
 0xaf6   :  { %1175 = vmax.xlane.f32.xlu0 %v1174_v0 }
 0xafd   :  { %1216 = vrot.lane.b32.xlu1 %v5346_v41, %s5086_s29 }
 0xb01   :  { %1214 = vrot.lane.b32.xlu1 %v5336_v38, %s5086_s29 }
 0xb05   :  { %1212 = vrot.lane.b32.xlu1 %v5338_v39, %s5086_s29 }
 0xb0c   :  { %1218 = vrot.lane.b32.xlu0 %v5342_v40, %s5086_s29 }
 0xb75   :  { %v1173_v1 = vpop.xlane.xlu1 %1172 }
 0xb76   :  { %v1181_v2 = vsub.f32 %v1165_v44, %v1173_v1 }
 0xb77   :  { %v1170_v3 = vpop.xlane.xlu0 %1169 }
 0xb78   :  { %v1186_v5 = vmul.f32 1.442695, %v1181_v2  ;;  %v1180_v11 = vsub.f32 %v1164_v53, %v1170_v3 }
 0xb79   :  { %v1217_v13 = vpop.permute.xlu1 %1216 }
 0xb7a   :  { %4898 = vpow2.f32 %v1186_v5  ;;  %v1184_v51 = vmul.f32 1.442695, %v1180_v11 }
 0xb7b   :  { %v1179_v12 = vpop.xlane.xlu0 %1178 }
 0xb7c   :  { %4900 = vpow2.f32 %v1184_v51  ;;  %v1183_v23 = vsub.f32 %v1167_v61, %v1179_v12 }
 0xb7d   :  { %v1215_v15 = vpop.permute.xlu1 %1214 }
 0xb7e   :  { %v1190_v25 = vmul.f32 1.442695, %v1183_v23 }
 0xb7f   :  { %v1176_v14 = vpop.xlane.xlu0 %1175 }
 0xb80   :  { %v1182_v24 = vsub.f32 %v1166_v63, %v1176_v14  ;;  %4902 = vpow2.f32 %v1190_v25 }
 0xb81   :  { %v1213_v20 = vpop.permute.xlu1 %1212 }
 0xb82   :  { %v1188_v26 = vmul.f32 1.442695, %v1182_v24 }
 0xb83   :  { %v1219_v16 = vpop.permute.xlu0 %1218 }
 0xb84   :  { %4543 = vmatprep.subr.mxu0 %v1219_v16  ;;  %4904 = vpow2.f32 %v1188_v26 }
 0xb85   :  { %4544 = vmatpush3.msra.mxu0 %v1219_v16 }
 0xb86   :  { %4545 = vmatprep.subr.mxu0 %v1217_v13 }
 0xb87   :  { %v4899_v17 = vpop.eup %4898  ;;  %4546 = vmatpush3.msra.mxu0 %v1217_v13 }
 0xb88   :  { %4547 = vmatprep.subr.mxu0 %v1215_v15  ;;  %v1195_v18 = vsel %vm238_vm1, %v4899_v17, 0.0 }
 0xb89   :  { %v4901_v19 = vpop.eup %4900  ;;  %1196 = vadd.xlane.f32.xlu1 %v1195_v18  ;;  %4548 = vmatpush3.msra.mxu0 %v1215_v15 }
 0xb8a   :  { %4549 = vmatprep.subr.mxu0 %v1213_v20  ;;  %v1192_v22 = vsel %vm238_vm1, %v4901_v19, 0.0 }
 0xb8b   :  { %1193 = vadd.xlane.f32.xlu0 %v1192_v22  ;;  %4550 = vmatpush3.msra.mxu0 %v1213_v20 }
 0xb8d   :  { %v4903_v28 = vpop.eup %4902 }
 0xb8e   :  { %v1201_v36 = vsel %vm238_vm1, %v4903_v28, 0.0 }
 0xb91   :  { %v4905_v29 = vpop.eup %4904 }
 0xb92   :  { %v1198_v37 = vsel %vm238_vm1, %v4905_v29, 0.0 }
 0xb9a   :  { %1333 = vrot.lane.b32.xlu1 %v5346_v41, %s5087_s30 }
 0xba1   :  { %1335 = vrot.lane.b32.xlu0 %v5342_v40, %s5087_s30 }
 0xbbe   :  { %1202 = vadd.xlane.f32.xlu1 %v1201_v36 }
 0xbc0   :  { %1199 = vadd.xlane.f32.xlu0 %v1198_v37 }
 0xbcf   :  { %1329 = vrot.lane.b32.xlu1 %v5338_v39, %s5087_s30 }
 0xbd3   :  { %1323 = vrot.lane.b32.xlu1 %v5336_v38, %s5088_s13 }
 0xbd6   :  { %1331 = vrot.lane.b32.xlu0 %v5336_v38, %s5087_s30 }
 0xbd7   :  { %1327 = vrot.lane.b32.xlu1 %v5342_v40, %s5088_s13 }
 0xbda   :  { %1321 = vrot.lane.b32.xlu0 %v5338_v39, %s5088_s13 }
 0xbde   :  { %1325 = vrot.lane.b32.xlu0 %v5346_v41, %s5088_s13 }
 0xc12   :  { %v1197_v42 = vpop.xlane.xlu1 %1196 }
 0xc13   :  { %4906 = vrcp.f32 %v1197_v42 }
 0xc14   :  { %v1194_v43 = vpop.xlane.xlu0 %1193 }
 0xc15   :  { %4908 = vrcp.f32 %v1194_v43 }
 0xc16   :  { %v1334_v55 = vpop.permute.xlu1 %1333 }
 0xc18   :  { %v1336_v44 = vpop.permute.xlu0 %1335 }
 0xc19   :  { %4557 = vmatprep.subr.msk.mxu0 %vm502_vm2, %v1336_v44 }
 0xc20   :  { %v4907_v45 = vpop.eup %4906 }
 0xc21   :  { %v1207_v53 = vmul.f32 %v4907_v45, %v4899_v17 }
 0xc22   :  { %v4909_v46 = vpop.eup %4908 }
 0xc23   :  { %v1205_v49 = vmul.f32 %v4909_v46, %v4901_v19 }
 0xc25   :  { %4551 = vmatprep.mubr.msk.f32.mxu0 %vm238_vm1, %v1205_v49 }
 0xc26   :  { %4552 = vmatmul.mubr.msk.f32.vlgmr.msra.gmra.mxu0 %vm238_vm1, %v1207_v53 }
 0xc27   :  { %4558 = vmatpush3.xpose.msk.msra.mxu0 %vm502_vm2, %v1336_v44 }
 0xc28   :  { %4559 = vmatprep.subr.msk.mxu0 %vm502_vm2, %v1334_v55 }
 0xc2b   :  { %4560 = vmatpush3.xpose.msk.msra.mxu0 %vm502_vm2, %v1334_v55 }
 0xc47   :  { %v1203_v56 = vpop.xlane.xlu1 %1202 }
 0xc48   :  { %4910 = vrcp.f32 %v1203_v56 }
 0xc49   :  { %v1200_v59 = vpop.xlane.xlu0 %1199 }
 0xc4a   :  { %4912 = vrcp.f32 %v1200_v59 }
 0xc4b   :  { %v1330_v62 = vpop.permute.xlu1 %1329 }
 0xc4d   :  { %v1332_v61 = vpop.permute.xlu0 %1331 }
 0xc4e   :  { %4561 = vmatprep.subr.msk.mxu0 %vm502_vm2, %v1332_v61 }
 0xc4f   :  { %4562 = vmatpush3.xpose.msk.msra.mxu0 %vm502_vm2, %v1332_v61  ;;  %v1324_v5 = vpop.permute.xlu1 %1323 }
 0xc50   :  { %4563 = vmatprep.subr.msk.mxu0 %vm502_vm2, %v1330_v62 }
 0xc51   :  { %v1322_v2 = vpop.permute.xlu0 %1321 }
 0xc53   :  { %4564 = vmatpush3.xpose.msk.msra.mxu0 %vm502_vm2, %v1330_v62  ;;  %v1328_v51 = vpop.permute.xlu1 %1327 }
 0xc55   :  { %v4911_v63 = vpop.eup %4910  ;;  %v1326_v11 = vpop.permute.xlu0 %1325 }
 0xc56   :  { %v1211_v3 = vmul.f32 %v4911_v63, %v4903_v28 }
 0xc57   :  { %v4913_v0 = vpop.eup %4912 }
 0xc58   :  { %v1209_v1 = vmul.f32 %v4913_v0, %v4905_v29 }
 0xc5a   :  { %4554 = vmatprep.mubr.msk.f32.mxu0 %vm238_vm1, %v1209_v1 }
 0xc5b   :  { %4555 = vmatmul.mubr.msk.f32.gmra.mxu0 %vm238_vm1, %v1211_v3 }
 0xc5c   :  { %4565 = vmatprep.mubr.msk.f32.mxu0 %vm502_vm2, %v1322_v2 }
 0xc5f   :  { %4566 = vmatmul.mubr.msk.f32.vlgmr.msra.gmra.mxu0 %vm502_vm2, %v1324_v5 }
 0xc60   :  { %4568 = vmatprep.mubr.msk.f32.mxu0 %vm502_vm2, %v1326_v11 }
 0xc63   :  { %4569 = vmatmul.mubr.msk.f32.gmra.mxu0 %vm502_vm2, %v1328_v51 }
 0xce6   :  { %v4553_v12 = vpop.f32.mrf.mxu0 }
 0xce8   :  { %v1302_v13 = vpop.f32.mrf.mxu0 }
 0xd1b   :  { %v5560_v14 = vpop.f32.mrf.mxu0 }
 0xd1d   :  { %v1312_v15 = vpop.f32.mrf.mxu0 }
 0xd1f   :  { %v4567_v16 = vpop.f32.mrf.mxu0 }
 0xd20   :  { %v1439_v17 = vmul.f32 0.35355338, %v4567_v16 }
 0xd21   :  { %v1419_v18 = vpop.f32.mrf.mxu0 }
 0xd22   :  { %v1438_v19 = vmul.f32 0.35355338, %v1419_v18  ;;  %v1443_v20 = vadd.f32 %v1439_v17, %v5371_v47  ;;  %v1664_v18 = vld [vmem:[%s6234_s9 + $0x18] sm:$0xff] }
 0xd23   :  { %v4570_v22 = vpop.f32.mrf.mxu0 }
 0xd24   :  { %v1449_v23 = vsel %vm238_vm1, %v1443_v20, -inf  ;;  %v1442_v24 = vadd.f32 %v1438_v19, %v5376_v54  ;;  %v1441_v26 = vmul.f32 0.35355338, %v4570_v22  ;;  %v1663_v19 = vld [vmem:[%s6234_s9 + $0x10] sm:$0xff]  ;;  %v1661_v22 = vld [vmem:[%s6234_s9] sm:$0xff] }
 0xd25   :  { %1450 = vmax.xlane.f32.xlu1 %v1449_v23  ;;  %v1429_v25 = vpop.f32.mrf.mxu0 }
 0xd26   :  { %v1440_v28 = vmul.f32 0.35355338, %v1429_v25  ;;  %v1446_v29 = vsel %vm238_vm1, %v1442_v24, -inf  ;;  %v1445_v42 = vadd.f32 %v1441_v26, %v5382_v60 }
 0xd27   :  { %1447 = vmax.xlane.f32.xlu0 %v1446_v29 }
 0xd28   :  { %v1444_v36 = vadd.f32 %v1440_v28, %v5391_v4  ;;  %v1455_v47 = vsel %vm238_vm1, %v1445_v42, -inf }
 0xd2a   :  { %v1452_v37 = vsel %vm238_vm1, %v1444_v36, -inf }
 0xd2b   :  { %1453 = vmax.xlane.f32.xlu0 %v1452_v37 }
 0xd2f   :  { %1456 = vmax.xlane.f32.xlu0 %v1455_v47 }
 0xdae   :  { %v1451_v43 = vpop.xlane.xlu1 %1450 }
 0xdaf   :  { %v1459_v44 = vsub.f32 %v1443_v20, %v1451_v43  ;;  %v1662_v20 = vld [vmem:[%s6234_s9 + $0x8] sm:$0xff] }
 0xdb0   :  { %v1448_v54 = vpop.xlane.xlu0 %1447 }
 0xdb1   :  { %v1464_v45 = vmul.f32 1.442695, %v1459_v44  ;;  %v1458_v46 = vsub.f32 %v1442_v24, %v1448_v54 }
 0xdb3   :  { %4914 = vpow2.f32 %v1464_v45  ;;  %v1462_v49 = vmul.f32 1.442695, %v1458_v46 }
 0xdb4   :  { %v1454_v53 = vpop.xlane.xlu0 %1453 }
 0xdb5   :  { %4916 = vpow2.f32 %v1462_v49  ;;  %v1460_v55 = vsub.f32 %v1444_v36, %v1454_v53 }
 0xdb7   :  { %v1466_v56 = vmul.f32 1.442695, %v1460_v55 }
 0xdb8   :  { %v1457_v4 = vpop.xlane.xlu0 %1456 }
 0xdb9   :  { %4918 = vpow2.f32 %v1466_v56  ;;  %v1461_v59 = vsub.f32 %v1445_v42, %v1457_v4 }
 0xdbb   :  { %v1468_v61 = vmul.f32 1.442695, %v1461_v59 }
 0xdbd   :  { %4920 = vpow2.f32 %v1468_v61 }
 0xdc0   :  { %v4915_v60 = vpop.eup %4914 }
 0xdc1   :  { %v1473_v62 = vsel %vm238_vm1, %v4915_v60, 0.0 }
 0xdc2   :  { %v4917_v63 = vpop.eup %4916  ;;  %1474 = vadd.xlane.f32.xlu1 %v1473_v62 }
 0xdc3   :  { %v1470_v0 = vsel %vm238_vm1, %v4917_v63, 0.0 }
 0xdc4   :  { %1471 = vadd.xlane.f32.xlu0 %v1470_v0 }
 0xdc6   :  { %v4919_v1 = vpop.eup %4918 }
 0xdc7   :  { %v1476_v2 = vsel %vm238_vm1, %v4919_v1, 0.0 }
 0xdc8   :  { %1477 = vadd.xlane.f32.xlu0 %v1476_v2 }
 0xdca   :  { %v4921_v3 = vpop.eup %4920 }
 0xdcb   :  { %v1479_v5 = vsel %vm238_vm1, %v4921_v3, 0.0 }
 0xdcc   :  { %1480 = vadd.xlane.f32.xlu1 %v1479_v5 }
 0xddd   :  { %1494 = vrot.lane.b32.xlu1 %v5346_v41, %s5089_s14 }
 0xdde   :  { %1496 = vrot.lane.b32.xlu0 %v5342_v40, %s5089_s14 }
 0xde1   :  { %1492 = vrot.lane.b32.xlu1 %v5336_v38, %s5089_s14 }
 0xde2   :  { %1603 = vrot.lane.b32.xlu0 %v5502_v31, %s5090_s15 }
 0xde5   :  { %1490 = vrot.lane.b32.xlu1 %v5338_v39, %s5089_s14 }
 0xde6   :  { %1619 = vrot.lane.b32.xlu0 %v1302_v13, %s6238_s17 }
 0xde9   :  { %1605 = vrot.lane.b32.xlu1 %v5500_v30, %s5090_s15 }
 0xdea   :  { %1607 = vrot.lane.b32.xlu0 %v5506_v34, %s5090_s15 }
 0xded   :  { %1621 = vrot.lane.b32.xlu1 %v4553_v12, %s6238_s17 }
 0xdee   :  { %1623 = vrot.lane.b32.xlu0 %v1312_v15, %s6238_s17 }
 0xdf1   :  { %1609 = vrot.lane.b32.xlu1 %v5504_v33, %s5090_s15 }
 0xdf5   :  { %1625 = vrot.lane.b32.xlu1 %v5560_v14, %s6238_s17 }
 0xe4b   :  { %v1475_v39 = vpop.xlane.xlu1 %1474 }
 0xe4d   :  { %v1472_v38 = vpop.xlane.xlu0 %1471 }
 0xe4e   :  { %4922 = vrcp.f32 %v1472_v38 }
 0xe4f   :  { %4924 = vrcp.f32 %v1475_v39 }
 0xe51   :  { %v1478_v40 = vpop.xlane.xlu0 %1477 }
 0xe52   :  { %4926 = vrcp.f32 %v1478_v40 }
 0xe55   :  { %v1481_v41 = vpop.xlane.xlu1 %1480  ;;  %v1497_v30 = vpop.permute.xlu0 %1496 }
 0xe56   :  { %4928 = vrcp.f32 %v1481_v41  ;;  %4571 = vmatprep.subr.mxu1 %v1497_v30 }
 0xe57   :  { %4572 = vmatpush3.msra.mxu1 %v1497_v30 }
 0xe59   :  { %v1495_v31 = vpop.permute.xlu1 %1494  ;;  %v1604_v29 = vpop.permute.xlu0 %1603 }
 0xe5a   :  { %4573 = vmatprep.subr.mxu1 %v1495_v31  ;;  %v1647_v45 = vsel %vm502_vm2, %v5442_v8, %v1604_v29 }
 0xe5b   :  { %v4923_v34 = vpop.eup %4922  ;;  %4574 = vmatpush3.msra.mxu1 %v1495_v31 }
 0xe5c   :  { %v1483_v11 = vmul.f32 %v4923_v34, %v4917_v63  ;;  %v4925_v51 = vpop.eup %4924 }
 0xe5d   :  { %v1493_v33 = vpop.permute.xlu1 %1492  ;;  %v1485_v14 = vmul.f32 %v4925_v51, %v4915_v60  ;;  %v1620_v37 = vpop.permute.xlu0 %1619 }
 0xe5e   :  { %4575 = vmatprep.subr.mxu1 %v1493_v33  ;;  %4579 = vmatprep.mubr.msk.f32.mxu1 %vm238_vm1, %v1483_v11  ;;  %v1652_v46 = vsel %vm1651_vm3, %v1647_v45, %v1620_v37 }
 0xe5f   :  { %4576 = vmatpush3.msra.mxu1 %v1493_v33  ;;  %v4927_v12 = vpop.eup %4926 }
 0xe60   :  { %v1487_v16 = vmul.f32 %v4927_v12, %v4919_v1 }
 0xe61   :  { %v1491_v13 = vpop.permute.xlu1 %1490  ;;  %v1608_v47 = vpop.permute.xlu0 %1607 }
 0xe62   :  { %4577 = vmatprep.subr.mxu1 %v1491_v13  ;;  %v1649_v59 = vsel %vm502_vm2, %v5446_v10, %v1608_v47  ;;  %v5638_v10 = vld [vmem:[%s6232_s7] sm:$0xff]  ;;  %v1844_v47 = vld [vmem:[%s6235_s10 + $0x10] sm:$0xff] }
 0xe63   :  { %v4929_v15 = vpop.eup %4928  ;;  %4578 = vmatpush3.msra.mxu1 %v1491_v13  ;;  %v1769_v1 = vrot.slane %v5638_v10, %v5245_v7 }
 0xe64   :  { %4580 = vmatmul.mubr.msk.f32.vlgmr.msra.gmra.mxu1 %vm238_vm1, %v1485_v14  ;;  %v1489_v17 = vmul.f32 %v4929_v15, %v4921_v3  ;;  %4585 = vmatprep.subr.mxu1 %v1664_v18 }
 0xe65   :  { %4582 = vmatprep.mubr.msk.f32.mxu1 %vm238_vm1, %v1487_v16  ;;  %4586 = vmatpush3.msra.mxu1 %v1664_v18  ;;  %v1606_v28 = vpop.permute.xlu1 %1605  ;;  %v1624_v44 = vpop.permute.xlu0 %1623 }
 0xe66   :  { %4587 = vmatprep.subr.mxu1 %v1663_v19  ;;  %v1648_v49 = vsel %vm502_vm2, %v5440_v6, %v1606_v28  ;;  %v1654_v8 = vsel %vm1651_vm3, %v1649_v59, %v1624_v44  ;;  %v1842_v44 = vld [vmem:[%s6235_s10] sm:$0xff] }
 0xe67   :  { %4588 = vmatpush3.msra.mxu1 %v1663_v19 }
 0xe68   :  { %4583 = vmatmul.mubr.msk.f32.gmra.mxu1 %vm238_vm1, %v1489_v17  ;;  %4589 = vmatprep.subr.mxu1 %v1662_v20 }
 0xe69   :  { %4590 = vmatpush3.msra.mxu1 %v1662_v20  ;;  %v1622_v36 = vpop.permute.xlu1 %1621 }
 0xe6a   :  { %4591 = vmatprep.subr.mxu1 %v1661_v22  ;;  %v1653_v55 = vsel %vm1651_vm3, %v1648_v49, %v1622_v36 }
 0xe6b   :  { %4592 = vmatpush3.msra.mxu1 %v1661_v22 }
 0xe6d   :  { %v1610_v42 = vpop.permute.xlu1 %1609 }
 0xe6e   :  { %v1650_v6 = vsel %vm502_vm2, %v5444_v9, %v1610_v42  ;;  %v1845_v42 = vld [vmem:[%s6235_s10 + $0x18] sm:$0xff] }
 0xe6f   :  { %4599 = vmatprep.subr.mxu0 %v1845_v42 }
 0xe70   :  { %4600 = vmatpush3.msra.mxu0 %v1845_v42 }
 0xe71   :  { %v1626_v43 = vpop.permute.xlu1 %1625  ;;  %4601 = vmatprep.subr.mxu0 %v1844_v47 }
 0xe72   :  { %v1655_v62 = vsel %vm1651_vm3, %v1650_v6, %v1626_v43  ;;  %v1843_v43 = vld [vmem:[%s6235_s10 + $0x8] sm:$0xff]  ;;  %4602 = vmatpush3.msra.mxu0 %v1844_v47 }
 0xe73   :  { %4603 = vmatprep.subr.mxu0 %v1843_v43 }
 0xe74   :  { %4604 = vmatpush3.msra.mxu0 %v1843_v43 }
 0xe75   :  { %4605 = vmatprep.subr.mxu0 %v1842_v44 }
 0xe76   :  { %4606 = vmatpush3.msra.mxu0 %v1842_v44 }
 0xf24   :  { %v4581_v23 = vpop.f32.mrf.mxu1 }
 0xf25   :  { %1637 = vrot.lane.b32.xlu1 %v4581_v23, %s6240_s18 }
 0xf26   :  { %v1580_v24 = vpop.f32.mrf.mxu1 }
 0xf27   :  { %1635 = vrot.lane.b32.xlu0 %v1580_v24, %s6240_s18 }
 0xf28   :  { %v4584_v25 = vpop.f32.mrf.mxu1 }
 0xf29   :  { %1641 = vrot.lane.b32.xlu1 %v4584_v25, %s6240_s18 }
 0xf2a   :  { %v1590_v26 = vpop.f32.mrf.mxu1 }
 0xf2b   :  { %1639 = vrot.lane.b32.xlu0 %v1590_v26, %s6240_s18 }
 0xf97   :  { %v1638_v54 = vpop.permute.xlu1 %1637 }
 0xf98   :  { %v1658_v4 = vsel %vm1656_vm4, %v1653_v55, %v1638_v54 }
 0xf99   :  { %v1636_v53 = vpop.permute.xlu0 %1635 }
 0xf9a   :  { %v1657_v56 = vsel %vm1656_vm4, %v1652_v46, %v1636_v53 }
 0xf9b   :  { %4593 = vmatprep.mubr.msk.f32.mxu1 %vm238_vm1, %v1657_v56  ;;  %v1642_v61 = vpop.permute.xlu1 %1641 }
 0xf9c   :  { %4594 = vmatmul.mubr.msk.f32.vlgmr.msra.gmra.mxu1 %vm238_vm1, %v1658_v4  ;;  %v1660_v0 = vsel %vm1656_vm4, %v1655_v62, %v1642_v61  ;;  %v1829_v62 = vrot.slane %v5638_v10, %v5258_v57 }
 0xf9d   :  { %v1640_v60 = vpop.permute.xlu0 %1639 }
 0xf9e   :  { %v1659_v63 = vsel %vm1656_vm4, %v1654_v8, %v1640_v60 }
 0xf9f   :  { %4596 = vmatprep.mubr.msk.f32.mxu1 %vm238_vm1, %v1659_v63 }
 0xfa0   :  { %4597 = vmatmul.mubr.msk.f32.gmra.mxu1 %vm238_vm1, %v1660_v0 }
0x105c   :  { %v4595_v9 = vpop.f32.mrf.mxu1 }
0x105d   :  { %v1763_v2 = vadd.f32 %v4595_v9, %v5285_v21  ;;  %v1837_v9 = vrot.slane %v5638_v10, %v5261_v58 }
0x105e   :  { %v1743_v3 = vpop.f32.mrf.mxu1 }
0x105f   :  { %v5643_v5 = vadd.f32 %v1769_v1, %v1763_v2  ;;  %v1762_v38 = vadd.f32 %v1743_v3, %v5292_v27 }
0x1060   :  { %v4598_v39 = vpop.f32.mrf.mxu1 }
0x1061   :  { %v5646_v40 = vadd.f32 %v1769_v1, %v1762_v38  ;;  %v1777_v41 = vsel %vm238_vm1, %v5643_v5, 0.0  ;;  %v1765_v31 = vadd.f32 %v4598_v39, %v5299_v32 }
0x1062   :  { %1778 = vadd.xlane.f32.xlu1 %v1777_v41  ;;  %v1753_v30 = vpop.f32.mrf.mxu1 }
0x1063   :  { %v1764_v34 = vadd.f32 %v1753_v30, %v5303_v35  ;;  %v1774_v21 = vsel %vm238_vm1, %v5646_v40, 0.0  ;;  %v5656_v33 = vadd.f32 %v1769_v1, %v1765_v31 }
0x1064   :  { %1775 = vadd.xlane.f32.xlu0 %v1774_v21 }
0x1065   :  { %v5654_v11 = vadd.f32 %v1769_v1, %v1764_v34  ;;  %v1783_v51 = vsel %vm238_vm1, %v5656_v33, 0.0 }
0x1067   :  { %v1780_v27 = vsel %vm238_vm1, %v5654_v11, 0.0 }
0x1068   :  { %1781 = vadd.xlane.f32.xlu0 %v1780_v27 }
0x106c   :  { %1784 = vadd.xlane.f32.xlu0 %v1783_v51 }
0x10eb   :  { %v1779_v12 = vpop.xlane.xlu1 %1778 }
0x10ec   :  { %v1787_v32 = vmul.f32 0.03125, %v1779_v12 }
0x10ed   :  { %v1776_v13 = vpop.xlane.xlu0 %1775 }
0x10ee   :  { %v1791_v35 = vsub.f32 %v5643_v5, %v1787_v32  ;;  %v1786_v14 = vmul.f32 0.03125, %v1776_v13  ;;  %v1974_v32 = vld [vmem:[%s6236_s11 + $0x38] sm:$0xff]  ;;  %v1973_v13 = vld [vmem:[%s6236_s11 + $0x30] sm:$0xff] }
0x10ef   :  { %4613 = vmatprep.subr.mxu1 %v1974_v32 }
0x10f0   :  { %v1790_v15 = vsub.f32 %v5646_v40, %v1786_v14  ;;  %v1795_v16 = vmul.f32 %v1791_v35, %v1791_v35  ;;  %4614 = vmatpush3.msra.mxu1 %v1974_v32  ;;  %v1971_v14 = vld [vmem:[%s6236_s11 + $0x20] sm:$0xff] }
0x10f1   :  { %v1782_v17 = vpop.xlane.xlu0 %1781  ;;  %4615 = vmatprep.subr.mxu1 %v1973_v13 }
0x10f2   :  { %v1788_v18 = vmul.f32 0.03125, %v1782_v17  ;;  %v1801_v19 = vsel %vm238_vm1, %v1795_v16, 0.0  ;;  %v1794_v20 = vmul.f32 %v1790_v15, %v1790_v15  ;;  %4616 = vmatpush3.msra.mxu1 %v1973_v13  ;;  %v1969_v16 = vld [vmem:[%s6236_s11 + $0x10] sm:$0xff]  ;;  %v1968_v17 = vld [vmem:[%s6236_s11 + $0x8] sm:$0xff] }
0x10f3   :  { %1802 = vadd.xlane.f32.xlu1 %v1801_v19  ;;  %v5715_v19 = vsub.s32 6, %v5219_v48 }
0x10f4   :  { %v1792_v22 = vsub.f32 %v5654_v11, %v1788_v18  ;;  %v1798_v23 = vsel %vm238_vm1, %v1794_v20, 0.0  ;;  %v1967_v18 = vld [vmem:[%s6236_s11] sm:$0xff] }
0x10f5   :  { %1799 = vadd.xlane.f32.xlu0 %v1798_v23  ;;  %v1785_v24 = vpop.xlane.xlu0 %1784  ;;  %v1849_v20 = vrot.slane %v5638_v10, %v5715_v19 }
0x10f6   :  { %v1789_v25 = vmul.f32 0.03125, %v1785_v24  ;;  %v1796_v26 = vmul.f32 %v1792_v22, %v1792_v22 }
0x10f8   :  { %v1793_v28 = vsub.f32 %v5656_v33, %v1789_v25  ;;  %v1804_v29 = vsel %vm238_vm1, %v1796_v26, 0.0 }
0x10f9   :  { %1805 = vadd.xlane.f32.xlu0 %v1804_v29 }
0x10fa   :  { %v1797_v36 = vmul.f32 %v1793_v28, %v1793_v28 }
0x10fc   :  { %v1807_v37 = vsel %vm238_vm1, %v1797_v36, 0.0 }
0x10fd   :  { %1808 = vadd.xlane.f32.xlu1 %v1807_v37 }
0x117c   :  { %v1803_v54 = vpop.xlane.xlu1 %1802 }
0x117d   :  { %v1811_v45 = vmul.f32 0.03125, %v1803_v54 }
0x117e   :  { %v1800_v46 = vpop.xlane.xlu0 %1799 }
0x117f   :  { %v1815_v49 = vadd.f32 1e-05, %v1811_v45  ;;  %v1810_v53 = vmul.f32 0.03125, %v1800_v46 }
0x1181   :  { %4930 = vrsqrt.f32 %v1815_v49  ;;  %v1814_v55 = vadd.f32 1e-05, %v1810_v53 }
0x1182   :  { %v1806_v56 = vpop.xlane.xlu0 %1805 }
0x1183   :  { %4932 = vrsqrt.f32 %v1814_v55  ;;  %v1812_v4 = vmul.f32 0.03125, %v1806_v56 }
0x1185   :  { %v1816_v59 = vadd.f32 1e-05, %v1812_v4 }
0x1186   :  { %v1809_v61 = vpop.xlane.xlu1 %1808 }
0x1187   :  { %4934 = vrsqrt.f32 %v1816_v59  ;;  %v1813_v8 = vmul.f32 0.03125, %v1809_v61 }
0x1189   :  { %v1817_v6 = vadd.f32 1e-05, %v1813_v8 }
0x118b   :  { %4936 = vrsqrt.f32 %v1817_v6 }
0x118e   :  { %v4931_v60 = vpop.eup %4930 }
0x118f   :  { %v1823_v63 = vmul.f32 %v4931_v60, %v1791_v35  ;;  %v1972_v35 = vld [vmem:[%s6236_s11 + $0x28] sm:$0xff] }
0x1190   :  { %v4933_v0 = vpop.eup %4932  ;;  %4617 = vmatprep.subr.mxu1 %v1972_v35 }
0x1191   :  { %v1822_v1 = vmul.f32 %v4933_v0, %v1790_v15  ;;  %v1831_v2 = vmul.f32 %v1829_v62, %v1823_v63  ;;  %4618 = vmatpush3.msra.mxu1 %v1972_v35  ;;  %v1970_v15 = vld [vmem:[%s6236_s11 + $0x18] sm:$0xff]  ;;  %v5724_v0 = vsub.s32 5, %v5219_v48 }
0x1192   :  { %4619 = vmatprep.subr.mxu1 %v1971_v14 }
0x1193   :  { %v1830_v3 = vmul.f32 %v1829_v62, %v1822_v1  ;;  %v1839_v30 = vadd.f32 %v1837_v9, %v1831_v2  ;;  %4620 = vmatpush3.msra.mxu1 %v1971_v14  ;;  %v1978_v1 = vrot.slane %v5638_v10, %v5724_v0 }
0x1194   :  { %v4935_v38 = vpop.eup %4934  ;;  %4621 = vmatprep.subr.mxu1 %v1970_v15 }
0x1195   :  { %v1838_v39 = vadd.f32 %v1837_v9, %v1830_v3  ;;  %v1824_v41 = vmul.f32 %v4935_v38, %v1792_v22  ;;  %4622 = vmatpush3.msra.mxu1 %v1970_v15 }
0x1196   :  { %4623 = vmatprep.subr.mxu1 %v1969_v16 }
0x1197   :  { %4607 = vmatprep.mubr.msk.f32.mxu0 %vm238_vm1, %v1838_v39  ;;  %v1832_v31 = vmul.f32 %v1829_v62, %v1824_v41  ;;  %4624 = vmatpush3.msra.mxu1 %v1969_v16 }
0x1198   :  { %v4937_v34 = vpop.eup %4936  ;;  %4608 = vmatmul.mubr.msk.f32.vlgmr.msra.gmra.mxu0 %vm238_vm1, %v1839_v30  ;;  %4625 = vmatprep.subr.mxu1 %v1968_v17 }
0x1199   :  { %v1840_v21 = vadd.f32 %v1837_v9, %v1832_v31  ;;  %v1825_v27 = vmul.f32 %v4937_v34, %v1793_v28  ;;  %4626 = vmatpush3.msra.mxu1 %v1968_v17 }
0x119a   :  { %4627 = vmatprep.subr.mxu1 %v1967_v18 }
0x119b   :  { %4610 = vmatprep.mubr.msk.f32.mxu0 %vm238_vm1, %v1840_v21  ;;  %v1833_v51 = vmul.f32 %v1829_v62, %v1825_v27  ;;  %4628 = vmatpush3.msra.mxu1 %v1967_v18 }
0x119d   :  { %v1841_v12 = vadd.f32 %v1837_v9, %v1833_v51 }
0x119f   :  { %4611 = vmatmul.mubr.msk.f32.gmra.mxu0 %vm238_vm1, %v1841_v12 }
0x1258   :  { %v4609_v22 = vpop.f32.mrf.mxu0 }
0x1259   :  { %v1934_v23 = vadd.f32 %v4609_v22, %v1849_v20 }
0x125a   :  { %v1928_v24 = vpop.f32.mrf.mxu0 }
0x125b   :  { %v1952_v25 = vmul.f32 0.70710677, %v1934_v23  ;;  %v1929_v26 = vadd.f32 %v1928_v24, %v1849_v20  ;;  %v1948_v53 = vmul.f32 0.5, %v1934_v23 }
0x125d   :  { %4938 = verf.f32 %v1952_v25  ;;  %v1951_v28 = vmul.f32 0.70710677, %v1929_v26  ;;  %v1947_v46 = vmul.f32 0.5, %v1929_v26 }
0x125f   :  { %4940 = verf.f32 %v1951_v28  ;;  %v4612_v29 = vpop.f32.mrf.mxu0 }
0x1260   :  { %v1944_v36 = vadd.f32 %v4612_v29, %v1849_v20 }
0x1261   :  { %v1938_v37 = vpop.f32.mrf.mxu0 }
0x1262   :  { %v1954_v42 = vmul.f32 0.70710677, %v1944_v36  ;;  %v1939_v47 = vadd.f32 %v1938_v37, %v1849_v20  ;;  %v1950_v60 = vmul.f32 0.5, %v1944_v36 }
0x1264   :  { %4942 = verf.f32 %v1954_v42  ;;  %v1953_v43 = vmul.f32 0.70710677, %v1939_v47  ;;  %v1949_v8 = vmul.f32 0.5, %v1939_v47  ;;  %v4132_v42 = vld [vmem:[%s6233_s8 + $0x38] sm:$0xff]  ;;  %v4131_v47 = vld [vmem:[%s6233_s8 + $0x30] sm:$0xff] }
0x1265   :  { %4635 = vmatprep.subr.mxu0 %v4132_v42 }
0x1266   :  { %4944 = verf.f32 %v1953_v43  ;;  %4636 = vmatpush3.msra.mxu0 %v4132_v42  ;;  %v4130_v43 = vld [vmem:[%s6233_s8 + $0x28] sm:$0xff] }
0x1267   :  { %4637 = vmatprep.subr.mxu0 %v4131_v47 }
0x1268   :  { %4638 = vmatpush3.msra.mxu0 %v4131_v47  ;;  %v5825_v47 = vld [vmem:[%s6228_s3 + $0x18] sm:$0xff] }
0x1269   :  { %4639 = vmatprep.subr.mxu0 %v4130_v43 }
0x126a   :  { %v4939_v44 = vpop.eup %4938  ;;  %4640 = vmatpush3.msra.mxu0 %v4130_v43 }
0x126b   :  { %v1960_v45 = vadd.f32 1.0, %v4939_v44  ;;  %v4129_v44 = vld [vmem:[%s6233_s8 + $0x20] sm:$0xff] }
0x126c   :  { %v4941_v54 = vpop.eup %4940  ;;  %4641 = vmatprep.subr.mxu0 %v4129_v44 }
0x126d   :  { %v1959_v49 = vadd.f32 1.0, %v4941_v54  ;;  %v1964_v56 = vmul.f32 %v1960_v45, %v1948_v53  ;;  %4642 = vmatpush3.msra.mxu0 %v4129_v44 }
0x126f   :  { %v1963_v55 = vmul.f32 %v1959_v49, %v1947_v46 }
0x1271   :  { %v4943_v4 = vpop.eup %4942  ;;  %4629 = vmatprep.mubr.msk.f32.mxu1 %vm59_vm0, %v1963_v55 }
0x1272   :  { %4630 = vmatmul.mubr.msk.f32.vlgmr.msra.gmra.mxu1 %vm59_vm0, %v1964_v56  ;;  %v1962_v61 = vadd.f32 1.0, %v4943_v4 }
0x1273   :  { %v4945_v59 = vpop.eup %4944 }
0x1274   :  { %v1961_v6 = vadd.f32 1.0, %v4945_v59  ;;  %v1966_v63 = vmul.f32 %v1962_v61, %v1950_v60  ;;  %v4128_v60 = vld [vmem:[%s6232_s7 + $0x8] sm:$0xff] }
0x1276   :  { %v1965_v62 = vmul.f32 %v1961_v6, %v1949_v8 }
0x1278   :  { %4632 = vmatprep.mubr.msk.f32.mxu1 %vm59_vm0, %v1965_v62 }
0x1279   :  { %4633 = vmatmul.mubr.msk.f32.gmra.mxu1 %vm59_vm0, %v1966_v63  ;;  %v2137_v63 = vrot.slane %v4128_v60, %v5222_v50 }
0x1332   :  { %v4631_v9 = vpop.f32.mrf.mxu1 }
0x1333   :  { %v2063_v2 = vadd.f32 %v4631_v9, %v1978_v1 }
0x1334   :  { %v2057_v3 = vpop.f32.mrf.mxu1 }
0x1335   :  { %v5729_v38 = vadd.f32 %v2063_v2, %v5643_v5  ;;  %v2058_v39 = vadd.f32 %v2057_v3, %v1978_v1  ;;  %v2145_v3 = vrot.slane %v4128_v60, %v5230_v52 }
0x1337   :  { %v5732_v41 = vadd.f32 %v2058_v39, %v5646_v40  ;;  %v2085_v30 = vsel %vm238_vm1, %v5729_v38, 0.0 }
0x1338   :  { %2086 = vadd.xlane.f32.xlu1 %v2085_v30 }
0x1339   :  { %v4634_v31 = vpop.f32.mrf.mxu1  ;;  %v2082_v34 = vsel %vm238_vm1, %v5732_v41, 0.0 }
0x133a   :  { %v2073_v21 = vadd.f32 %v4634_v31, %v1978_v1  ;;  %2083 = vadd.xlane.f32.xlu0 %v2082_v34 }
0x133b   :  { %v2067_v10 = vpop.f32.mrf.mxu1 }
0x133c   :  { %v5739_v27 = vadd.f32 %v2073_v21, %v5656_v33  ;;  %v2068_v5 = vadd.f32 %v2067_v10, %v1978_v1 }
0x133e   :  { %v5742_v51 = vadd.f32 %v2068_v5, %v5654_v11  ;;  %v2091_v40 = vsel %vm238_vm1, %v5739_v27, 0.0 }
0x133f   :  { %2092 = vadd.xlane.f32.xlu1 %v2091_v40 }
0x1340   :  { %v2088_v12 = vsel %vm238_vm1, %v5742_v51, 0.0 }
0x1341   :  { %2089 = vadd.xlane.f32.xlu0 %v2088_v12 }
0x13c1   :  { %v2087_v32 = vpop.xlane.xlu1 %2086 }
0x13c2   :  { %v2095_v13 = vmul.f32 0.03125, %v2087_v32 }
0x13c3   :  { %v2084_v35 = vpop.xlane.xlu0 %2083 }
0x13c4   :  { %v2099_v14 = vsub.f32 %v5729_v38, %v2095_v13  ;;  %v2094_v15 = vmul.f32 0.03125, %v2084_v35 }
0x13c6   :  { %v2098_v33 = vsub.f32 %v5732_v41, %v2094_v15  ;;  %v2103_v16 = vmul.f32 %v2099_v14, %v2099_v14 }
0x13c8   :  { %v2093_v17 = vpop.xlane.xlu1 %2092  ;;  %v2109_v11 = vsel %vm238_vm1, %v2103_v16, 0.0  ;;  %v2102_v18 = vmul.f32 %v2098_v33, %v2098_v33 }
0x13c9   :  { %v2097_v20 = vmul.f32 0.03125, %v2093_v17  ;;  %2110 = vadd.xlane.f32.xlu1 %v2109_v11 }
0x13ca   :  { %v2090_v22 = vpop.xlane.xlu0 %2089  ;;  %v2106_v23 = vsel %vm238_vm1, %v2102_v18, 0.0 }
0x13cb   :  { %v2101_v24 = vsub.f32 %v5739_v27, %v2097_v20  ;;  %v2096_v25 = vmul.f32 0.03125, %v2090_v22  ;;  %2107 = vadd.xlane.f32.xlu0 %v2106_v23  ;;  %v5812_v23 = vld [vmem:[%s6228_s3 + $0x8] sm:$0xff] }
0x13cd   :  { %v2100_v26 = vsub.f32 %v5742_v51, %v2096_v25  ;;  %v2105_v28 = vmul.f32 %v2101_v24, %v2101_v24 }
0x13cf   :  { %v2115_v29 = vsel %vm238_vm1, %v2105_v28, 0.0  ;;  %v2104_v36 = vmul.f32 %v2100_v26, %v2100_v26  ;;  %v5818_v28 = vld [vmem:[%s6228_s3] sm:$0xff] }
0x13d0   :  { %2116 = vadd.xlane.f32.xlu1 %v2115_v29 }
0x13d1   :  { %v2112_v37 = vsel %vm238_vm1, %v2104_v36, 0.0 }
0x13d2   :  { %2113 = vadd.xlane.f32.xlu0 %v2112_v37 }
0x1452   :  { %v2111_v54 = vpop.xlane.xlu1 %2110 }
0x1453   :  { %v2119_v45 = vmul.f32 0.03125, %v2111_v54 }
0x1454   :  { %v2108_v46 = vpop.xlane.xlu0 %2107 }
0x1455   :  { %v2123_v49 = vadd.f32 1e-05, %v2119_v45  ;;  %v2118_v53 = vmul.f32 0.03125, %v2108_v46  ;;  %v5832_v45 = vld [vmem:[%s6228_s3 + $0x10] sm:$0xff]  ;;  %s6242_s3 = smov 16  }
0x1457   :  { %4946 = vrsqrt.f32 %v2123_v49  ;;  %v2122_v55 = vadd.f32 1e-05, %v2118_v53 }
0x1459   :  { %4948 = vrsqrt.f32 %v2122_v55  ;;  %v2117_v56 = vpop.xlane.xlu1 %2116 }
0x145a   :  { %v2121_v4 = vmul.f32 0.03125, %v2117_v56 }
0x145b   :  { %v2114_v59 = vpop.xlane.xlu0 %2113 }
0x145c   :  { %v2125_v61 = vadd.f32 1e-05, %v2121_v4  ;;  %v2120_v8 = vmul.f32 0.03125, %v2114_v59 }
0x145e   :  { %4950 = vrsqrt.f32 %v2125_v61  ;;  %v2124_v6 = vadd.f32 1e-05, %v2120_v8 }
0x1460   :  { %4952 = vrsqrt.f32 %v2124_v6 }
0x1464   :  { %v4947_v62 = vpop.eup %4946 }
0x1465   :  { %v2131_v1 = vmul.f32 %v4947_v62, %v2099_v14 }
0x1466   :  { %v4949_v9 = vpop.eup %4948 }
0x1467   :  { %v2130_v2 = vmul.f32 %v4949_v9, %v2098_v33  ;;  %v2139_v39 = vmul.f32 %v2137_v63, %v2131_v1 }
0x1469   :  { %v2138_v30 = vmul.f32 %v2137_v63, %v2130_v2  ;;  %v2147_v21 = vadd.f32 %v2145_v3, %v2139_v39 }
0x146b   :  { %v4951_v31 = vpop.eup %4950  ;;  %v2146_v34 = vadd.f32 %v2145_v3, %v2138_v30 }
0x146c   :  { %v2133_v10 = vmul.f32 %v4951_v31, %v2101_v24 }
0x146d   :  { %v4953_v5 = vpop.eup %4952  ;;  %4643 = vmatprep.mubr.msk.f32.mxu0 %vm238_vm1, %v2146_v34 }
0x146e   :  { %4644 = vmatmul.mubr.msk.f32.vlgmr.msra.gmra.mxu0 %vm238_vm1, %v2147_v21  ;;  %v2132_v40 = vmul.f32 %v4953_v5, %v2100_v26  ;;  %v2141_v12 = vmul.f32 %v2137_v63, %v2133_v10 }
0x1470   :  { %v2140_v32 = vmul.f32 %v2137_v63, %v2132_v40  ;;  %v2149_v13 = vadd.f32 %v2145_v3, %v2141_v12 }
0x1472   :  { %v2148_v50 = vadd.f32 %v2145_v3, %v2140_v32 }
0x1474   :  { %4646 = vmatprep.mubr.msk.f32.mxu0 %vm238_vm1, %v2148_v50 }
0x1475   :  { %4647 = vmatmul.mubr.msk.f32.gmra.mxu0 %vm238_vm1, %v2149_v13 }
0x152e   :  { %v5777_v52 = vpop.f32.mrf.mxu0 }
0x1530   :  { %v5779_v35 = vpop.f32.mrf.mxu0 }
0x1531   :  { %4657 = vmatprep.mubr.msk.f32.mxu0 %vm502_vm2, %v5779_v35 }
0x1535   :  { %v5783_v14 = vpop.f32.mrf.mxu0 }
0x1536   :  { %2262 = vrot.lane.b32.xlu0 %v5783_v14, %s5079_s16 }
0x1537   :  { %v5787_v15 = vpop.f32.mrf.mxu0 }
0x1538   :  { %2260 = vrot.lane.b32.xlu1 %v5787_v15, %s5079_s16 }
0x153c   :  { %2258 = vrot.lane.b32.xlu1 %v5777_v52, %s5079_s16 }
0x1540   :  { %2256 = vrot.lane.b32.xlu1 %v5779_v35, %s5079_s16 }
0x15a8   :  { %v2263_v33 = vpop.permute.xlu0 %2262 }
0x15a9   :  { %4649 = vmatprep.subr.msk.mxu0 %vm502_vm2, %v2263_v33 }
0x15aa   :  { %4650 = vmatpush3.xpose.msk.msra.mxu0 %vm502_vm2, %v2263_v33  ;;  %v2261_v16 = vpop.permute.xlu1 %2260 }
0x15ab   :  { %4651 = vmatprep.subr.msk.mxu0 %vm502_vm2, %v2261_v16 }
0x15ae   :  { %4652 = vmatpush3.xpose.msk.msra.mxu0 %vm502_vm2, %v2261_v16  ;;  %v2259_v17 = vpop.permute.xlu1 %2258 }
0x15af   :  { %4653 = vmatprep.subr.msk.mxu0 %vm502_vm2, %v2259_v17 }
0x15b2   :  { %4654 = vmatpush3.xpose.msk.msra.mxu0 %vm502_vm2, %v2259_v17  ;;  %v2257_v11 = vpop.permute.xlu1 %2256 }
0x15b3   :  { %4655 = vmatprep.subr.msk.mxu0 %vm502_vm2, %v2257_v11 }
0x15b6   :  { %4656 = vmatpush3.xpose.msk.msra.mxu0 %vm502_vm2, %v2257_v11 }
0x15b9   :  { %4658 = vmatmul.mubr.msk.f32.vlgmr.msra.gmra.mxu0 %vm502_vm2, %v5777_v52 }
0x15ba   :  { %4660 = vmatprep.mubr.msk.f32.mxu0 %vm502_vm2, %v5787_v15 }
0x15bd   :  { %4661 = vmatmul.mubr.msk.f32.gmra.mxu0 %vm502_vm2, %v5783_v14 }
0x1679   :  { %v4659_v18 = vpop.f32.mrf.mxu0 }
0x167a   :  { %v2366_v20 = vmul.f32 0.35355338, %v4659_v18 }
0x167b   :  { %v2346_v22 = vpop.f32.mrf.mxu0 }
0x167c   :  { %v2370_v24 = vadd.f32 %v5812_v23, %v2366_v20  ;;  %v2365_v25 = vmul.f32 0.35355338, %v2346_v22 }
0x167d   :  { %v4662_v26 = vpop.f32.mrf.mxu0 }
0x167e   :  { %v2369_v29 = vadd.f32 %v5818_v28, %v2365_v25  ;;  %v2368_v36 = vmul.f32 0.35355338, %v4662_v26  ;;  %v2376_v37 = vsel %vm238_vm1, %v2370_v24, -inf }
0x167f   :  { %2377 = vmax.xlane.f32.xlu1 %v2376_v37  ;;  %v2356_v42 = vpop.f32.mrf.mxu0 }
0x1680   :  { %v2372_v43 = vadd.f32 %v5825_v47, %v2368_v36  ;;  %v2367_v44 = vmul.f32 0.35355338, %v2356_v42  ;;  %v2373_v54 = vsel %vm238_vm1, %v2369_v29, -inf }
0x1681   :  { %2374 = vmax.xlane.f32.xlu0 %v2373_v54 }
0x1682   :  { %v2371_v46 = vadd.f32 %v5832_v45, %v2367_v44  ;;  %v2382_v49 = vsel %vm238_vm1, %v2372_v43, -inf }
0x1684   :  { %v2379_v53 = vsel %vm238_vm1, %v2371_v46, -inf }
0x1685   :  { %2383 = vmax.xlane.f32.xlu0 %v2382_v49 }
0x1689   :  { %2380 = vmax.xlane.f32.xlu0 %v2379_v53 }
0x1690   :  { %2421 = vrot.lane.b32.xlu1 %v5787_v15, %s5080_s25 }
0x1694   :  { %2419 = vrot.lane.b32.xlu1 %v5777_v52, %s5080_s25 }
0x1698   :  { %2417 = vrot.lane.b32.xlu1 %v5779_v35, %s5080_s25 }
0x169f   :  { %2423 = vrot.lane.b32.xlu0 %v5783_v14, %s5080_s25 }
0x1708   :  { %v2378_v55 = vpop.xlane.xlu1 %2377 }
0x1709   :  { %v2386_v56 = vsub.f32 %v2370_v24, %v2378_v55 }
0x170a   :  { %v2375_v4 = vpop.xlane.xlu0 %2374 }
0x170b   :  { %v2391_v59 = vmul.f32 1.442695, %v2386_v56  ;;  %v2385_v61 = vsub.f32 %v2369_v29, %v2375_v4 }
0x170c   :  { %v2422_v60 = vpop.permute.xlu1 %2421 }
0x170d   :  { %4954 = vpow2.f32 %v2391_v59  ;;  %v2389_v8 = vmul.f32 1.442695, %v2385_v61 }
0x170e   :  { %v2384_v6 = vpop.xlane.xlu0 %2383 }
0x170f   :  { %4956 = vpow2.f32 %v2389_v8  ;;  %v2388_v31 = vsub.f32 %v2372_v43, %v2384_v6 }
0x1710   :  { %v2420_v63 = vpop.permute.xlu1 %2419 }
0x1711   :  { %v2395_v21 = vmul.f32 1.442695, %v2388_v31 }
0x1712   :  { %v2381_v62 = vpop.xlane.xlu0 %2380 }
0x1713   :  { %v2387_v34 = vsub.f32 %v2371_v46, %v2381_v62  ;;  %4958 = vpow2.f32 %v2395_v21 }
0x1714   :  { %v2418_v39 = vpop.permute.xlu1 %2417 }
0x1715   :  { %v2393_v10 = vmul.f32 1.442695, %v2387_v34 }
0x1716   :  { %v2424_v1 = vpop.permute.xlu0 %2423 }
0x1717   :  { %4663 = vmatprep.subr.mxu1 %v2424_v1  ;;  %4960 = vpow2.f32 %v2393_v10 }
0x1718   :  { %4664 = vmatpush3.msra.mxu1 %v2424_v1 }
0x1719   :  { %4665 = vmatprep.subr.mxu1 %v2422_v60 }
0x171a   :  { %v4955_v9 = vpop.eup %4954  ;;  %4666 = vmatpush3.msra.mxu1 %v2422_v60 }
0x171b   :  { %4667 = vmatprep.subr.mxu1 %v2420_v63  ;;  %v2400_v2 = vsel %vm238_vm1, %v4955_v9, 0.0 }
0x171c   :  { %v4957_v3 = vpop.eup %4956  ;;  %2401 = vadd.xlane.f32.xlu1 %v2400_v2  ;;  %4668 = vmatpush3.msra.mxu1 %v2420_v63 }
0x171d   :  { %4669 = vmatprep.subr.mxu1 %v2418_v39  ;;  %v2397_v30 = vsel %vm238_vm1, %v4957_v3, 0.0 }
0x171e   :  { %2398 = vadd.xlane.f32.xlu0 %v2397_v30  ;;  %4670 = vmatpush3.msra.mxu1 %v2418_v39 }
0x1720   :  { %v4959_v5 = vpop.eup %4958 }
0x1721   :  { %v2406_v12 = vsel %vm238_vm1, %v4959_v5, 0.0 }
0x1724   :  { %v4961_v40 = vpop.eup %4960 }
0x1725   :  { %v2403_v32 = vsel %vm238_vm1, %v4961_v40, 0.0 }
0x172d   :  { %2538 = vrot.lane.b32.xlu1 %v5787_v15, %s5081_s2 }
0x1734   :  { %2540 = vrot.lane.b32.xlu0 %v5783_v14, %s5081_s2 }
0x1751   :  { %2407 = vadd.xlane.f32.xlu1 %v2406_v12 }
0x1753   :  { %2404 = vadd.xlane.f32.xlu0 %v2403_v32 }
0x1762   :  { %2534 = vrot.lane.b32.xlu1 %v5779_v35, %s5081_s2 }
0x1766   :  { %2528 = vrot.lane.b32.xlu1 %v5777_v52, %s5082_s26 }
0x1769   :  { %2536 = vrot.lane.b32.xlu0 %v5777_v52, %s5081_s2 }
0x176a   :  { %2532 = vrot.lane.b32.xlu1 %v5783_v14, %s5082_s26 }
0x176d   :  { %2526 = vrot.lane.b32.xlu0 %v5779_v35, %s5082_s26 }
0x1771   :  { %2530 = vrot.lane.b32.xlu0 %v5787_v15, %s5082_s26 }
0x17a5   :  { %v2402_v50 = vpop.xlane.xlu1 %2401 }
0x17a6   :  { %4962 = vrcp.f32 %v2402_v50 }
0x17a7   :  { %v2399_v13 = vpop.xlane.xlu0 %2398 }
0x17a8   :  { %4964 = vrcp.f32 %v2399_v13 }
0x17a9   :  { %v2539_v20 = vpop.permute.xlu1 %2538 }
0x17ab   :  { %v2541_v33 = vpop.permute.xlu0 %2540 }
0x17ac   :  { %4677 = vmatprep.subr.msk.mxu1 %vm502_vm2, %v2541_v33 }
0x17b3   :  { %v4963_v16 = vpop.eup %4962 }
0x17b4   :  { %v2412_v18 = vmul.f32 %v4963_v16, %v4955_v9 }
0x17b5   :  { %v4965_v17 = vpop.eup %4964 }
0x17b6   :  { %v2410_v11 = vmul.f32 %v4965_v17, %v4957_v3 }
0x17b8   :  { %4671 = vmatprep.mubr.msk.f32.mxu1 %vm238_vm1, %v2410_v11 }
0x17b9   :  { %4672 = vmatmul.mubr.msk.f32.vlgmr.msra.gmra.mxu1 %vm238_vm1, %v2412_v18 }
0x17ba   :  { %4678 = vmatpush3.xpose.msk.msra.mxu1 %vm502_vm2, %v2541_v33 }
0x17bb   :  { %4679 = vmatprep.subr.msk.mxu1 %vm502_vm2, %v2539_v20 }
0x17be   :  { %4680 = vmatpush3.xpose.msk.msra.mxu1 %vm502_vm2, %v2539_v20 }
0x17da   :  { %v2408_v22 = vpop.xlane.xlu1 %2407 }
0x17db   :  { %4966 = vrcp.f32 %v2408_v22 }
0x17dc   :  { %v2405_v24 = vpop.xlane.xlu0 %2404 }
0x17dd   :  { %4968 = vrcp.f32 %v2405_v24 }
0x17de   :  { %v2535_v26 = vpop.permute.xlu1 %2534 }
0x17e0   :  { %v2537_v25 = vpop.permute.xlu0 %2536 }
0x17e1   :  { %4681 = vmatprep.subr.msk.mxu1 %vm502_vm2, %v2537_v25 }
0x17e2   :  { %4682 = vmatpush3.xpose.msk.msra.mxu1 %vm502_vm2, %v2537_v25  ;;  %v2529_v44 = vpop.permute.xlu1 %2528 }
0x17e3   :  { %4683 = vmatprep.subr.msk.mxu1 %vm502_vm2, %v2535_v26 }
0x17e4   :  { %v2527_v42 = vpop.permute.xlu0 %2526 }
0x17e6   :  { %4684 = vmatpush3.xpose.msk.msra.mxu1 %vm502_vm2, %v2535_v26  ;;  %v2533_v46 = vpop.permute.xlu1 %2532 }
0x17e8   :  { %v4967_v29 = vpop.eup %4966  ;;  %v2531_v54 = vpop.permute.xlu0 %2530 }
0x17e9   :  { %v2416_v43 = vmul.f32 %v4967_v29, %v4959_v5 }
0x17ea   :  { %v4969_v36 = vpop.eup %4968 }
0x17eb   :  { %v2414_v37 = vmul.f32 %v4969_v36, %v4961_v40 }
0x17ed   :  { %4674 = vmatprep.mubr.msk.f32.mxu1 %vm238_vm1, %v2414_v37 }
0x17ee   :  { %4675 = vmatmul.mubr.msk.f32.gmra.mxu1 %vm238_vm1, %v2416_v43 }
0x17ef   :  { %4685 = vmatprep.mubr.msk.f32.mxu1 %vm502_vm2, %v2527_v42 }
0x17f2   :  { %4686 = vmatmul.mubr.msk.f32.vlgmr.msra.gmra.mxu1 %vm502_vm2, %v2529_v44 }
0x17f3   :  { %4688 = vmatprep.mubr.msk.f32.mxu1 %vm502_vm2, %v2531_v54 }
0x17f6   :  { %4689 = vmatmul.mubr.msk.f32.gmra.mxu1 %vm502_vm2, %v2533_v46 }
0x1879   :  { %v5881_v49 = vpop.f32.mrf.mxu1 }
0x187b   :  { %v5883_v53 = vpop.f32.mrf.mxu1 }
0x18ae   :  { %v5885_v55 = vpop.f32.mrf.mxu1 }
0x18b0   :  { %v5887_v56 = vpop.f32.mrf.mxu1 }
0x18b2   :  { %v4687_v4 = vpop.f32.mrf.mxu1 }
0x18b3   :  { %v2644_v59 = vmul.f32 0.35355338, %v4687_v4 }
0x18b4   :  { %v2624_v61 = vpop.f32.mrf.mxu1 }
0x18b5   :  { %v2648_v8 = vadd.f32 %v5812_v23, %v2644_v59  ;;  %v2643_v6 = vmul.f32 0.35355338, %v2624_v61 }
0x18b6   :  { %v4690_v60 = vpop.f32.mrf.mxu1 }
0x18b7   :  { %v2647_v62 = vadd.f32 %v5818_v28, %v2643_v6  ;;  %v2646_v63 = vmul.f32 0.35355338, %v4690_v60  ;;  %v2654_v1 = vsel %vm238_vm1, %v2648_v8, -inf }
0x18b8   :  { %2655 = vmax.xlane.f32.xlu1 %v2654_v1  ;;  %v2634_v9 = vpop.f32.mrf.mxu1 }
0x18b9   :  { %v2650_v2 = vadd.f32 %v5825_v47, %v2646_v63  ;;  %v2645_v3 = vmul.f32 0.35355338, %v2634_v9  ;;  %v2651_v39 = vsel %vm238_vm1, %v2647_v62, -inf }
0x18ba   :  { %2652 = vmax.xlane.f32.xlu0 %v2651_v39 }
0x18bb   :  { %v2649_v30 = vadd.f32 %v5832_v45, %v2645_v3  ;;  %v2660_v31 = vsel %vm238_vm1, %v2650_v2, -inf }
0x18bd   :  { %v2657_v34 = vsel %vm238_vm1, %v2649_v30, -inf }
0x18be   :  { %2661 = vmax.xlane.f32.xlu0 %v2660_v31 }
0x18c2   :  { %2658 = vmax.xlane.f32.xlu0 %v2657_v34 }
0x18c9   :  { %2699 = vrot.lane.b32.xlu1 %v5787_v15, %s5083_s5 }
0x18cd   :  { %2697 = vrot.lane.b32.xlu1 %v5777_v52, %s5083_s5 }
0x18d1   :  { %2695 = vrot.lane.b32.xlu1 %v5779_v35, %s5083_s5 }
0x18d8   :  { %2701 = vrot.lane.b32.xlu0 %v5783_v14, %s5083_s5 }
0x1941   :  { %v2656_v21 = vpop.xlane.xlu1 %2655 }
0x1942   :  { %v2664_v10 = vsub.f32 %v2648_v8, %v2656_v21 }
0x1943   :  { %v2653_v5 = vpop.xlane.xlu0 %2652 }
0x1944   :  { %v2669_v40 = vmul.f32 1.442695, %v2664_v10  ;;  %v2663_v12 = vsub.f32 %v2647_v62, %v2653_v5 }
0x1945   :  { %v2700_v13 = vpop.permute.xlu1 %2699 }
0x1946   :  { %4970 = vpow2.f32 %v2669_v40  ;;  %v2667_v32 = vmul.f32 1.442695, %v2663_v12 }
0x1947   :  { %v2662_v50 = vpop.xlane.xlu0 %2661 }
0x1948   :  { %4972 = vpow2.f32 %v2667_v32  ;;  %v2666_v25 = vsub.f32 %v2650_v2, %v2662_v50 }
0x1949   :  { %v2698_v16 = vpop.permute.xlu1 %2697 }
0x194a   :  { %v2673_v29 = vmul.f32 1.442695, %v2666_v25 }
0x194b   :  { %v2659_v33 = vpop.xlane.xlu0 %2658 }
0x194c   :  { %v2665_v26 = vsub.f32 %v2649_v30, %v2659_v33  ;;  %4974 = vpow2.f32 %v2673_v29 }
0x194d   :  { %v2696_v22 = vpop.permute.xlu1 %2695 }
0x194e   :  { %v2671_v36 = vmul.f32 1.442695, %v2665_v26 }
0x194f   :  { %v2702_v17 = vpop.permute.xlu0 %2701 }
0x1950   :  { %4691 = vmatprep.subr.mxu0 %v2702_v17  ;;  %4976 = vpow2.f32 %v2671_v36 }
0x1951   :  { %4692 = vmatpush3.msra.mxu0 %v2702_v17 }
0x1952   :  { %4693 = vmatprep.subr.mxu0 %v2700_v13 }
0x1953   :  { %v4971_v11 = vpop.eup %4970  ;;  %4694 = vmatpush3.msra.mxu0 %v2700_v13 }
0x1954   :  { %4695 = vmatprep.subr.mxu0 %v2698_v16  ;;  %v2678_v18 = vsel %vm238_vm1, %v4971_v11, 0.0 }
0x1955   :  { %v4973_v20 = vpop.eup %4972  ;;  %2679 = vadd.xlane.f32.xlu1 %v2678_v18  ;;  %4696 = vmatpush3.msra.mxu0 %v2698_v16 }
0x1956   :  { %4697 = vmatprep.subr.mxu0 %v2696_v22  ;;  %v2675_v24 = vsel %vm238_vm1, %v4973_v20, 0.0 }
0x1957   :  { %2676 = vadd.xlane.f32.xlu0 %v2675_v24  ;;  %4698 = vmatpush3.msra.mxu0 %v2696_v22 }
0x1959   :  { %v4975_v37 = vpop.eup %4974 }
0x195a   :  { %v2684_v43 = vsel %vm238_vm1, %v4975_v37, 0.0 }
0x195d   :  { %v4977_v42 = vpop.eup %4976 }
0x195e   :  { %v2681_v44 = vsel %vm238_vm1, %v4977_v42, 0.0 }
0x1966   :  { %2816 = vrot.lane.b32.xlu1 %v5787_v15, %s5084_s27 }
0x196d   :  { %2818 = vrot.lane.b32.xlu0 %v5783_v14, %s5084_s27 }
0x198a   :  { %2685 = vadd.xlane.f32.xlu1 %v2684_v43 }
0x198c   :  { %2682 = vadd.xlane.f32.xlu0 %v2681_v44 }
0x199b   :  { %2812 = vrot.lane.b32.xlu1 %v5779_v35, %s5084_s27 }
0x199f   :  { %2806 = vrot.lane.b32.xlu1 %v5777_v52, %s5085_s28 }
0x19a2   :  { %2814 = vrot.lane.b32.xlu0 %v5777_v52, %s5084_s27 }
0x19a3   :  { %2810 = vrot.lane.b32.xlu1 %v5783_v14, %s5085_s28 }
0x19a6   :  { %2804 = vrot.lane.b32.xlu0 %v5779_v35, %s5085_s28 }
0x19aa   :  { %2808 = vrot.lane.b32.xlu0 %v5787_v15, %s5085_s28 }
0x19de   :  { %v2680_v54 = vpop.xlane.xlu1 %2679 }
0x19df   :  { %4978 = vrcp.f32 %v2680_v54 }
0x19e0   :  { %v2677_v46 = vpop.xlane.xlu0 %2676 }
0x19e1   :  { %4980 = vrcp.f32 %v2677_v46 }
0x19e2   :  { %v2817_v60 = vpop.permute.xlu1 %2816 }
0x19e4   :  { %v2819_v4 = vpop.permute.xlu0 %2818 }
0x19e5   :  { %4705 = vmatprep.subr.msk.mxu0 %vm502_vm2, %v2819_v4 }
0x19ec   :  { %v4979_v59 = vpop.eup %4978 }
0x19ed   :  { %v2690_v6 = vmul.f32 %v4979_v59, %v4971_v11 }
0x19ee   :  { %v4981_v61 = vpop.eup %4980 }
0x19ef   :  { %v2688_v8 = vmul.f32 %v4981_v61, %v4973_v20 }
0x19f1   :  { %4699 = vmatprep.mubr.msk.f32.mxu0 %vm238_vm1, %v2688_v8 }
0x19f2   :  { %4700 = vmatmul.mubr.msk.f32.vlgmr.msra.gmra.mxu0 %vm238_vm1, %v2690_v6 }
0x19f3   :  { %4706 = vmatpush3.xpose.msk.msra.mxu0 %vm502_vm2, %v2819_v4 }
0x19f4   :  { %4707 = vmatprep.subr.msk.mxu0 %vm502_vm2, %v2817_v60 }
0x19f7   :  { %4708 = vmatpush3.xpose.msk.msra.mxu0 %vm502_vm2, %v2817_v60 }
0x1a13   :  { %v2686_v62 = vpop.xlane.xlu1 %2685 }
0x1a14   :  { %4982 = vrcp.f32 %v2686_v62 }
0x1a15   :  { %v2683_v63 = vpop.xlane.xlu0 %2682 }
0x1a16   :  { %4984 = vrcp.f32 %v2683_v63 }
0x1a17   :  { %v2813_v9 = vpop.permute.xlu1 %2812 }
0x1a19   :  { %v2815_v1 = vpop.permute.xlu0 %2814 }
0x1a1a   :  { %4709 = vmatprep.subr.msk.mxu0 %vm502_vm2, %v2815_v1 }
0x1a1b   :  { %4710 = vmatpush3.xpose.msk.msra.mxu0 %vm502_vm2, %v2815_v1  ;;  %v2807_v34 = vpop.permute.xlu1 %2806 }
0x1a1c   :  { %4711 = vmatprep.subr.msk.mxu0 %vm502_vm2, %v2813_v9 }
0x1a1d   :  { %v2805_v30 = vpop.permute.xlu0 %2804 }
0x1a1f   :  { %4712 = vmatpush3.xpose.msk.msra.mxu0 %vm502_vm2, %v2813_v9  ;;  %v2811_v10 = vpop.permute.xlu1 %2810 }
0x1a21   :  { %v4983_v2 = vpop.eup %4982  ;;  %v2809_v21 = vpop.permute.xlu0 %2808 }
0x1a22   :  { %v2694_v31 = vmul.f32 %v4983_v2, %v4975_v37 }
0x1a23   :  { %v4985_v3 = vpop.eup %4984 }
0x1a24   :  { %v2692_v39 = vmul.f32 %v4985_v3, %v4977_v42 }
0x1a26   :  { %4702 = vmatprep.mubr.msk.f32.mxu0 %vm238_vm1, %v2692_v39 }
0x1a27   :  { %4703 = vmatmul.mubr.msk.f32.gmra.mxu0 %vm238_vm1, %v2694_v31 }
0x1a28   :  { %4713 = vmatprep.mubr.msk.f32.mxu0 %vm502_vm2, %v2805_v30 }
0x1a2b   :  { %4714 = vmatmul.mubr.msk.f32.vlgmr.msra.gmra.mxu0 %vm502_vm2, %v2807_v34 }
0x1a2c   :  { %4716 = vmatprep.mubr.msk.f32.mxu0 %vm502_vm2, %v2809_v21 }
0x1a2f   :  { %4717 = vmatmul.mubr.msk.f32.gmra.mxu0 %vm502_vm2, %v2811_v10 }
0x1ab2   :  { %v5941_v5 = vpop.f32.mrf.mxu0 }
0x1ab4   :  { %v5943_v40 = vpop.f32.mrf.mxu0 }
0x1ae7   :  { %v5945_v12 = vpop.f32.mrf.mxu0 }
0x1ae9   :  { %v5947_v32 = vpop.f32.mrf.mxu0 }
0x1aeb   :  { %v4715_v50 = vpop.f32.mrf.mxu0 }
0x1aec   :  { %v2922_v13 = vmul.f32 0.35355338, %v4715_v50 }
0x1aed   :  { %v2902_v33 = vpop.f32.mrf.mxu0 }
0x1aee   :  { %v2926_v16 = vadd.f32 %v5812_v23, %v2922_v13  ;;  %v2921_v17 = vmul.f32 0.35355338, %v2902_v33 }
0x1aef   :  { %v4718_v11 = vpop.f32.mrf.mxu0 }
0x1af0   :  { %v2925_v18 = vadd.f32 %v5818_v28, %v2921_v17  ;;  %v2924_v20 = vmul.f32 0.35355338, %v4718_v11  ;;  %v2932_v22 = vsel %vm238_vm1, %v2926_v16, -inf }
0x1af1   :  { %2933 = vmax.xlane.f32.xlu1 %v2932_v22  ;;  %v2912_v24 = vpop.f32.mrf.mxu0 }
0x1af2   :  { %v2928_v25 = vadd.f32 %v5825_v47, %v2924_v20  ;;  %v2923_v26 = vmul.f32 0.35355338, %v2912_v24  ;;  %v2929_v29 = vsel %vm238_vm1, %v2925_v18, -inf }
0x1af3   :  { %2930 = vmax.xlane.f32.xlu0 %v2929_v29 }
0x1af4   :  { %v2927_v36 = vadd.f32 %v5832_v45, %v2923_v26  ;;  %v2938_v37 = vsel %vm238_vm1, %v2928_v25, -inf }
0x1af6   :  { %v2935_v42 = vsel %vm238_vm1, %v2927_v36, -inf }
0x1af7   :  { %2939 = vmax.xlane.f32.xlu0 %v2938_v37 }
0x1afb   :  { %2936 = vmax.xlane.f32.xlu0 %v2935_v42 }
0x1b02   :  { %2977 = vrot.lane.b32.xlu1 %v5787_v15, %s5086_s29 }
0x1b06   :  { %2975 = vrot.lane.b32.xlu1 %v5777_v52, %s5086_s29 }
0x1b0a   :  { %2973 = vrot.lane.b32.xlu1 %v5779_v35, %s5086_s29 }
0x1b11   :  { %2979 = vrot.lane.b32.xlu0 %v5783_v14, %s5086_s29 }
0x1b7a   :  { %v2934_v43 = vpop.xlane.xlu1 %2933 }
0x1b7b   :  { %v2942_v44 = vsub.f32 %v2926_v16, %v2934_v43 }
0x1b7c   :  { %v2931_v54 = vpop.xlane.xlu0 %2930 }
0x1b7d   :  { %v2947_v46 = vmul.f32 1.442695, %v2942_v44  ;;  %v2941_v4 = vsub.f32 %v2925_v18, %v2931_v54 }
0x1b7e   :  { %v2978_v8 = vpop.permute.xlu1 %2977 }
0x1b7f   :  { %4986 = vpow2.f32 %v2947_v46  ;;  %v2945_v59 = vmul.f32 1.442695, %v2941_v4 }
0x1b80   :  { %v2940_v61 = vpop.xlane.xlu0 %2939 }
0x1b81   :  { %4988 = vpow2.f32 %v2945_v59  ;;  %v2944_v39 = vsub.f32 %v2928_v25, %v2940_v61 }
0x1b82   :  { %v2976_v60 = vpop.permute.xlu1 %2975 }
0x1b83   :  { %v2951_v31 = vmul.f32 1.442695, %v2944_v39 }
0x1b84   :  { %v2937_v6 = vpop.xlane.xlu0 %2936 }
0x1b85   :  { %v2943_v30 = vsub.f32 %v2927_v36, %v2937_v6  ;;  %4990 = vpow2.f32 %v2951_v31 }
0x1b86   :  { %v2974_v2 = vpop.permute.xlu1 %2973 }
0x1b87   :  { %v2949_v34 = vmul.f32 1.442695, %v2943_v30 }
0x1b88   :  { %v2980_v62 = vpop.permute.xlu0 %2979 }
0x1b89   :  { %4719 = vmatprep.subr.mxu1 %v2980_v62  ;;  %4992 = vpow2.f32 %v2949_v34 }
0x1b8a   :  { %4720 = vmatpush3.msra.mxu1 %v2980_v62 }
0x1b8b   :  { %4721 = vmatprep.subr.mxu1 %v2978_v8 }
0x1b8c   :  { %v4987_v63 = vpop.eup %4986  ;;  %4722 = vmatpush3.msra.mxu1 %v2978_v8 }
0x1b8d   :  { %4723 = vmatprep.subr.mxu1 %v2976_v60  ;;  %v2956_v1 = vsel %vm238_vm1, %v4987_v63, 0.0 }
0x1b8e   :  { %v4989_v9 = vpop.eup %4988  ;;  %2957 = vadd.xlane.f32.xlu1 %v2956_v1  ;;  %4724 = vmatpush3.msra.mxu1 %v2976_v60 }
0x1b8f   :  { %4725 = vmatprep.subr.mxu1 %v2974_v2  ;;  %v2953_v3 = vsel %vm238_vm1, %v4989_v9, 0.0 }
0x1b90   :  { %2954 = vadd.xlane.f32.xlu0 %v2953_v3  ;;  %4726 = vmatpush3.msra.mxu1 %v2974_v2 }
0x1b92   :  { %v4991_v21 = vpop.eup %4990 }
0x1b93   :  { %v2962_v50 = vsel %vm238_vm1, %v4991_v21, 0.0 }
0x1b96   :  { %v4993_v10 = vpop.eup %4992 }
0x1b97   :  { %v2959_v13 = vsel %vm238_vm1, %v4993_v10, 0.0 }
0x1b9f   :  { %3094 = vrot.lane.b32.xlu1 %v5787_v15, %s5087_s30 }
0x1ba6   :  { %3096 = vrot.lane.b32.xlu0 %v5783_v14, %s5087_s30 }
0x1bc3   :  { %2963 = vadd.xlane.f32.xlu1 %v2962_v50 }
0x1bc5   :  { %2960 = vadd.xlane.f32.xlu0 %v2959_v13 }
0x1bd4   :  { %3090 = vrot.lane.b32.xlu1 %v5779_v35, %s5087_s30 }
0x1bd8   :  { %3084 = vrot.lane.b32.xlu1 %v5777_v52, %s5088_s13 }
0x1bdb   :  { %3092 = vrot.lane.b32.xlu0 %v5777_v52, %s5087_s30 }
0x1bdc   :  { %3088 = vrot.lane.b32.xlu1 %v5783_v14, %s5088_s13 }
0x1bdf   :  { %3082 = vrot.lane.b32.xlu0 %v5779_v35, %s5088_s13 }
0x1be3   :  { %3086 = vrot.lane.b32.xlu0 %v5787_v15, %s5088_s13  ;;  %s6243_s13 = smov 24  }
0x1c17   :  { %v2958_v33 = vpop.xlane.xlu1 %2957 }
0x1c18   :  { %4994 = vrcp.f32 %v2958_v33 }
0x1c19   :  { %v2955_v16 = vpop.xlane.xlu0 %2954 }
0x1c1a   :  { %4996 = vrcp.f32 %v2955_v16 }
0x1c1b   :  { %v3095_v24 = vpop.permute.xlu1 %3094 }
0x1c1d   :  { %v3097_v17 = vpop.permute.xlu0 %3096 }
0x1c1e   :  { %4733 = vmatprep.subr.msk.mxu1 %vm502_vm2, %v3097_v17 }
0x1c25   :  { %v4995_v11 = vpop.eup %4994 }
0x1c26   :  { %v2968_v22 = vmul.f32 %v4995_v11, %v4987_v63 }
0x1c27   :  { %v4997_v18 = vpop.eup %4996 }
0x1c28   :  { %v2966_v20 = vmul.f32 %v4997_v18, %v4989_v9 }
0x1c2a   :  { %4727 = vmatprep.mubr.msk.f32.mxu1 %vm238_vm1, %v2966_v20 }
0x1c2b   :  { %4728 = vmatmul.mubr.msk.f32.vlgmr.msra.gmra.mxu1 %vm238_vm1, %v2968_v22 }
0x1c2c   :  { %4734 = vmatpush3.xpose.msk.msra.mxu1 %vm502_vm2, %v3097_v17 }
0x1c2d   :  { %4735 = vmatprep.subr.msk.mxu1 %vm502_vm2, %v3095_v24 }
0x1c30   :  { %4736 = vmatpush3.xpose.msk.msra.mxu1 %vm502_vm2, %v3095_v24 }
0x1c4c   :  { %v2964_v25 = vpop.xlane.xlu1 %2963 }
0x1c4d   :  { %4998 = vrcp.f32 %v2964_v25 }
0x1c4e   :  { %v2961_v26 = vpop.xlane.xlu0 %2960 }
0x1c4f   :  { %5000 = vrcp.f32 %v2961_v26 }
0x1c50   :  { %v3091_v36 = vpop.permute.xlu1 %3090 }
0x1c52   :  { %v3093_v29 = vpop.permute.xlu0 %3092 }
0x1c53   :  { %4737 = vmatprep.subr.msk.mxu1 %vm502_vm2, %v3093_v29 }
0x1c54   :  { %4738 = vmatpush3.xpose.msk.msra.mxu1 %vm502_vm2, %v3093_v29  ;;  %v3085_v46 = vpop.permute.xlu1 %3084 }
0x1c55   :  { %4739 = vmatprep.subr.msk.mxu1 %vm502_vm2, %v3091_v36 }
0x1c56   :  { %v3083_v44 = vpop.permute.xlu0 %3082 }
0x1c58   :  { %4740 = vmatpush3.xpose.msk.msra.mxu1 %vm502_vm2, %v3091_v36  ;;  %v3089_v59 = vpop.permute.xlu1 %3088 }
0x1c5a   :  { %v4999_v37 = vpop.eup %4998  ;;  %v3087_v4 = vpop.permute.xlu0 %3086 }
0x1c5b   :  { %v2972_v54 = vmul.f32 %v4999_v37, %v4991_v21 }
0x1c5c   :  { %v5001_v42 = vpop.eup %5000 }
0x1c5d   :  { %v2970_v43 = vmul.f32 %v5001_v42, %v4993_v10 }
0x1c5f   :  { %4730 = vmatprep.mubr.msk.f32.mxu1 %vm238_vm1, %v2970_v43 }
0x1c60   :  { %4731 = vmatmul.mubr.msk.f32.gmra.mxu1 %vm238_vm1, %v2972_v54 }
0x1c61   :  { %4741 = vmatprep.mubr.msk.f32.mxu1 %vm502_vm2, %v3083_v44 }
0x1c64   :  { %4742 = vmatmul.mubr.msk.f32.vlgmr.msra.gmra.mxu1 %vm502_vm2, %v3085_v46 }
0x1c65   :  { %4744 = vmatprep.mubr.msk.f32.mxu1 %vm502_vm2, %v3087_v4 }
0x1c68   :  { %4745 = vmatmul.mubr.msk.f32.gmra.mxu1 %vm502_vm2, %v3089_v59 }
0x1ceb   :  { %v4729_v61 = vpop.f32.mrf.mxu1 }
0x1ced   :  { %v3063_v8 = vpop.f32.mrf.mxu1 }
0x1d20   :  { %v4732_v6 = vpop.f32.mrf.mxu1 }
0x1d22   :  { %v3073_v60 = vpop.f32.mrf.mxu1 }
0x1d24   :  { %v4743_v62 = vpop.f32.mrf.mxu1 }
0x1d25   :  { %v3200_v63 = vmul.f32 0.35355338, %v4743_v62 }
0x1d26   :  { %v3180_v1 = vpop.f32.mrf.mxu1 }
0x1d27   :  { %v3204_v9 = vadd.f32 %v5812_v23, %v3200_v63  ;;  %v3199_v2 = vmul.f32 0.35355338, %v3180_v1  ;;  %v4188_v1 = vld [vmem:[%s6234_s9 + $0x38] sm:$0xff] }
0x1d28   :  { %v4746_v3 = vpop.f32.mrf.mxu1 }
0x1d29   :  { %v3203_v39 = vadd.f32 %v5818_v28, %v3199_v2  ;;  %v3210_v30 = vsel %vm238_vm1, %v3204_v9, -inf  ;;  %v3202_v34 = vmul.f32 0.35355338, %v4746_v3  ;;  %v4186_v2 = vld [vmem:[%s6234_s9 + $0x28] sm:$0xff]  ;;  %v4185_v3 = vld [vmem:[%s6234_s9 + $0x20] sm:$0xff] }
0x1d2a   :  { %3211 = vmax.xlane.f32.xlu1 %v3210_v30  ;;  %v3190_v31 = vpop.f32.mrf.mxu1 }
0x1d2b   :  { %v3201_v21 = vmul.f32 0.35355338, %v3190_v31  ;;  %v3207_v10 = vsel %vm238_vm1, %v3203_v39, -inf  ;;  %v3206_v13 = vadd.f32 %v5825_v47, %v3202_v34 }
0x1d2c   :  { %3208 = vmax.xlane.f32.xlu0 %v3207_v10 }
0x1d2d   :  { %v3205_v50 = vadd.f32 %v5832_v45, %v3201_v21  ;;  %v3216_v23 = vsel %vm238_vm1, %v3206_v13, -inf }
0x1d2f   :  { %v3213_v33 = vsel %vm238_vm1, %v3205_v50, -inf }
0x1d30   :  { %3214 = vmax.xlane.f32.xlu0 %v3213_v33 }
0x1d34   :  { %3217 = vmax.xlane.f32.xlu0 %v3216_v23 }
0x1db3   :  { %v3212_v28 = vpop.xlane.xlu1 %3211 }
0x1db4   :  { %v3220_v16 = vsub.f32 %v3204_v9, %v3212_v28  ;;  %v4187_v9 = vld [vmem:[%s6234_s9 + $0x30] sm:$0xff] }
0x1db5   :  { %v3209_v17 = vpop.xlane.xlu0 %3208 }
0x1db6   :  { %v3225_v11 = vmul.f32 1.442695, %v3220_v16  ;;  %v3219_v18 = vsub.f32 %v3203_v39, %v3209_v17 }
0x1db8   :  { %5002 = vpow2.f32 %v3225_v11  ;;  %v3223_v20 = vmul.f32 1.442695, %v3219_v18 }
0x1db9   :  { %v3215_v22 = vpop.xlane.xlu0 %3214 }
0x1dba   :  { %5004 = vpow2.f32 %v3223_v20  ;;  %v3221_v24 = vsub.f32 %v3205_v50, %v3215_v22 }
0x1dbc   :  { %v3227_v25 = vmul.f32 1.442695, %v3221_v24 }
0x1dbd   :  { %v3218_v45 = vpop.xlane.xlu0 %3217 }
0x1dbe   :  { %5006 = vpow2.f32 %v3227_v25  ;;  %v3222_v47 = vsub.f32 %v3206_v13, %v3218_v45 }
0x1dc0   :  { %v3229_v26 = vmul.f32 1.442695, %v3222_v47 }
0x1dc2   :  { %5008 = vpow2.f32 %v3229_v26 }
0x1dc5   :  { %v5003_v29 = vpop.eup %5002 }
0x1dc6   :  { %v3234_v36 = vsel %vm238_vm1, %v5003_v29, 0.0 }
0x1dc7   :  { %v5005_v37 = vpop.eup %5004  ;;  %3235 = vadd.xlane.f32.xlu1 %v3234_v36 }
0x1dc8   :  { %v3231_v42 = vsel %vm238_vm1, %v5005_v37, 0.0 }
0x1dc9   :  { %3232 = vadd.xlane.f32.xlu0 %v3231_v42 }
0x1dcb   :  { %v5007_v43 = vpop.eup %5006 }
0x1dcc   :  { %v3237_v44 = vsel %vm238_vm1, %v5007_v43, 0.0 }
0x1dcd   :  { %3238 = vadd.xlane.f32.xlu0 %v3237_v44 }
0x1dcf   :  { %v5009_v54 = vpop.eup %5008 }
0x1dd0   :  { %v3240_v46 = vsel %vm238_vm1, %v5009_v54, 0.0 }
0x1dd1   :  { %3241 = vadd.xlane.f32.xlu1 %v3240_v46 }
0x1de2   :  { %3255 = vrot.lane.b32.xlu1 %v5787_v15, %s5089_s14 }
0x1de3   :  { %3257 = vrot.lane.b32.xlu0 %v5783_v14, %s5089_s14 }
0x1de6   :  { %3253 = vrot.lane.b32.xlu1 %v5777_v52, %s5089_s14 }
0x1de7   :  { %3364 = vrot.lane.b32.xlu0 %v5943_v40, %s5090_s15 }
0x1dea   :  { %3251 = vrot.lane.b32.xlu1 %v5779_v35, %s5089_s14 }
0x1deb   :  { %3380 = vrot.lane.b32.xlu0 %v3063_v8, %s6242_s3 }
0x1dee   :  { %3366 = vrot.lane.b32.xlu1 %v5941_v5, %s5090_s15 }
0x1def   :  { %3368 = vrot.lane.b32.xlu0 %v5947_v32, %s5090_s15 }
0x1df2   :  { %3382 = vrot.lane.b32.xlu1 %v4729_v61, %s6242_s3 }
0x1df3   :  { %3384 = vrot.lane.b32.xlu0 %v3073_v60, %s6242_s3 }
0x1df6   :  { %3370 = vrot.lane.b32.xlu1 %v5945_v12, %s5090_s15 }
0x1dfa   :  { %3386 = vrot.lane.b32.xlu1 %v4732_v6, %s6242_s3 }
0x1e50   :  { %v3236_v35 = vpop.xlane.xlu1 %3235 }
0x1e52   :  { %v3233_v52 = vpop.xlane.xlu0 %3232 }
0x1e53   :  { %5010 = vrcp.f32 %v3233_v52 }
0x1e54   :  { %5012 = vrcp.f32 %v3236_v35 }
0x1e56   :  { %v3239_v14 = vpop.xlane.xlu0 %3238 }
0x1e57   :  { %5014 = vrcp.f32 %v3239_v14 }
0x1e5a   :  { %v3242_v15 = vpop.xlane.xlu1 %3241  ;;  %v3258_v5 = vpop.permute.xlu0 %3257 }
0x1e5b   :  { %5016 = vrcp.f32 %v3242_v15  ;;  %4747 = vmatprep.subr.mxu0 %v3258_v5 }
0x1e5c   :  { %4748 = vmatpush3.msra.mxu0 %v3258_v5 }
0x1e5e   :  { %v3256_v40 = vpop.permute.xlu1 %3255  ;;  %v3365_v10 = vpop.permute.xlu0 %3364 }
0x1e5f   :  { %4749 = vmatprep.subr.mxu0 %v3256_v40  ;;  %v3408_v11 = vsel %vm502_vm2, %v5883_v53, %v3365_v10 }
0x1e60   :  { %v5011_v32 = vpop.eup %5010  ;;  %4750 = vmatpush3.msra.mxu0 %v3256_v40 }
0x1e61   :  { %v3244_v4 = vmul.f32 %v5011_v32, %v5005_v37  ;;  %v5013_v12 = vpop.eup %5012 }
0x1e62   :  { %v3254_v59 = vpop.permute.xlu1 %3253  ;;  %v3246_v6 = vmul.f32 %v5013_v12, %v5003_v29  ;;  %v3381_v13 = vpop.permute.xlu0 %3380 }
0x1e63   :  { %4751 = vmatprep.subr.mxu0 %v3254_v59  ;;  %4755 = vmatprep.mubr.msk.f32.mxu0 %vm238_vm1, %v3244_v4  ;;  %v3412_v18 = vsel %vm1651_vm3, %v3408_v11, %v3381_v13  ;;  %v4196_v13 = vld [vmem:[%s6235_s10 + $0x38] sm:$0xff] }
0x1e64   :  { %4752 = vmatpush3.msra.mxu0 %v3254_v59  ;;  %v5015_v61 = vpop.eup %5014  ;;  %4775 = vmatprep.subr.mxu1 %v4196_v13 }
0x1e65   :  { %v3248_v62 = vmul.f32 %v5015_v61, %v5007_v43  ;;  %4776 = vmatpush3.msra.mxu1 %v4196_v13 }
0x1e66   :  { %v3252_v8 = vpop.permute.xlu1 %3251  ;;  %v3369_v23 = vpop.permute.xlu0 %3368 }
0x1e67   :  { %4753 = vmatprep.subr.mxu0 %v3252_v8  ;;  %v3410_v47 = vsel %vm502_vm2, %v5887_v56, %v3369_v23  ;;  %v6076_v56 = vld [vmem:[%s6232_s7 + $0x8] sm:$0xff] }
0x1e68   :  { %v5017_v60 = vpop.eup %5016  ;;  %4754 = vmatpush3.msra.mxu0 %v3252_v8  ;;  %v3529_v43 = vrot.slane %v6076_v56, %v5245_v7  ;;  %v4194_v23 = vld [vmem:[%s6235_s10 + $0x28] sm:$0xff] }
0x1e69   :  { %4756 = vmatmul.mubr.msk.f32.vlgmr.msra.gmra.mxu0 %vm238_vm1, %v3246_v6  ;;  %v3250_v63 = vmul.f32 %v5017_v60, %v5009_v54  ;;  %4761 = vmatprep.subr.mxu0 %v4188_v1 }
0x1e6a   :  { %4758 = vmatprep.mubr.msk.f32.mxu0 %vm238_vm1, %v3248_v62  ;;  %4762 = vmatpush3.msra.mxu0 %v4188_v1  ;;  %v3367_v21 = vpop.permute.xlu1 %3366  ;;  %v3385_v16 = vpop.permute.xlu0 %3384 }
0x1e6b   :  { %4763 = vmatprep.subr.mxu0 %v4187_v9  ;;  %v3409_v20 = vsel %vm502_vm2, %v5881_v49, %v3367_v21  ;;  %v3414_v53 = vsel %vm1651_vm3, %v3410_v47, %v3385_v16 }
0x1e6c   :  { %4764 = vmatpush3.msra.mxu0 %v4187_v9 }
0x1e6d   :  { %4759 = vmatmul.mubr.msk.f32.gmra.mxu0 %vm238_vm1, %v3250_v63  ;;  %4765 = vmatprep.subr.mxu0 %v4186_v2 }
0x1e6e   :  { %4766 = vmatpush3.msra.mxu0 %v4186_v2  ;;  %v3383_v50 = vpop.permute.xlu1 %3382 }
0x1e6f   :  { %4767 = vmatprep.subr.mxu0 %v4185_v3  ;;  %v3413_v24 = vsel %vm1651_vm3, %v3409_v20, %v3383_v50 }
0x1e70   :  { %4768 = vmatpush3.msra.mxu0 %v4185_v3 }
0x1e72   :  { %v3371_v33 = vpop.permute.xlu1 %3370 }
0x1e73   :  { %v3411_v49 = vsel %vm502_vm2, %v5885_v55, %v3371_v33  ;;  %v4195_v33 = vld [vmem:[%s6235_s10 + $0x30] sm:$0xff] }
0x1e74   :  { %4777 = vmatprep.subr.mxu1 %v4195_v33 }
0x1e75   :  { %4778 = vmatpush3.msra.mxu1 %v4195_v33 }
0x1e76   :  { %v3387_v28 = vpop.permute.xlu1 %3386  ;;  %4779 = vmatprep.subr.mxu1 %v4194_v23 }
0x1e77   :  { %v3415_v36 = vsel %vm1651_vm3, %v3411_v49, %v3387_v28  ;;  %v4193_v28 = vld [vmem:[%s6235_s10 + $0x20] sm:$0xff]  ;;  %4780 = vmatpush3.msra.mxu1 %v4194_v23 }
0x1e78   :  { %4781 = vmatprep.subr.mxu1 %v4193_v28 }
0x1e79   :  { %4782 = vmatpush3.msra.mxu1 %v4193_v28 }
0x1f29   :  { %v4757_v39 = vpop.f32.mrf.mxu0 }
0x1f2a   :  { %3398 = vrot.lane.b32.xlu1 %v4757_v39, %s6243_s13 }
0x1f2b   :  { %v3341_v30 = vpop.f32.mrf.mxu0 }
0x1f2c   :  { %3396 = vrot.lane.b32.xlu0 %v3341_v30, %s6243_s13 }
0x1f2d   :  { %v4760_v31 = vpop.f32.mrf.mxu0 }
0x1f2e   :  { %3402 = vrot.lane.b32.xlu1 %v4760_v31, %s6243_s13 }
0x1f2f   :  { %v3351_v34 = vpop.f32.mrf.mxu0 }
0x1f30   :  { %3400 = vrot.lane.b32.xlu0 %v3351_v34, %s6243_s13 }
0x1f9c   :  { %v3399_v17 = vpop.permute.xlu1 %3398 }
0x1f9d   :  { %v3417_v45 = vsel %vm1656_vm4, %v3413_v24, %v3399_v17 }
0x1f9e   :  { %v3397_v22 = vpop.permute.xlu0 %3396 }
0x1f9f   :  { %v3416_v25 = vsel %vm1656_vm4, %v3412_v18, %v3397_v22 }
0x1fa0   :  { %4769 = vmatprep.mubr.msk.f32.mxu0 %vm238_vm1, %v3416_v25  ;;  %v3403_v26 = vpop.permute.xlu1 %3402 }
0x1fa1   :  { %4770 = vmatmul.mubr.msk.f32.vlgmr.msra.gmra.mxu0 %vm238_vm1, %v3417_v45  ;;  %v3419_v42 = vsel %vm1656_vm4, %v3415_v36, %v3403_v26 }
0x1fa2   :  { %v3401_v29 = vpop.permute.xlu0 %3400 }
0x1fa3   :  { %v3418_v37 = vsel %vm1656_vm4, %v3414_v53, %v3401_v29  ;;  %v3589_v29 = vrot.slane %v6076_v56, %v5258_v57 }
0x1fa4   :  { %4772 = vmatprep.mubr.msk.f32.mxu0 %vm238_vm1, %v3418_v37 }
0x1fa5   :  { %4773 = vmatmul.mubr.msk.f32.gmra.mxu0 %vm238_vm1, %v3419_v42 }
0x2061   :  { %v4771_v55 = vpop.f32.mrf.mxu0 }
0x2062   :  { %v3523_v44 = vadd.f32 %v4771_v55, %v5729_v38  ;;  %v3597_v55 = vrot.slane %v6076_v56, %v5261_v58  ;;  %v4208_v58 = vld [vmem:[%s6236_s11 + $0x78] sm:$0xff] }
0x2063   :  { %v3503_v54 = vpop.f32.mrf.mxu0  ;;  %4789 = vmatprep.subr.mxu0 %v4208_v58 }
0x2064   :  { %v6081_v46 = vadd.f32 %v3529_v43, %v3523_v44  ;;  %v3522_v52 = vadd.f32 %v3503_v54, %v5732_v41  ;;  %4790 = vmatpush3.msra.mxu0 %v4208_v58 }
0x2065   :  { %v4774_v35 = vpop.f32.mrf.mxu0 }
0x2066   :  { %v6084_v14 = vadd.f32 %v3529_v43, %v3522_v52  ;;  %v3537_v15 = vsel %vm238_vm1, %v6081_v46, 0.0  ;;  %v3525_v40 = vadd.f32 %v4774_v35, %v5739_v27 }
0x2067   :  { %3538 = vadd.xlane.f32.xlu1 %v3537_v15  ;;  %v3513_v5 = vpop.f32.mrf.mxu0 }
0x2068   :  { %v3524_v7 = vadd.f32 %v3513_v5, %v5742_v51  ;;  %v3534_v38 = vsel %vm238_vm1, %v6084_v14, 0.0  ;;  %v6094_v4 = vadd.f32 %v3529_v43, %v3525_v40 }
0x2069   :  { %3535 = vadd.xlane.f32.xlu0 %v3534_v38 }
0x206a   :  { %v6092_v32 = vadd.f32 %v3529_v43, %v3524_v7  ;;  %v3543_v59 = vsel %vm238_vm1, %v6094_v4, 0.0 }
0x206c   :  { %v3540_v41 = vsel %vm238_vm1, %v6092_v32, 0.0 }
0x206d   :  { %3541 = vadd.xlane.f32.xlu0 %v3540_v41 }
0x2071   :  { %3544 = vadd.xlane.f32.xlu0 %v3543_v59  ;;  %v4207_v59 = vld [vmem:[%s6236_s11 + $0x70] sm:$0xff] }
0x2072   :  { %4791 = vmatprep.subr.mxu0 %v4207_v59 }
0x2073   :  { %4792 = vmatpush3.msra.mxu0 %v4207_v59 }
0x20f0   :  { %v3539_v12 = vpop.xlane.xlu1 %3538 }
0x20f1   :  { %v3547_v27 = vmul.f32 0.03125, %v3539_v12  ;;  %v4206_v12 = vld [vmem:[%s6236_s11 + $0x68] sm:$0xff] }
0x20f2   :  { %v3536_v61 = vpop.xlane.xlu0 %3535  ;;  %4793 = vmatprep.subr.mxu0 %v4206_v12 }
0x20f3   :  { %v3551_v51 = vsub.f32 %v6081_v46, %v3547_v27  ;;  %v3546_v8 = vmul.f32 0.03125, %v3536_v61  ;;  %4794 = vmatpush3.msra.mxu0 %v4206_v12  ;;  %v4205_v27 = vld [vmem:[%s6236_s11 + $0x60] sm:$0xff]  ;;  %v4204_v61 = vld [vmem:[%s6236_s11 + $0x58] sm:$0xff] }
0x20f4   :  { %4795 = vmatprep.subr.mxu0 %v4205_v27 }
0x20f5   :  { %v3550_v6 = vsub.f32 %v6084_v14, %v3546_v8  ;;  %v3555_v60 = vmul.f32 %v3551_v51, %v3551_v51  ;;  %4796 = vmatpush3.msra.mxu0 %v4205_v27  ;;  %v4202_v8 = vld [vmem:[%s6236_s11 + $0x48] sm:$0xff] }
0x20f6   :  { %v3542_v62 = vpop.xlane.xlu0 %3541  ;;  %4797 = vmatprep.subr.mxu0 %v4204_v61 }
0x20f7   :  { %v3548_v63 = vmul.f32 0.03125, %v3542_v62  ;;  %v3561_v1 = vsel %vm238_vm1, %v3555_v60, 0.0  ;;  %v3554_v9 = vmul.f32 %v3550_v6, %v3550_v6  ;;  %4798 = vmatpush3.msra.mxu0 %v4204_v61  ;;  %v3610_v60 = vrot.slane %v6076_v56, %v5715_v19 }
0x20f8   :  { %3562 = vadd.xlane.f32.xlu1 %v3561_v1 }
0x20f9   :  { %v3552_v2 = vsub.f32 %v6092_v32, %v3548_v63  ;;  %v3558_v3 = vsel %vm238_vm1, %v3554_v9, 0.0 }
0x20fa   :  { %3559 = vadd.xlane.f32.xlu0 %v3558_v3  ;;  %v3545_v39 = vpop.xlane.xlu0 %3544 }
0x20fb   :  { %v3549_v30 = vmul.f32 0.03125, %v3545_v39  ;;  %v3556_v31 = vmul.f32 %v3552_v2, %v3552_v2 }
0x20fd   :  { %v3553_v34 = vsub.f32 %v6094_v4, %v3549_v30  ;;  %v3564_v21 = vsel %vm238_vm1, %v3556_v31, 0.0 }
0x20fe   :  { %3565 = vadd.xlane.f32.xlu0 %v3564_v21 }
0x20ff   :  { %v3557_v10 = vmul.f32 %v3553_v34, %v3553_v34 }
0x2101   :  { %v3567_v50 = vsel %vm238_vm1, %v3557_v10, 0.0 }
0x2102   :  { %3568 = vadd.xlane.f32.xlu1 %v3567_v50 }
0x2181   :  { %v3563_v16 = vpop.xlane.xlu1 %3562 }
0x2182   :  { %v3571_v17 = vmul.f32 0.03125, %v3563_v16 }
0x2183   :  { %v3560_v11 = vpop.xlane.xlu0 %3559 }
0x2184   :  { %v3575_v18 = vadd.f32 1e-05, %v3571_v17  ;;  %v3570_v20 = vmul.f32 0.03125, %v3560_v11 }
0x2186   :  { %5018 = vrsqrt.f32 %v3575_v18  ;;  %v3574_v22 = vadd.f32 1e-05, %v3570_v20 }
0x2187   :  { %v3566_v24 = vpop.xlane.xlu0 %3565 }
0x2188   :  { %5020 = vrsqrt.f32 %v3574_v22  ;;  %v3572_v25 = vmul.f32 0.03125, %v3566_v24 }
0x218a   :  { %v3576_v45 = vadd.f32 1e-05, %v3572_v25 }
0x218b   :  { %v3569_v47 = vpop.xlane.xlu1 %3568 }
0x218c   :  { %5022 = vrsqrt.f32 %v3576_v45  ;;  %v3573_v26 = vmul.f32 0.03125, %v3569_v47 }
0x218e   :  { %v3577_v53 = vadd.f32 1e-05, %v3573_v26 }
0x2190   :  { %5024 = vrsqrt.f32 %v3577_v53  ;;  %v3740_v53 = vrot.slane %v6076_v56, %v5724_v0 }
0x2193   :  { %v5019_v49 = vpop.eup %5018 }
0x2194   :  { %v3583_v36 = vmul.f32 %v5019_v49, %v3551_v51  ;;  %v4203_v51 = vld [vmem:[%s6236_s11 + $0x50] sm:$0xff] }
0x2195   :  { %v5021_v37 = vpop.eup %5020  ;;  %4799 = vmatprep.subr.mxu0 %v4203_v51 }
0x2196   :  { %v3582_v42 = vmul.f32 %v5021_v37, %v3550_v6  ;;  %v3591_v43 = vmul.f32 %v3589_v29, %v3583_v36  ;;  %4800 = vmatpush3.msra.mxu0 %v4203_v51  ;;  %v4201_v6 = vld [vmem:[%s6236_s11 + $0x40] sm:$0xff] }
0x2197   :  { %4801 = vmatprep.subr.mxu0 %v4202_v8 }
0x2198   :  { %v3590_v44 = vmul.f32 %v3589_v29, %v3582_v42  ;;  %v3599_v15 = vadd.f32 %v3597_v55, %v3591_v43  ;;  %4802 = vmatpush3.msra.mxu0 %v4202_v8 }
0x2199   :  { %v5023_v54 = vpop.eup %5022  ;;  %4803 = vmatprep.subr.mxu0 %v4201_v6 }
0x219a   :  { %v3598_v52 = vadd.f32 %v3597_v55, %v3590_v44  ;;  %v3584_v35 = vmul.f32 %v5023_v54, %v3552_v2  ;;  %4804 = vmatpush3.msra.mxu0 %v4201_v6 }
0x219c   :  { %4783 = vmatprep.mubr.msk.f32.mxu1 %vm238_vm1, %v3598_v52  ;;  %v3592_v5 = vmul.f32 %v3589_v29, %v3584_v35 }
0x219d   :  { %v5025_v40 = vpop.eup %5024  ;;  %4784 = vmatmul.mubr.msk.f32.vlgmr.msra.gmra.mxu1 %vm238_vm1, %v3599_v15 }
0x219e   :  { %v3600_v7 = vadd.f32 %v3597_v55, %v3592_v5  ;;  %v3585_v57 = vmul.f32 %v5025_v40, %v3553_v34 }
0x21a0   :  { %4786 = vmatprep.mubr.msk.f32.mxu1 %vm238_vm1, %v3600_v7  ;;  %v3593_v38 = vmul.f32 %v3589_v29, %v3585_v57 }
0x21a2   :  { %v3601_v41 = vadd.f32 %v3597_v55, %v3593_v38 }
0x21a4   :  { %4787 = vmatmul.mubr.msk.f32.gmra.mxu1 %vm238_vm1, %v3601_v41 }
0x225d   :  { %v4785_v62 = vpop.f32.mrf.mxu1 }
0x225e   :  { %v3695_v63 = vadd.f32 %v4785_v62, %v3610_v60 }
0x225f   :  { %v3689_v1 = vpop.f32.mrf.mxu1 }
0x2260   :  { %v3713_v9 = vmul.f32 0.70710677, %v3695_v63  ;;  %v3690_v2 = vadd.f32 %v3689_v1, %v3610_v60  ;;  %v3709_v16 = vmul.f32 0.5, %v3695_v63 }
0x2262   :  { %5026 = verf.f32 %v3713_v9  ;;  %v3712_v3 = vmul.f32 0.70710677, %v3690_v2  ;;  %v3708_v23 = vmul.f32 0.5, %v3690_v2  ;;  %v3913_v2 = vld [vmem:[%s6231_s6 + $0x18] sm:$0xff] }
0x2263   :  { %4811 = vmatprep.subr.mxu1 %v3913_v2 }
0x2264   :  { %5028 = verf.f32 %v3712_v3  ;;  %v4788_v39 = vpop.f32.mrf.mxu1  ;;  %v3912_v3 = vld [vmem:[%s6231_s6 + $0x10] sm:$0xff]  ;;  %4812 = vmatpush3.msra.mxu1 %v3913_v2 }
0x2265   :  { %v3705_v30 = vadd.f32 %v4788_v39, %v3610_v60  ;;  %v3911_v39 = vld [vmem:[%s6231_s6 + $0x8] sm:$0xff]  ;;  %4813 = vmatprep.subr.mxu1 %v3912_v3 }
0x2266   :  { %v3699_v31 = vpop.f32.mrf.mxu1  ;;  %4814 = vmatpush3.msra.mxu1 %v3912_v3  ;;  %v5056_v3 = vld [vmem:[%s6226_s1 + $0x10] sm:$0xff] }
0x2267   :  { %v3715_v34 = vmul.f32 0.70710677, %v3705_v30  ;;  %v3700_v21 = vadd.f32 %v3699_v31, %v3610_v60  ;;  %v3711_v45 = vmul.f32 0.5, %v3705_v30  ;;  %v3910_v30 = vld [vmem:[%s6231_s6] sm:$0xff]  ;;  %4815 = vmatprep.subr.mxu1 %v3911_v39 }
0x2268   :  { %4816 = vmatpush3.msra.mxu1 %v3911_v39 }
0x2269   :  { %5030 = verf.f32 %v3715_v34  ;;  %v3714_v10 = vmul.f32 0.70710677, %v3700_v21  ;;  %v3710_v24 = vmul.f32 0.5, %v3700_v21  ;;  %4817 = vmatprep.subr.mxu1 %v3910_v30 }
0x226a   :  { %4818 = vmatpush3.msra.mxu1 %v3910_v30 }
0x226b   :  { %5032 = verf.f32 %v3714_v10 }
0x226f   :  { %v5027_v50 = vpop.eup %5026 }
0x2270   :  { %v3721_v33 = vadd.f32 1.0, %v5027_v50 }
0x2271   :  { %v5029_v13 = vpop.eup %5028 }
0x2272   :  { %v3720_v28 = vadd.f32 1.0, %v5029_v13  ;;  %v3725_v11 = vmul.f32 %v3721_v33, %v3709_v16 }
0x2274   :  { %v3724_v17 = vmul.f32 %v3720_v28, %v3708_v23 }
0x2276   :  { %v5031_v18 = vpop.eup %5030  ;;  %4805 = vmatprep.mubr.msk.f32.mxu0 %vm59_vm0, %v3724_v17 }
0x2277   :  { %4806 = vmatmul.mubr.msk.f32.vlgmr.msra.gmra.mxu0 %vm59_vm0, %v3725_v11  ;;  %v3723_v22 = vadd.f32 1.0, %v5031_v18 }
0x2278   :  { %v5033_v20 = vpop.eup %5032 }
0x2279   :  { %v3722_v25 = vadd.f32 1.0, %v5033_v20  ;;  %v3727_v26 = vmul.f32 %v3723_v22, %v3711_v45  ;;  %v5048_v20 = vld [vmem:[%s6229_s4] sm:$0xff] }
0x227a   :  { %v3897_v22 = vrot.slane %v5048_v20, %v5724_v0 }
0x227b   :  { %v3726_v47 = vmul.f32 %v3722_v25, %v3710_v24 }
0x227d   :  { %4808 = vmatprep.mubr.msk.f32.mxu0 %vm59_vm0, %v3726_v47 }
0x227e   :  { %4809 = vmatmul.mubr.msk.f32.gmra.mxu0 %vm59_vm0, %v3727_v26  ;;  %v3905_v26 = vrot.slane %v5048_v20, %v5715_v19  ;;  %v3916_v19 = vsub.s32 7, %v5219_v48 }
0x2337   :  { %v4807_v49 = vpop.f32.mrf.mxu0 }
0x2338   :  { %v3825_v29 = vadd.f32 %v4807_v49, %v3740_v53 }
0x2339   :  { %v3819_v36 = vpop.f32.mrf.mxu0 }
0x233a   :  { %v3839_v37 = vadd.f32 %v3825_v29, %v6081_v46  ;;  %v3820_v42 = vadd.f32 %v3819_v36, %v3740_v53 }
0x233c   :  { %v3838_v43 = vadd.f32 %v3820_v42, %v6084_v14  ;;  %v3845_v55 = vsel %vm238_vm1, %v3839_v37, 0.0 }
0x233d   :  { %3846 = vadd.xlane.f32.xlu1 %v3845_v55 }
0x233e   :  { %v4810_v44 = vpop.f32.mrf.mxu0  ;;  %v3842_v54 = vsel %vm238_vm1, %v3838_v43, 0.0 }
0x233f   :  { %v3835_v52 = vadd.f32 %v4810_v44, %v3740_v53  ;;  %3843 = vadd.xlane.f32.xlu0 %v3842_v54 }
0x2340   :  { %v3829_v35 = vpop.f32.mrf.mxu0 }
0x2341   :  { %v3841_v15 = vadd.f32 %v3835_v52, %v6094_v4  ;;  %v3830_v56 = vadd.f32 %v3829_v35, %v3740_v53  ;;  %v3917_v52 = vrot.slane %v5048_v20, %v3916_v19 }
0x2343   :  { %v3840_v5 = vadd.f32 %v3830_v56, %v6092_v32  ;;  %v3851_v40 = vsel %vm238_vm1, %v3841_v15, 0.0 }
0x2344   :  { %3852 = vadd.xlane.f32.xlu1 %v3851_v40  ;;  %v5049_v40 = vld [vmem:[%s6225_s0 + $0x8] sm:$0xff] }
0x2345   :  { %v3848_v46 = vsel %vm238_vm1, %v3840_v5, 0.0 }
0x2346   :  { %3849 = vadd.xlane.f32.xlu0 %v3848_v46 }
0x23c6   :  { %v3847_v14 = vpop.xlane.xlu1 %3846 }
0x23c7   :  { %v3855_v7 = vmul.f32 0.03125, %v3847_v14  ;;  %v5050_v14 = vld [vmem:[%s6225_s0] sm:$0xff] }
0x23c8   :  { %v3844_v57 = vpop.xlane.xlu0 %3843 }
0x23c9   :  { %v3859_v38 = vsub.f32 %v3839_v37, %v3855_v7  ;;  %v3854_v41 = vmul.f32 0.03125, %v3844_v57 }
0x23cb   :  { %v3858_v58 = vsub.f32 %v3838_v43, %v3854_v41  ;;  %v3863_v59 = vmul.f32 %v3859_v38, %v3859_v38 }
0x23cd   :  { %v3853_v12 = vpop.xlane.xlu1 %3852  ;;  %v3869_v27 = vsel %vm238_vm1, %v3863_v59, 0.0  ;;  %v3862_v4 = vmul.f32 %v3858_v58, %v3858_v58  ;;  %v5051_v59 = vld [vmem:[%s6226_s1] sm:$0xff] }
0x23ce   :  { %v3857_v61 = vmul.f32 0.03125, %v3853_v12  ;;  %3870 = vadd.xlane.f32.xlu1 %v3869_v27  ;;  %v5052_v27 = vld [vmem:[%s6225_s0 + $0x18] sm:$0xff] }
0x23cf   :  { %v3850_v32 = vpop.xlane.xlu0 %3849  ;;  %v3866_v51 = vsel %vm238_vm1, %v3862_v4, 0.0 }
0x23d0   :  { %v3861_v8 = vsub.f32 %v3841_v15, %v3857_v61  ;;  %v3856_v6 = vmul.f32 0.03125, %v3850_v32  ;;  %3867 = vadd.xlane.f32.xlu0 %v3866_v51  ;;  %v5053_v32 = vld [vmem:[%s6226_s1 + $0x8] sm:$0xff] }
0x23d2   :  { %v3860_v60 = vsub.f32 %v3840_v5, %v3856_v6  ;;  %v3865_v62 = vmul.f32 %v3861_v8, %v3861_v8  ;;  %v5054_v6 = vld [vmem:[%s6225_s0 + $0x10] sm:$0xff]  ;;  %s5093_s0 = smov [#allocation2]  }
0x23d3   :  { %s4052_s13 = sshll.u32 %s5093_s0, 4  ;;  %s4053_s13 = int_to_ptr.vmem [resolvable:$true] %s4052_s13 }
0x23d4   :  { %v3875_v63 = vsel %vm238_vm1, %v3865_v62, 0.0  ;;  %v3864_v1 = vmul.f32 %v3860_v60, %v3860_v60  ;;  %s5057_s11 = scalar_lea.vmem %s4053_s13, 16  ;;  %s5061_s14 = scalar_lea.vmem %s4053_s13, 32 }
0x23d5   :  { %3876 = vadd.xlane.f32.xlu1 %v3875_v63  ;;  %p5058_p0 = scmp.ne.s32.totalorder %s4053_s13, %s5057_s11  ;;  %p5062_p1 = scmp.lt.s32.totalorder %s4053_s13, %s4053_s13 }
0x23d6   :  { %v3872_v9 = vsel %vm238_vm1, %v3864_v1, 0.0  ;;  %p5063_p2 = scmp.lt.s32.totalorder %s5061_s14, %s5057_s11 }
0x23d7   :  { %3873 = vadd.xlane.f32.xlu0 %v3872_v9  ;;  %v5055_v9 = vld [vmem:[%s6226_s1 + $0x18] sm:$0xff] }
0x23d8   :  { %p5064_p3 = por %p5063_p2, %p5062_p1 }
0x23da   :  { %p5065_p4 = pnand %p5064_p3, %p5058_p0 }
0x2457   :  { %v3871_v31 = vpop.xlane.xlu1 %3870 }
0x2458   :  { %v3879_v34 = vmul.f32 0.03125, %v3871_v31 }
0x2459   :  { %v3868_v21 = vpop.xlane.xlu0 %3867 }
0x245a   :  { %v3883_v10 = vadd.f32 1e-05, %v3879_v34  ;;  %v3878_v50 = vmul.f32 0.03125, %v3868_v21 }
0x245c   :  { %5034 = vrsqrt.f32 %v3883_v10  ;;  %v3882_v13 = vadd.f32 1e-05, %v3878_v50 }
0x245e   :  { %5036 = vrsqrt.f32 %v3882_v13  ;;  %v3877_v33 = vpop.xlane.xlu1 %3876 }
0x245f   :  { %v3881_v23 = vmul.f32 0.03125, %v3877_v33 }
0x2460   :  { %v3874_v28 = vpop.xlane.xlu0 %3873 }
0x2461   :  { %v3885_v16 = vadd.f32 1e-05, %v3881_v23  ;;  %v3880_v17 = vmul.f32 0.03125, %v3874_v28 }
0x2463   :  { %5038 = vrsqrt.f32 %v3885_v16  ;;  %v3884_v11 = vadd.f32 1e-05, %v3880_v17 }
0x2465   :  { %5040 = vrsqrt.f32 %v3884_v11 }
0x2469   :  { %v5035_v18 = vpop.eup %5034 }
0x246a   :  { %v3891_v24 = vmul.f32 %v5035_v18, %v3859_v38 }
0x246b   :  { %v5037_v25 = vpop.eup %5036 }
0x246c   :  { %v3890_v45 = vmul.f32 %v5037_v25, %v3858_v58  ;;  %v3899_v47 = vmul.f32 %v3897_v22, %v3891_v24 }
0x246e   :  { %v3898_v53 = vmul.f32 %v3897_v22, %v3890_v45  ;;  %v3907_v36 = vadd.f32 %v3905_v26, %v3899_v47 }
0x2470   :  { %v5039_v49 = vpop.eup %5038  ;;  %v3906_v29 = vadd.f32 %v3905_v26, %v3898_v53 }
0x2471   :  { %v3893_v37 = vmul.f32 %v5039_v49, %v3861_v8 }
0x2472   :  { %v5041_v42 = vpop.eup %5040  ;;  %4819 = vmatprep.mubr.msk.f32.mxu1 %vm238_vm1, %v3906_v29 }
0x2473   :  { %4820 = vmatmul.mubr.msk.f32.vlgmr.msra.gmra.mxu1 %vm238_vm1, %v3907_v36  ;;  %v3892_v43 = vmul.f32 %v5041_v42, %v3860_v60  ;;  %v3901_v55 = vmul.f32 %v3897_v22, %v3893_v37 }
0x2475   :  { %v3900_v44 = vmul.f32 %v3897_v22, %v3892_v43  ;;  %v3909_v54 = vadd.f32 %v3905_v26, %v3901_v55 }
0x2477   :  { %v3908_v0 = vadd.f32 %v3905_v26, %v3900_v44 }
0x2479   :  { %4822 = vmatprep.mubr.msk.f32.mxu1 %vm238_vm1, %v3908_v0 }
0x247a   :  { %4823 = vmatmul.mubr.msk.f32.gmra.mxu1 %vm238_vm1, %v3909_v54 }
0x2533   :  { %v4821_v35 = vpop.f32.mrf.mxu1 }
0x2534   :  { %v4002_v15 = vadd.f32 %v4821_v35, %v3917_v52 }
0x2535   :  { %v3996_v56 = vpop.f32.mrf.mxu1 }
0x2536   :  { %v3997_v5 = vadd.f32 %v3996_v56, %v3917_v52  ;;  %v4016_v46 = vsub.f32 %v4002_v15, %v5049_v40 }
0x2538   :  { %v4015_v7 = vsub.f32 %v3997_v5, %v5050_v14  ;;  %v4020_v41 = vand.u32 2147483647, %v4016_v46 }
0x253a   :  { %v4019_v57 = vand.u32 2147483647, %v4015_v7  ;;  %v4824_v38 = vpop.f32.mrf.mxu1  ;;  %v4024_v51 = vmul.f32 %v5053_v32, %v4020_v41 }
0x253b   :  { %v4012_v58 = vadd.f32 %v4824_v38, %v3917_v52 }
0x253c   :  { %v4006_v48 = vpop.f32.mrf.mxu1  ;;  %v4023_v12 = vmul.f32 %v5051_v59, %v4019_v57  ;;  %v4028_v1 = vsel %vm59_vm0, %v4024_v51, 0.0 }
0x253d   :  { %v4018_v4 = vsub.f32 %v4012_v58, %v5052_v27  ;;  %v4007_v61 = vadd.f32 %v4006_v48, %v3917_v52 }
0x253e   :  { %v4027_v62 = vsel %vm59_vm0, %v4023_v12, 0.0 }
0x253f   :  { %v4022_v8 = vand.u32 2147483647, %v4018_v4  ;;  %v4017_v60 = vsub.f32 %v4007_v61, %v5054_v6  ;;  %v4029_v30 = vadd.f32 %v4028_v1, %v4027_v62 }
0x2541   :  { %v4021_v63 = vand.u32 2147483647, %v4017_v60  ;;  %v4026_v2 = vmul.f32 %v5055_v9, %v4022_v8 }
0x2543   :  { %v4025_v39 = vmul.f32 %v5056_v3, %v4021_v63  ;;  %v4032_v21 = vsel %vm59_vm0, %v4026_v2, 0.0 }
0x2545   :  { %v4030_v31 = vsel %vm59_vm0, %v4025_v39, 0.0 }
0x2546   :  { %v4031_v34 = vadd.f32 %v4030_v31, %v4029_v30 }
0x2548   :  { %v4033_v10 = vadd.f32 %v4032_v21, %v4031_v34 }
0x254a   :  { %4034 = vadd.xlane.f32.xlu0 %v4033_v10 }
0x25d3   :  { %v4035_v50 = vpop.xlane.xlu0 %4034 }
0x25d4   :  { %v4036_v13 = vrot.slane %v4035_v50, 4 }
0x25d6   :  { %v4037_v33 = vadd.f32 %v4036_v13, %v4035_v50 }
0x25d8   :  { %v4038_v23 = vrot.slane %v4037_v33, 2 }
0x25da   :  { %v4039_v28 = vadd.f32 %v4038_v23, %v4037_v33 }
0x25dc   :  { %v4040_v16 = vrot.slane %v4039_v28, 1 }
0x25de   :  { %v4041_v17 = vadd.f32 %v4040_v16, %v4039_v28 }
0x25e0   :  { %4825 = vpush %v4041_v17 }
0x2611   :  { %s4826_s1 = spop %4825 }
0x2612   :  { %s4043_s9 = smul.f32 0.00012207031, %s4826_s1 }
0x2614   :  { %v4044_v11 = vstv %s4043_s9 }
0x2615   :  { %4045 = vst [vmem:[#allocation2] sm:$0x1] %v4044_v11 }
0x2616   :  { %5068 = shalt.err (!%p5065_p4)
}
0x2617   :  { %4055 = dma.vmem_to_hbm [thread:$0]  %s4053_s13, 16, %s6237_s12, [#allocation3]  }
0x2618   :  { %5077 = dma.done.wait [#allocation3], 16  }
0x2619   :  { %5078 = vsyncadd [#allocation3], 4294967280 }
0x261a   :  { %4059 = vsyncpa [#allocation3], 1 }

</bundles_post_ra>
